<compile_context>
chip_gen: v7x
topology: tpu7x:2x2x1
jax: 0.10.0
libtpu: 0.0.40
codegen_flags: <defaults>
</compile_context>

<pallas_src>
import jax
import jax.numpy as jnp
from jax.experimental import pallas as pl
from jax.experimental.pallas import tpu as pltpu

D_MODEL = 64
NUM_HEADS = 8
HEAD_DIM = D_MODEL // NUM_HEADS
FFN_DIM = 32
NUM_LAYERS = 4
SCALING = HEAD_DIM ** -0.5
LN_EPS = 1e-5


# ----------------------------- kernel ---------------------------------------

def _layer_norm(x, gamma, beta):
    mean = jnp.mean(x, axis=-1, keepdims=True)
    var = jnp.mean((x - mean) ** 2, axis=-1, keepdims=True)
    return (x - mean) * jax.lax.rsqrt(var + LN_EPS) * gamma + beta


def _encoder_kernel(h_ref, oq_ref, bias_ref,
                    wqk_ref, bqk_ref, wv_ref, bv_ref, wo_ref, bo_ref,
                    ln1g_ref, ln1b_ref, w1_ref, b1_ref, w2_ref, b2_ref,
                    ln2g_ref, ln2b_ref,
                    out_ref):
    h = h_ref[0]            # (S, D)   hidden states for this batch element
    oq = oq_ref[0]          # (S, D)   object queries (position embeddings)
    bias = bias_ref[0]      # (S, S)   additive attention bias (0 or -inf-ish)
    S, D = h.shape
    H, Hd = NUM_HEADS, HEAD_DIM

    for l in range(NUM_LAYERS):          # all 4 layers fused; h stays in VMEM
        # ----- self attention (head dim carried as a leading batch dim) -----
        hq = h + oq                       # with_pos_embed for query / key
        hq_b = jnp.broadcast_to(hq[None], (H, S, D))
        h_b = jnp.broadcast_to(h[None], (H, S, D))

        # fused Q|K projection: (H,S,D) x (H,2*Hd,D) -> (H,S,2*Hd)
        qk = jnp.einsum('hsd,hed->hse', hq_b, wqk_ref[l],
                        preferred_element_type=jnp.float32) + bqk_ref[l]
        q = qk[..., :Hd] * SCALING        # scale after bias add (matches HF)
        k = qk[..., Hd:]
        # V projection from the ORIGINAL hidden states (no pos-embed)
        v = jnp.einsum('hsd,hed->hse', h_b, wv_ref[l],
                       preferred_element_type=jnp.float32) + bv_ref[l]

        # scores / softmax / context, all heads in one batched op
        s = jnp.einsum('hqd,hkd->hqk', q, k,
                       preferred_element_type=jnp.float32) + bias[None, :, :]
        s = s - jnp.max(s, axis=-1, keepdims=True)
        p = jnp.exp(s)
        p = p * pl.reciprocal(jnp.sum(p, axis=-1, keepdims=True), approx=True)
        ctx = jnp.einsum('hqk,hkd->hqd', p, v,
                         preferred_element_type=jnp.float32)        # (H,S,Hd)

        # head merge folded into the output projection (sum over heads)
        attn = jnp.sum(jnp.einsum('hqd,hde->hqe', ctx, wo_ref[l],
                                  preferred_element_type=jnp.float32),
                       axis=0) + bo_ref[l]                           # (S,D)

        # residual + LayerNorm
        h1 = _layer_norm(h + attn, ln1g_ref[l], ln1b_ref[l])

        # ----- FFN: fc1 -> SiLU -> fc2 -----
        f = jnp.dot(h1, w1_ref[l], preferred_element_type=jnp.float32) + b1_ref[l]
        f = f * jax.nn.sigmoid(f)          # SiLU (module uses SiLU explicitly)
        f = jnp.dot(f, w2_ref[l], preferred_element_type=jnp.float32) + b2_ref[l]

        # residual + LayerNorm
        h = _layer_norm(h1 + f, ln2g_ref[l], ln2b_ref[l])

    out_ref[0] = h.astype(out_ref.dtype)


# ----------------------------- wrappers --------------------------------------

_STACK_ORDER = ("wqk", "bqk", "wv", "bv", "wo", "bo",
                "ln1_g", "ln1_b", "w1", "b1", "w2", "b2", "ln2_g", "ln2_b")


def _pack_params(all_params):
    """Pre-split Q/K/V/out weights per head and stack all layers (plain JAX)."""
    H, Hd = NUM_HEADS, HEAD_DIM

    def per_layer(p):
        # w_h[h, e, d] = W[d, h*Hd + e]  (W stored as [in, out])
        wq_h = p["wq"].T.reshape(H, Hd, D_MODEL)
        wk_h = p["wk"].T.reshape(H, Hd, D_MODEL)
        wqk_h = jnp.concatenate([wq_h, wk_h], axis=1)            # (H, 2*Hd, D)
        bq_h = p["bq"].reshape(H, Hd)[:, None, :]
        bk_h = p["bk"].reshape(H, Hd)[:, None, :]
        bqk_h = jnp.concatenate([bq_h, bk_h], axis=2)            # (H, 1, 2*Hd)
        wv_h = p["wv"].T.reshape(H, Hd, D_MODEL)                 # (H, Hd, D)
        bv_h = p["bv"].reshape(H, Hd)[:, None, :]                # (H, 1, Hd)
        wo_h = p["wo"].reshape(H, Hd, D_MODEL)                   # [h,d,e] = Wo[h*Hd+d, e]
        return dict(wqk=wqk_h, bqk=bqk_h, wv=wv_h, bv=bv_h, wo=wo_h,
                    bo=p["bo"], ln1_g=p["ln1_g"], ln1_b=p["ln1_b"],
                    w1=p["w1"], b1=p["b1"], w2=p["w2"], b2=p["b2"],
                    ln2_g=p["ln2_g"], ln2_b=p["ln2_b"])

    per = [per_layer(p) for p in all_params]
    return [jnp.stack([lp[k] for lp in per], axis=0) for k in _STACK_ORDER]


def expand_mask(mask, dtype=jnp.float32, target_len=None):
    """JAX port of `_expand_mask`, returning [B, S_tgt, S_src] additive bias.
    Note: a fully-masked row yields NaN after softmax, matching PyTorch."""
    B, src = mask.shape
    tgt = target_len if target_len is not None else src
    expanded = jnp.broadcast_to(mask[:, None, :].astype(dtype), (B, tgt, src))
    inverted = 1.0 - expanded
    min_val = jnp.finfo(dtype).min
    return jnp.where(inverted.astype(bool), min_val, inverted)


def detr_encoder(inputs_embeds, attention_mask, object_queries, all_params):
    """DetrEncoder.forward (eval mode): returns (hidden_states,)."""
    B, S, D = inputs_embeds.shape
    hidden = inputs_embeds                       # dropout p=0.0, eval -> identity
    if attention_mask is not None:
        bias = expand_mask(attention_mask, inputs_embeds.dtype)
    else:
        bias = jnp.zeros((B, S, S), inputs_embeds.dtype)
    if object_queries is None:
        object_queries = jnp.zeros_like(inputs_embeds)

    packed = _pack_params(all_params)

    def batched3(s1, s2):
        return pl.BlockSpec((1, s1, s2), lambda b: (b, 0, 0))

    def const_spec(shape):
        nd = len(shape)
        return pl.BlockSpec(shape, lambda b, _nd=nd: (0,) * _nd)

    in_specs = [batched3(S, D), batched3(S, D), batched3(S, S)]
    in_specs += [const_spec(p.shape) for p in packed]
    out_spec = pl.BlockSpec((1, S, D), lambda b: (b, 0, 0))

    out = pl.pallas_call(
        _encoder_kernel,
        out_shape=jax.ShapeDtypeStruct((B, S, D), inputs_embeds.dtype),
        grid_spec=pltpu.PrefetchScalarGridSpec(
            num_scalar_prefetch=0,
            grid=(B,),                      # "parallel": feeds both TCs on v7x
            in_specs=in_specs,
            out_specs=out_spec,
        ),
        compiler_params=pltpu.CompilerParams(
            dimension_semantics=("parallel",)),
    )(hidden, object_queries, bias, *packed)
    return (out,)


# ----------------------------- param init ------------------------------------

def init_layer_params(key):
    ks = jax.random.split(key, 6)
    std = 0.02

    def lin(k, din, dout):
        return (jax.random.normal(k, (din, dout), jnp.float32) * std,
                jnp.zeros((1, dout), jnp.float32))

    wq, bq = lin(ks[0], D_MODEL, D_MODEL)
    wk, bk = lin(ks[1], D_MODEL, D_MODEL)
    wv, bv = lin(ks[2], D_MODEL, D_MODEL)
    wo, bo = lin(ks[3], D_MODEL, D_MODEL)
    w1, b1 = lin(ks[4], D_MODEL, FFN_DIM)
    w2, b2 = lin(ks[5], FFN_DIM, D_MODEL)
    return dict(
        wq=wq, bq=bq, wk=wk, bk=bk, wv=wv, bv=bv, wo=wo, bo=bo,
        ln1_g=jnp.ones((1, D_MODEL), jnp.float32),
        ln1_b=jnp.zeros((1, D_MODEL), jnp.float32),
        w1=w1, b1=b1, w2=w2, b2=b2,
        ln2_g=jnp.ones((1, D_MODEL), jnp.float32),
        ln2_b=jnp.zeros((1, D_MODEL), jnp.float32),
    )


# ----------------------------- main ------------------------------------------

if __name__ == "__main__":
    key = jax.random.PRNGKey(0)
    k_in, k_oq, k_params = jax.random.split(key, 3)

    B, S = 2, 8
    inputs_embeds = jax.random.normal(k_in, (B, S, D_MODEL), jnp.float32)
    object_queries = jax.random.normal(k_oq, (B, S, D_MODEL), jnp.float32)

    # attention_mask: 1 = attend, 0 = masked (last two tokens of batch 1 masked)
    attention_mask = jnp.ones((B, S), jnp.float32)
    attention_mask = attention_mask.at[1, -2:].set(0.0)

    layer_keys = jax.random.split(k_params, NUM_LAYERS)
    all_params = [init_layer_params(k) for k in layer_keys]

    (hidden_states,) = detr_encoder(inputs_embeds, attention_mask,
                                    object_queries, all_params)
    hidden_states = jax.block_until_ready(hidden_states)

    assert hidden_states.shape == (B, S, D_MODEL)
    assert bool(jnp.all(jnp.isfinite(hidden_states)))
    print("KERNEL_OK")
</pallas_src>

<mosaic_0001>
module attributes {stable_mosaic.version = 11 : i64} {
  func.func @_encoder_kernel(%arg0: i32, %arg1: memref<1x8x64xf32, #tpu.memory_space<vmem>>, %arg2: memref<1x8x64xf32, #tpu.memory_space<vmem>>, %arg3: memref<1x8x8xf32, #tpu.memory_space<vmem>>, %arg4: memref<4x8x16x64xf32, #tpu.memory_space<vmem>>, %arg5: memref<4x8x1x16xf32, #tpu.memory_space<vmem>>, %arg6: memref<4x8x8x64xf32, #tpu.memory_space<vmem>>, %arg7: memref<4x8x1x8xf32, #tpu.memory_space<vmem>>, %arg8: memref<4x8x8x64xf32, #tpu.memory_space<vmem>>, %arg9: memref<4x1x64xf32, #tpu.memory_space<vmem>>, %arg10: memref<4x1x64xf32, #tpu.memory_space<vmem>>, %arg11: memref<4x1x64xf32, #tpu.memory_space<vmem>>, %arg12: memref<4x64x32xf32, #tpu.memory_space<vmem>>, %arg13: memref<4x1x32xf32, #tpu.memory_space<vmem>>, %arg14: memref<4x32x64xf32, #tpu.memory_space<vmem>>, %arg15: memref<4x1x64xf32, #tpu.memory_space<vmem>>, %arg16: memref<4x1x64xf32, #tpu.memory_space<vmem>>, %arg17: memref<4x1x64xf32, #tpu.memory_space<vmem>>, %arg18: memref<1x8x64xf32, #tpu.memory_space<vmem>>) attributes {dimension_semantics = [#tpu.dimension_semantics<parallel>], iteration_bounds = array<i64: 2>, scalar_prefetch = 0 : i64, scratch_operands = 0 : i64, tpu.core_type = #tpu.core_type<tc>, window_params = [{transform_indices = @transform_0, window_bounds = array<i64: 1, 8, 64>}, {transform_indices = @transform_1, window_bounds = array<i64: 1, 8, 64>}, {transform_indices = @transform_2, window_bounds = array<i64: 1, 8, 8>}, {pipeline_mode = #tpu.pipeline_mode<synchronous>, transform_indices = @transform_3, window_bounds = array<i64: 4, 8, 16, 64>}, {pipeline_mode = #tpu.pipeline_mode<synchronous>, transform_indices = @transform_4, window_bounds = array<i64: 4, 8, 1, 16>}, {pipeline_mode = #tpu.pipeline_mode<synchronous>, transform_indices = @transform_5, window_bounds = array<i64: 4, 8, 8, 64>}, {pipeline_mode = #tpu.pipeline_mode<synchronous>, transform_indices = @transform_6, window_bounds = array<i64: 4, 8, 1, 8>}, {pipeline_mode = #tpu.pipeline_mode<synchronous>, transform_indices = @transform_7, window_bounds = array<i64: 4, 8, 8, 64>}, {pipeline_mode = #tpu.pipeline_mode<synchronous>, transform_indices = @transform_8, window_bounds = array<i64: 4, 1, 64>}, {pipeline_mode = #tpu.pipeline_mode<synchronous>, transform_indices = @transform_9, window_bounds = array<i64: 4, 1, 64>}, {pipeline_mode = #tpu.pipeline_mode<synchronous>, transform_indices = @transform_10, window_bounds = array<i64: 4, 1, 64>}, {pipeline_mode = #tpu.pipeline_mode<synchronous>, transform_indices = @transform_11, window_bounds = array<i64: 4, 64, 32>}, {pipeline_mode = #tpu.pipeline_mode<synchronous>, transform_indices = @transform_12, window_bounds = array<i64: 4, 1, 32>}, {pipeline_mode = #tpu.pipeline_mode<synchronous>, transform_indices = @transform_13, window_bounds = array<i64: 4, 32, 64>}, {pipeline_mode = #tpu.pipeline_mode<synchronous>, transform_indices = @transform_14, window_bounds = array<i64: 4, 1, 64>}, {pipeline_mode = #tpu.pipeline_mode<synchronous>, transform_indices = @transform_15, window_bounds = array<i64: 4, 1, 64>}, {pipeline_mode = #tpu.pipeline_mode<synchronous>, transform_indices = @transform_16, window_bounds = array<i64: 4, 1, 64>}, {transform_indices = @transform_17, window_bounds = array<i64: 1, 8, 64>}]} {
    %c0 = arith.constant 0 : index
    %c0_0 = arith.constant 0 : index
    %c0_1 = arith.constant 0 : index
    %0 = vector.load %arg1[%c0, %c0_0, %c0_1] : memref<1x8x64xf32, #tpu.memory_space<vmem>>, vector<1x8x64xf32>
    %1 = vector.shape_cast %0 : vector<1x8x64xf32> to vector<8x64xf32>
    %c0_2 = arith.constant 0 : index
    %c0_3 = arith.constant 0 : index
    %c0_4 = arith.constant 0 : index
    %2 = vector.load %arg2[%c0_2, %c0_3, %c0_4] : memref<1x8x64xf32, #tpu.memory_space<vmem>>, vector<1x8x64xf32>
    %3 = vector.shape_cast %2 : vector<1x8x64xf32> to vector<8x64xf32>
    %c0_5 = arith.constant 0 : index
    %c0_6 = arith.constant 0 : index
    %c0_7 = arith.constant 0 : index
    %4 = vector.load %arg3[%c0_5, %c0_6, %c0_7] : memref<1x8x8xf32, #tpu.memory_space<vmem>>, vector<1x8x8xf32>
    %5 = vector.shape_cast %4 : vector<1x8x8xf32> to vector<8x8xf32>
    %6 = arith.addf %1, %3 : vector<8x64xf32>
    %7 = vector.shape_cast %6 : vector<8x64xf32> to vector<1x8x64xf32>
    %8 = vector.shape_cast %7 : vector<1x8x64xf32> to vector<1x8x64xf32>
    %9 = vector.broadcast %8 : vector<1x8x64xf32> to vector<8x8x64xf32>
    %10 = vector.shape_cast %1 : vector<8x64xf32> to vector<1x8x64xf32>
    %11 = vector.shape_cast %10 : vector<1x8x64xf32> to vector<1x8x64xf32>
    %12 = vector.broadcast %11 : vector<1x8x64xf32> to vector<8x8x64xf32>
    %c0_8 = arith.constant 0 : index
    %c0_9 = arith.constant 0 : index
    %c0_10 = arith.constant 0 : index
    %c0_11 = arith.constant 0 : index
    %13 = vector.load %arg4[%c0_8, %c0_9, %c0_10, %c0_11] : memref<4x8x16x64xf32, #tpu.memory_space<vmem>>, vector<1x8x16x64xf32>
    %14 = vector.shape_cast %13 : vector<1x8x16x64xf32> to vector<8x16x64xf32>
    "tpu.trace_start"() <{level = 10 : i32, message = "hsd,hed->hse"}> : () -> ()
    %cst = arith.constant dense<0.000000e+00> : vector<8x8x16xf32>
    %15 = tpu.matmul %9, %14, %cst {dimension_numbers = #tpu.dot_dimension_numbers<[2], [2], [1], [1], [0, 0, 0, 1, 1, 1], [0], [0]>} : vector<8x8x64xf32>, vector<8x16x64xf32>, vector<8x8x16xf32> -> vector<8x8x16xf32>
    "tpu.trace_stop"() : () -> ()
    %c0_12 = arith.constant 0 : index
    %c0_13 = arith.constant 0 : index
    %c0_14 = arith.constant 0 : index
    %c0_15 = arith.constant 0 : index
    %16 = vector.load %arg5[%c0_12, %c0_13, %c0_14, %c0_15] : memref<4x8x1x16xf32, #tpu.memory_space<vmem>>, vector<1x8x1x16xf32>
    %17 = vector.shape_cast %16 : vector<1x8x1x16xf32> to vector<8x1x16xf32>
    %18 = vector.broadcast %17 : vector<8x1x16xf32> to vector<8x8x16xf32>
    %19 = arith.addf %15, %18 : vector<8x8x16xf32>
    %20 = vector.extract_strided_slice %19 {offsets = [0, 0, 0], sizes = [8, 8, 8], strides = [1, 1, 1]} : vector<8x8x16xf32> to vector<8x8x8xf32>
    %cst_16 = arith.constant 0.353553385 : f32
    %21 = vector.broadcast %cst_16 : f32 to vector<8x8x8xf32>
    %22 = arith.mulf %20, %21 : vector<8x8x8xf32>
    %23 = vector.extract_strided_slice %19 {offsets = [0, 0, 8], sizes = [8, 8, 8], strides = [1, 1, 1]} : vector<8x8x16xf32> to vector<8x8x8xf32>
    %c0_17 = arith.constant 0 : index
    %c0_18 = arith.constant 0 : index
    %c0_19 = arith.constant 0 : index
    %c0_20 = arith.constant 0 : index
    %24 = vector.load %arg6[%c0_17, %c0_18, %c0_19, %c0_20] : memref<4x8x8x64xf32, #tpu.memory_space<vmem>>, vector<1x8x8x64xf32>
    %25 = vector.shape_cast %24 : vector<1x8x8x64xf32> to vector<8x8x64xf32>
    "tpu.trace_start"() <{level = 10 : i32, message = "hsd,hed->hse"}> : () -> ()
    %cst_21 = arith.constant dense<0.000000e+00> : vector<8x8x8xf32>
    %26 = tpu.matmul %12, %25, %cst_21 {dimension_numbers = #tpu.dot_dimension_numbers<[2], [2], [1], [1], [0, 0, 0, 1, 1, 1], [0], [0]>} : vector<8x8x64xf32>, vector<8x8x64xf32>, vector<8x8x8xf32> -> vector<8x8x8xf32>
    "tpu.trace_stop"() : () -> ()
    %c0_22 = arith.constant 0 : index
    %c0_23 = arith.constant 0 : index
    %c0_24 = arith.constant 0 : index
    %c0_25 = arith.constant 0 : index
    %27 = vector.load %arg7[%c0_22, %c0_23, %c0_24, %c0_25] : memref<4x8x1x8xf32, #tpu.memory_space<vmem>>, vector<1x8x1x8xf32>
    %28 = vector.shape_cast %27 : vector<1x8x1x8xf32> to vector<8x1x8xf32>
    %29 = vector.broadcast %28 : vector<8x1x8xf32> to vector<8x8x8xf32>
    %30 = arith.addf %26, %29 : vector<8x8x8xf32>
    "tpu.trace_start"() <{level = 10 : i32, message = "hqd,hkd->hqk"}> : () -> ()
    %cst_26 = arith.constant dense<0.000000e+00> : vector<8x8x8xf32>
    %31 = tpu.matmul %22, %23, %cst_26 {dimension_numbers = #tpu.dot_dimension_numbers<[2], [2], [1], [1], [0, 0, 0, 1, 1, 1], [0], [0]>} : vector<8x8x8xf32>, vector<8x8x8xf32>, vector<8x8x8xf32> -> vector<8x8x8xf32>
    "tpu.trace_stop"() : () -> ()
    %32 = vector.shape_cast %5 : vector<8x8xf32> to vector<1x8x8xf32>
    %33 = vector.broadcast %32 : vector<1x8x8xf32> to vector<8x8x8xf32>
    %34 = arith.addf %31, %33 : vector<8x8x8xf32>
    %cst_27 = arith.constant dense<0xFF800000> : vector<8x8xf32>
    %35 = vector.multi_reduction <maximumf>, %34, %cst_27 [2] : vector<8x8x8xf32> to vector<8x8xf32>
    %36 = vector.shape_cast %35 : vector<8x8xf32> to vector<8x8x1xf32>
    %37 = vector.broadcast %36 : vector<8x8x1xf32> to vector<8x8x8xf32>
    %38 = arith.subf %34, %37 : vector<8x8x8xf32>
    %39 = math.exp %38 : vector<8x8x8xf32>
    %cst_28 = arith.constant dense<0.000000e+00> : vector<8x8xf32>
    %40 = vector.multi_reduction <add>, %39, %cst_28 [2] : vector<8x8x8xf32> to vector<8x8xf32>
    %41 = vector.shape_cast %40 : vector<8x8xf32> to vector<8x8x1xf32>
    %42 = tpu.reciprocal %41 {approx = true} : vector<8x8x1xf32> -> vector<8x8x1xf32>
    %43 = vector.broadcast %42 : vector<8x8x1xf32> to vector<8x8x8xf32>
    %44 = arith.mulf %39, %43 : vector<8x8x8xf32>
    "tpu.trace_start"() <{level = 10 : i32, message = "hqk,hkd->hqd"}> : () -> ()
    %cst_29 = arith.constant dense<0.000000e+00> : vector<8x8x8xf32>
    %45 = tpu.matmul %44, %30, %cst_29 {dimension_numbers = #tpu.dot_dimension_numbers<[2], [1], [1], [2], [0, 0, 0, 1, 1, 2], [0], [0]>} : vector<8x8x8xf32>, vector<8x8x8xf32>, vector<8x8x8xf32> -> vector<8x8x8xf32>
    "tpu.trace_stop"() : () -> ()
    %c0_30 = arith.constant 0 : index
    %c0_31 = arith.constant 0 : index
    %c0_32 = arith.constant 0 : index
    %c0_33 = arith.constant 0 : index
    %46 = vector.load %arg8[%c0_30, %c0_31, %c0_32, %c0_33] : memref<4x8x8x64xf32, #tpu.memory_space<vmem>>, vector<1x8x8x64xf32>
    %47 = vector.shape_cast %46 : vector<1x8x8x64xf32> to vector<8x8x64xf32>
    "tpu.trace_start"() <{level = 10 : i32, message = "hqd,hde->hqe"}> : () -> ()
    %cst_34 = arith.constant dense<0.000000e+00> : vector<8x8x64xf32>
    %48 = tpu.matmul %45, %47, %cst_34 {dimension_numbers = #tpu.dot_dimension_numbers<[2], [1], [1], [2], [0, 0, 0, 1, 1, 2], [0], [0]>} : vector<8x8x8xf32>, vector<8x8x64xf32>, vector<8x8x64xf32> -> vector<8x8x64xf32>
    "tpu.trace_stop"() : () -> ()
    %cst_35 = arith.constant dense<0.000000e+00> : vector<8x64xf32>
    %49 = vector.multi_reduction <add>, %48, %cst_35 [0] : vector<8x8x64xf32> to vector<8x64xf32>
    %c0_36 = arith.constant 0 : index
    %c0_37 = arith.constant 0 : index
    %c0_38 = arith.constant 0 : index
    %50 = vector.load %arg9[%c0_36, %c0_37, %c0_38] : memref<4x1x64xf32, #tpu.memory_space<vmem>>, vector<1x1x64xf32>
    %51 = vector.shape_cast %50 : vector<1x1x64xf32> to vector<1x64xf32>
    %52 = vector.broadcast %51 : vector<1x64xf32> to vector<8x64xf32>
    %53 = arith.addf %49, %52 : vector<8x64xf32>
    %54 = arith.addf %1, %53 : vector<8x64xf32>
    %c0_39 = arith.constant 0 : index
    %c0_40 = arith.constant 0 : index
    %c0_41 = arith.constant 0 : index
    %55 = vector.load %arg10[%c0_39, %c0_40, %c0_41] : memref<4x1x64xf32, #tpu.memory_space<vmem>>, vector<1x1x64xf32>
    %56 = vector.shape_cast %55 : vector<1x1x64xf32> to vector<1x64xf32>
    %c0_42 = arith.constant 0 : index
    %c0_43 = arith.constant 0 : index
    %c0_44 = arith.constant 0 : index
    %57 = vector.load %arg11[%c0_42, %c0_43, %c0_44] : memref<4x1x64xf32, #tpu.memory_space<vmem>>, vector<1x1x64xf32>
    %58 = vector.shape_cast %57 : vector<1x1x64xf32> to vector<1x64xf32>
    %cst_45 = arith.constant dense<0.000000e+00> : vector<8xf32>
    %59 = vector.multi_reduction <add>, %54, %cst_45 [1] : vector<8x64xf32> to vector<8xf32>
    %60 = vector.shape_cast %59 : vector<8xf32> to vector<8x1xf32>
    %cst_46 = arith.constant 6.400000e+01 : f32
    %61 = vector.broadcast %cst_46 : f32 to vector<8x1xf32>
    %62 = arith.divf %60, %61 : vector<8x1xf32>
    %63 = vector.broadcast %62 : vector<8x1xf32> to vector<8x64xf32>
    %64 = arith.subf %54, %63 : vector<8x64xf32>
    %65 = arith.mulf %64, %64 : vector<8x64xf32>
    %cst_47 = arith.constant dense<0.000000e+00> : vector<8xf32>
    %66 = vector.multi_reduction <add>, %65, %cst_47 [1] : vector<8x64xf32> to vector<8xf32>
    %67 = vector.shape_cast %66 : vector<8xf32> to vector<8x1xf32>
    %cst_48 = arith.constant 6.400000e+01 : f32
    %68 = vector.broadcast %cst_48 : f32 to vector<8x1xf32>
    %69 = arith.divf %67, %68 : vector<8x1xf32>
    %70 = vector.broadcast %62 : vector<8x1xf32> to vector<8x64xf32>
    %71 = arith.subf %54, %70 : vector<8x64xf32>
    %cst_49 = arith.constant 9.99999974E-6 : f32
    %72 = vector.broadcast %cst_49 : f32 to vector<8x1xf32>
    %73 = arith.addf %69, %72 : vector<8x1xf32>
    %74 = math.rsqrt %73 : vector<8x1xf32>
    %75 = vector.broadcast %74 : vector<8x1xf32> to vector<8x64xf32>
    %76 = arith.mulf %71, %75 : vector<8x64xf32>
    %77 = vector.broadcast %56 : vector<1x64xf32> to vector<8x64xf32>
    %78 = arith.mulf %76, %77 : vector<8x64xf32>
    %79 = vector.broadcast %58 : vector<1x64xf32> to vector<8x64xf32>
    %80 = arith.addf %78, %79 : vector<8x64xf32>
    %c0_50 = arith.constant 0 : index
    %c0_51 = arith.constant 0 : index
    %c0_52 = arith.constant 0 : index
    %81 = vector.load %arg12[%c0_50, %c0_51, %c0_52] : memref<4x64x32xf32, #tpu.memory_space<vmem>>, vector<1x64x32xf32>
    %82 = vector.shape_cast %81 : vector<1x64x32xf32> to vector<64x32xf32>
    %cst_53 = arith.constant dense<0.000000e+00> : vector<8x32xf32>
    %83 = tpu.matmul %80, %82, %cst_53 {dimension_numbers = #tpu.dot_dimension_numbers<[1], [0], [0], [1], [0, 0, 1, 1], [], []>} : vector<8x64xf32>, vector<64x32xf32>, vector<8x32xf32> -> vector<8x32xf32>
    %c0_54 = arith.constant 0 : index
    %c0_55 = arith.constant 0 : index
    %c0_56 = arith.constant 0 : index
    %84 = vector.load %arg13[%c0_54, %c0_55, %c0_56] : memref<4x1x32xf32, #tpu.memory_space<vmem>>, vector<1x1x32xf32>
    %85 = vector.shape_cast %84 : vector<1x1x32xf32> to vector<1x32xf32>
    %86 = vector.broadcast %85 : vector<1x32xf32> to vector<8x32xf32>
    %87 = arith.addf %83, %86 : vector<8x32xf32>
    %88 = arith.negf %87 : vector<8x32xf32>
    %89 = math.exp %88 : vector<8x32xf32>
    %cst_57 = arith.constant 1.000000e+00 : f32
    %90 = vector.broadcast %cst_57 : f32 to vector<8x32xf32>
    %91 = arith.addf %90, %89 : vector<8x32xf32>
    %92 = arith.divf %90, %91 : vector<8x32xf32>
    %93 = arith.mulf %87, %92 : vector<8x32xf32>
    %c0_58 = arith.constant 0 : index
    %c0_59 = arith.constant 0 : index
    %c0_60 = arith.constant 0 : index
    %94 = vector.load %arg14[%c0_58, %c0_59, %c0_60] : memref<4x32x64xf32, #tpu.memory_space<vmem>>, vector<1x32x64xf32>
    %95 = vector.shape_cast %94 : vector<1x32x64xf32> to vector<32x64xf32>
    %cst_61 = arith.constant dense<0.000000e+00> : vector<8x64xf32>
    %96 = tpu.matmul %93, %95, %cst_61 {dimension_numbers = #tpu.dot_dimension_numbers<[1], [0], [0], [1], [0, 0, 1, 1], [], []>} : vector<8x32xf32>, vector<32x64xf32>, vector<8x64xf32> -> vector<8x64xf32>
    %c0_62 = arith.constant 0 : index
    %c0_63 = arith.constant 0 : index
    %c0_64 = arith.constant 0 : index
    %97 = vector.load %arg15[%c0_62, %c0_63, %c0_64] : memref<4x1x64xf32, #tpu.memory_space<vmem>>, vector<1x1x64xf32>
    %98 = vector.shape_cast %97 : vector<1x1x64xf32> to vector<1x64xf32>
    %99 = vector.broadcast %98 : vector<1x64xf32> to vector<8x64xf32>
    %100 = arith.addf %96, %99 : vector<8x64xf32>
    %101 = arith.addf %80, %100 : vector<8x64xf32>
    %c0_65 = arith.constant 0 : index
    %c0_66 = arith.constant 0 : index
    %c0_67 = arith.constant 0 : index
    %102 = vector.load %arg16[%c0_65, %c0_66, %c0_67] : memref<4x1x64xf32, #tpu.memory_space<vmem>>, vector<1x1x64xf32>
    %103 = vector.shape_cast %102 : vector<1x1x64xf32> to vector<1x64xf32>
    %c0_68 = arith.constant 0 : index
    %c0_69 = arith.constant 0 : index
    %c0_70 = arith.constant 0 : index
    %104 = vector.load %arg17[%c0_68, %c0_69, %c0_70] : memref<4x1x64xf32, #tpu.memory_space<vmem>>, vector<1x1x64xf32>
    %105 = vector.shape_cast %104 : vector<1x1x64xf32> to vector<1x64xf32>
    %cst_71 = arith.constant dense<0.000000e+00> : vector<8xf32>
    %106 = vector.multi_reduction <add>, %101, %cst_71 [1] : vector<8x64xf32> to vector<8xf32>
    %107 = vector.shape_cast %106 : vector<8xf32> to vector<8x1xf32>
    %cst_72 = arith.constant 6.400000e+01 : f32
    %108 = vector.broadcast %cst_72 : f32 to vector<8x1xf32>
    %109 = arith.divf %107, %108 : vector<8x1xf32>
    %110 = vector.broadcast %109 : vector<8x1xf32> to vector<8x64xf32>
    %111 = arith.subf %101, %110 : vector<8x64xf32>
    %112 = arith.mulf %111, %111 : vector<8x64xf32>
    %cst_73 = arith.constant dense<0.000000e+00> : vector<8xf32>
    %113 = vector.multi_reduction <add>, %112, %cst_73 [1] : vector<8x64xf32> to vector<8xf32>
    %114 = vector.shape_cast %113 : vector<8xf32> to vector<8x1xf32>
    %cst_74 = arith.constant 6.400000e+01 : f32
    %115 = vector.broadcast %cst_74 : f32 to vector<8x1xf32>
    %116 = arith.divf %114, %115 : vector<8x1xf32>
    %117 = vector.broadcast %109 : vector<8x1xf32> to vector<8x64xf32>
    %118 = arith.subf %101, %117 : vector<8x64xf32>
    %cst_75 = arith.constant 9.99999974E-6 : f32
    %119 = vector.broadcast %cst_75 : f32 to vector<8x1xf32>
    %120 = arith.addf %116, %119 : vector<8x1xf32>
    %121 = math.rsqrt %120 : vector<8x1xf32>
    %122 = vector.broadcast %121 : vector<8x1xf32> to vector<8x64xf32>
    %123 = arith.mulf %118, %122 : vector<8x64xf32>
    %124 = vector.broadcast %103 : vector<1x64xf32> to vector<8x64xf32>
    %125 = arith.mulf %123, %124 : vector<8x64xf32>
    %126 = vector.broadcast %105 : vector<1x64xf32> to vector<8x64xf32>
    %127 = arith.addf %125, %126 : vector<8x64xf32>
    %128 = arith.addf %127, %3 : vector<8x64xf32>
    %129 = vector.shape_cast %128 : vector<8x64xf32> to vector<1x8x64xf32>
    %130 = vector.shape_cast %129 : vector<1x8x64xf32> to vector<1x8x64xf32>
    %131 = vector.broadcast %130 : vector<1x8x64xf32> to vector<8x8x64xf32>
    %132 = vector.shape_cast %127 : vector<8x64xf32> to vector<1x8x64xf32>
    %133 = vector.shape_cast %132 : vector<1x8x64xf32> to vector<1x8x64xf32>
    %134 = vector.broadcast %133 : vector<1x8x64xf32> to vector<8x8x64xf32>
    %c1 = arith.constant 1 : index
    %c0_76 = arith.constant 0 : index
    %c0_77 = arith.constant 0 : index
    %c0_78 = arith.constant 0 : index
    %135 = vector.load %arg4[%c1, %c0_76, %c0_77, %c0_78] : memref<4x8x16x64xf32, #tpu.memory_space<vmem>>, vector<1x8x16x64xf32>
    %136 = vector.shape_cast %135 : vector<1x8x16x64xf32> to vector<8x16x64xf32>
    "tpu.trace_start"() <{level = 10 : i32, message = "hsd,hed->hse"}> : () -> ()
    %cst_79 = arith.constant dense<0.000000e+00> : vector<8x8x16xf32>
    %137 = tpu.matmul %131, %136, %cst_79 {dimension_numbers = #tpu.dot_dimension_numbers<[2], [2], [1], [1], [0, 0, 0, 1, 1, 1], [0], [0]>} : vector<8x8x64xf32>, vector<8x16x64xf32>, vector<8x8x16xf32> -> vector<8x8x16xf32>
    "tpu.trace_stop"() : () -> ()
    %c1_80 = arith.constant 1 : index
    %c0_81 = arith.constant 0 : index
    %c0_82 = arith.constant 0 : index
    %c0_83 = arith.constant 0 : index
    %138 = vector.load %arg5[%c1_80, %c0_81, %c0_82, %c0_83] : memref<4x8x1x16xf32, #tpu.memory_space<vmem>>, vector<1x8x1x16xf32>
    %139 = vector.shape_cast %138 : vector<1x8x1x16xf32> to vector<8x1x16xf32>
    %140 = vector.broadcast %139 : vector<8x1x16xf32> to vector<8x8x16xf32>
    %141 = arith.addf %137, %140 : vector<8x8x16xf32>
    %142 = vector.extract_strided_slice %141 {offsets = [0, 0, 0], sizes = [8, 8, 8], strides = [1, 1, 1]} : vector<8x8x16xf32> to vector<8x8x8xf32>
    %cst_84 = arith.constant 0.353553385 : f32
    %143 = vector.broadcast %cst_84 : f32 to vector<8x8x8xf32>
    %144 = arith.mulf %142, %143 : vector<8x8x8xf32>
    %145 = vector.extract_strided_slice %141 {offsets = [0, 0, 8], sizes = [8, 8, 8], strides = [1, 1, 1]} : vector<8x8x16xf32> to vector<8x8x8xf32>
    %c1_85 = arith.constant 1 : index
    %c0_86 = arith.constant 0 : index
    %c0_87 = arith.constant 0 : index
    %c0_88 = arith.constant 0 : index
    %146 = vector.load %arg6[%c1_85, %c0_86, %c0_87, %c0_88] : memref<4x8x8x64xf32, #tpu.memory_space<vmem>>, vector<1x8x8x64xf32>
    %147 = vector.shape_cast %146 : vector<1x8x8x64xf32> to vector<8x8x64xf32>
    "tpu.trace_start"() <{level = 10 : i32, message = "hsd,hed->hse"}> : () -> ()
    %cst_89 = arith.constant dense<0.000000e+00> : vector<8x8x8xf32>
    %148 = tpu.matmul %134, %147, %cst_89 {dimension_numbers = #tpu.dot_dimension_numbers<[2], [2], [1], [1], [0, 0, 0, 1, 1, 1], [0], [0]>} : vector<8x8x64xf32>, vector<8x8x64xf32>, vector<8x8x8xf32> -> vector<8x8x8xf32>
    "tpu.trace_stop"() : () -> ()
    %c1_90 = arith.constant 1 : index
    %c0_91 = arith.constant 0 : index
    %c0_92 = arith.constant 0 : index
    %c0_93 = arith.constant 0 : index
    %149 = vector.load %arg7[%c1_90, %c0_91, %c0_92, %c0_93] : memref<4x8x1x8xf32, #tpu.memory_space<vmem>>, vector<1x8x1x8xf32>
    %150 = vector.shape_cast %149 : vector<1x8x1x8xf32> to vector<8x1x8xf32>
    %151 = vector.broadcast %150 : vector<8x1x8xf32> to vector<8x8x8xf32>
    %152 = arith.addf %148, %151 : vector<8x8x8xf32>
    "tpu.trace_start"() <{level = 10 : i32, message = "hqd,hkd->hqk"}> : () -> ()
    %cst_94 = arith.constant dense<0.000000e+00> : vector<8x8x8xf32>
    %153 = tpu.matmul %144, %145, %cst_94 {dimension_numbers = #tpu.dot_dimension_numbers<[2], [2], [1], [1], [0, 0, 0, 1, 1, 1], [0], [0]>} : vector<8x8x8xf32>, vector<8x8x8xf32>, vector<8x8x8xf32> -> vector<8x8x8xf32>
    "tpu.trace_stop"() : () -> ()
    %154 = vector.shape_cast %5 : vector<8x8xf32> to vector<1x8x8xf32>
    %155 = vector.broadcast %154 : vector<1x8x8xf32> to vector<8x8x8xf32>
    %156 = arith.addf %153, %155 : vector<8x8x8xf32>
    %cst_95 = arith.constant dense<0xFF800000> : vector<8x8xf32>
    %157 = vector.multi_reduction <maximumf>, %156, %cst_95 [2] : vector<8x8x8xf32> to vector<8x8xf32>
    %158 = vector.shape_cast %157 : vector<8x8xf32> to vector<8x8x1xf32>
    %159 = vector.broadcast %158 : vector<8x8x1xf32> to vector<8x8x8xf32>
    %160 = arith.subf %156, %159 : vector<8x8x8xf32>
    %161 = math.exp %160 : vector<8x8x8xf32>
    %cst_96 = arith.constant dense<0.000000e+00> : vector<8x8xf32>
    %162 = vector.multi_reduction <add>, %161, %cst_96 [2] : vector<8x8x8xf32> to vector<8x8xf32>
    %163 = vector.shape_cast %162 : vector<8x8xf32> to vector<8x8x1xf32>
    %164 = tpu.reciprocal %163 {approx = true} : vector<8x8x1xf32> -> vector<8x8x1xf32>
    %165 = vector.broadcast %164 : vector<8x8x1xf32> to vector<8x8x8xf32>
    %166 = arith.mulf %161, %165 : vector<8x8x8xf32>
    "tpu.trace_start"() <{level = 10 : i32, message = "hqk,hkd->hqd"}> : () -> ()
    %cst_97 = arith.constant dense<0.000000e+00> : vector<8x8x8xf32>
    %167 = tpu.matmul %166, %152, %cst_97 {dimension_numbers = #tpu.dot_dimension_numbers<[2], [1], [1], [2], [0, 0, 0, 1, 1, 2], [0], [0]>} : vector<8x8x8xf32>, vector<8x8x8xf32>, vector<8x8x8xf32> -> vector<8x8x8xf32>
    "tpu.trace_stop"() : () -> ()
    %c1_98 = arith.constant 1 : index
    %c0_99 = arith.constant 0 : index
    %c0_100 = arith.constant 0 : index
    %c0_101 = arith.constant 0 : index
    %168 = vector.load %arg8[%c1_98, %c0_99, %c0_100, %c0_101] : memref<4x8x8x64xf32, #tpu.memory_space<vmem>>, vector<1x8x8x64xf32>
    %169 = vector.shape_cast %168 : vector<1x8x8x64xf32> to vector<8x8x64xf32>
    "tpu.trace_start"() <{level = 10 : i32, message = "hqd,hde->hqe"}> : () -> ()
    %cst_102 = arith.constant dense<0.000000e+00> : vector<8x8x64xf32>
    %170 = tpu.matmul %167, %169, %cst_102 {dimension_numbers = #tpu.dot_dimension_numbers<[2], [1], [1], [2], [0, 0, 0, 1, 1, 2], [0], [0]>} : vector<8x8x8xf32>, vector<8x8x64xf32>, vector<8x8x64xf32> -> vector<8x8x64xf32>
    "tpu.trace_stop"() : () -> ()
    %cst_103 = arith.constant dense<0.000000e+00> : vector<8x64xf32>
    %171 = vector.multi_reduction <add>, %170, %cst_103 [0] : vector<8x8x64xf32> to vector<8x64xf32>
    %c1_104 = arith.constant 1 : index
    %c0_105 = arith.constant 0 : index
    %c0_106 = arith.constant 0 : index
    %172 = vector.load %arg9[%c1_104, %c0_105, %c0_106] : memref<4x1x64xf32, #tpu.memory_space<vmem>>, vector<1x1x64xf32>
    %173 = vector.shape_cast %172 : vector<1x1x64xf32> to vector<1x64xf32>
    %174 = vector.broadcast %173 : vector<1x64xf32> to vector<8x64xf32>
    %175 = arith.addf %171, %174 : vector<8x64xf32>
    %176 = arith.addf %127, %175 : vector<8x64xf32>
    %c1_107 = arith.constant 1 : index
    %c0_108 = arith.constant 0 : index
    %c0_109 = arith.constant 0 : index
    %177 = vector.load %arg10[%c1_107, %c0_108, %c0_109] : memref<4x1x64xf32, #tpu.memory_space<vmem>>, vector<1x1x64xf32>
    %178 = vector.shape_cast %177 : vector<1x1x64xf32> to vector<1x64xf32>
    %c1_110 = arith.constant 1 : index
    %c0_111 = arith.constant 0 : index
    %c0_112 = arith.constant 0 : index
    %179 = vector.load %arg11[%c1_110, %c0_111, %c0_112] : memref<4x1x64xf32, #tpu.memory_space<vmem>>, vector<1x1x64xf32>
    %180 = vector.shape_cast %179 : vector<1x1x64xf32> to vector<1x64xf32>
    %cst_113 = arith.constant dense<0.000000e+00> : vector<8xf32>
    %181 = vector.multi_reduction <add>, %176, %cst_113 [1] : vector<8x64xf32> to vector<8xf32>
    %182 = vector.shape_cast %181 : vector<8xf32> to vector<8x1xf32>
    %cst_114 = arith.constant 6.400000e+01 : f32
    %183 = vector.broadcast %cst_114 : f32 to vector<8x1xf32>
    %184 = arith.divf %182, %183 : vector<8x1xf32>
    %185 = vector.broadcast %184 : vector<8x1xf32> to vector<8x64xf32>
    %186 = arith.subf %176, %185 : vector<8x64xf32>
    %187 = arith.mulf %186, %186 : vector<8x64xf32>
    %cst_115 = arith.constant dense<0.000000e+00> : vector<8xf32>
    %188 = vector.multi_reduction <add>, %187, %cst_115 [1] : vector<8x64xf32> to vector<8xf32>
    %189 = vector.shape_cast %188 : vector<8xf32> to vector<8x1xf32>
    %cst_116 = arith.constant 6.400000e+01 : f32
    %190 = vector.broadcast %cst_116 : f32 to vector<8x1xf32>
    %191 = arith.divf %189, %190 : vector<8x1xf32>
    %192 = vector.broadcast %184 : vector<8x1xf32> to vector<8x64xf32>
    %193 = arith.subf %176, %192 : vector<8x64xf32>
    %cst_117 = arith.constant 9.99999974E-6 : f32
    %194 = vector.broadcast %cst_117 : f32 to vector<8x1xf32>
    %195 = arith.addf %191, %194 : vector<8x1xf32>
    %196 = math.rsqrt %195 : vector<8x1xf32>
    %197 = vector.broadcast %196 : vector<8x1xf32> to vector<8x64xf32>
    %198 = arith.mulf %193, %197 : vector<8x64xf32>
    %199 = vector.broadcast %178 : vector<1x64xf32> to vector<8x64xf32>
    %200 = arith.mulf %198, %199 : vector<8x64xf32>
    %201 = vector.broadcast %180 : vector<1x64xf32> to vector<8x64xf32>
    %202 = arith.addf %200, %201 : vector<8x64xf32>
    %c1_118 = arith.constant 1 : index
    %c0_119 = arith.constant 0 : index
    %c0_120 = arith.constant 0 : index
    %203 = vector.load %arg12[%c1_118, %c0_119, %c0_120] : memref<4x64x32xf32, #tpu.memory_space<vmem>>, vector<1x64x32xf32>
    %204 = vector.shape_cast %203 : vector<1x64x32xf32> to vector<64x32xf32>
    %cst_121 = arith.constant dense<0.000000e+00> : vector<8x32xf32>
    %205 = tpu.matmul %202, %204, %cst_121 {dimension_numbers = #tpu.dot_dimension_numbers<[1], [0], [0], [1], [0, 0, 1, 1], [], []>} : vector<8x64xf32>, vector<64x32xf32>, vector<8x32xf32> -> vector<8x32xf32>
    %c1_122 = arith.constant 1 : index
    %c0_123 = arith.constant 0 : index
    %c0_124 = arith.constant 0 : index
    %206 = vector.load %arg13[%c1_122, %c0_123, %c0_124] : memref<4x1x32xf32, #tpu.memory_space<vmem>>, vector<1x1x32xf32>
    %207 = vector.shape_cast %206 : vector<1x1x32xf32> to vector<1x32xf32>
    %208 = vector.broadcast %207 : vector<1x32xf32> to vector<8x32xf32>
    %209 = arith.addf %205, %208 : vector<8x32xf32>
    %210 = arith.negf %209 : vector<8x32xf32>
    %211 = math.exp %210 : vector<8x32xf32>
    %cst_125 = arith.constant 1.000000e+00 : f32
    %212 = vector.broadcast %cst_125 : f32 to vector<8x32xf32>
    %213 = arith.addf %212, %211 : vector<8x32xf32>
    %214 = arith.divf %212, %213 : vector<8x32xf32>
    %215 = arith.mulf %209, %214 : vector<8x32xf32>
    %c1_126 = arith.constant 1 : index
    %c0_127 = arith.constant 0 : index
    %c0_128 = arith.constant 0 : index
    %216 = vector.load %arg14[%c1_126, %c0_127, %c0_128] : memref<4x32x64xf32, #tpu.memory_space<vmem>>, vector<1x32x64xf32>
    %217 = vector.shape_cast %216 : vector<1x32x64xf32> to vector<32x64xf32>
    %cst_129 = arith.constant dense<0.000000e+00> : vector<8x64xf32>
    %218 = tpu.matmul %215, %217, %cst_129 {dimension_numbers = #tpu.dot_dimension_numbers<[1], [0], [0], [1], [0, 0, 1, 1], [], []>} : vector<8x32xf32>, vector<32x64xf32>, vector<8x64xf32> -> vector<8x64xf32>
    %c1_130 = arith.constant 1 : index
    %c0_131 = arith.constant 0 : index
    %c0_132 = arith.constant 0 : index
    %219 = vector.load %arg15[%c1_130, %c0_131, %c0_132] : memref<4x1x64xf32, #tpu.memory_space<vmem>>, vector<1x1x64xf32>
    %220 = vector.shape_cast %219 : vector<1x1x64xf32> to vector<1x64xf32>
    %221 = vector.broadcast %220 : vector<1x64xf32> to vector<8x64xf32>
    %222 = arith.addf %218, %221 : vector<8x64xf32>
    %223 = arith.addf %202, %222 : vector<8x64xf32>
    %c1_133 = arith.constant 1 : index
    %c0_134 = arith.constant 0 : index
    %c0_135 = arith.constant 0 : index
    %224 = vector.load %arg16[%c1_133, %c0_134, %c0_135] : memref<4x1x64xf32, #tpu.memory_space<vmem>>, vector<1x1x64xf32>
    %225 = vector.shape_cast %224 : vector<1x1x64xf32> to vector<1x64xf32>
    %c1_136 = arith.constant 1 : index
    %c0_137 = arith.constant 0 : index
    %c0_138 = arith.constant 0 : index
    %226 = vector.load %arg17[%c1_136, %c0_137, %c0_138] : memref<4x1x64xf32, #tpu.memory_space<vmem>>, vector<1x1x64xf32>
    %227 = vector.shape_cast %226 : vector<1x1x64xf32> to vector<1x64xf32>
    %cst_139 = arith.constant dense<0.000000e+00> : vector<8xf32>
    %228 = vector.multi_reduction <add>, %223, %cst_139 [1] : vector<8x64xf32> to vector<8xf32>
    %229 = vector.shape_cast %228 : vector<8xf32> to vector<8x1xf32>
    %cst_140 = arith.constant 6.400000e+01 : f32
    %230 = vector.broadcast %cst_140 : f32 to vector<8x1xf32>
    %231 = arith.divf %229, %230 : vector<8x1xf32>
    %232 = vector.broadcast %231 : vector<8x1xf32> to vector<8x64xf32>
    %233 = arith.subf %223, %232 : vector<8x64xf32>
    %234 = arith.mulf %233, %233 : vector<8x64xf32>
    %cst_141 = arith.constant dense<0.000000e+00> : vector<8xf32>
    %235 = vector.multi_reduction <add>, %234, %cst_141 [1] : vector<8x64xf32> to vector<8xf32>
    %236 = vector.shape_cast %235 : vector<8xf32> to vector<8x1xf32>
    %cst_142 = arith.constant 6.400000e+01 : f32
    %237 = vector.broadcast %cst_142 : f32 to vector<8x1xf32>
    %238 = arith.divf %236, %237 : vector<8x1xf32>
    %239 = vector.broadcast %231 : vector<8x1xf32> to vector<8x64xf32>
    %240 = arith.subf %223, %239 : vector<8x64xf32>
    %cst_143 = arith.constant 9.99999974E-6 : f32
    %241 = vector.broadcast %cst_143 : f32 to vector<8x1xf32>
    %242 = arith.addf %238, %241 : vector<8x1xf32>
    %243 = math.rsqrt %242 : vector<8x1xf32>
    %244 = vector.broadcast %243 : vector<8x1xf32> to vector<8x64xf32>
    %245 = arith.mulf %240, %244 : vector<8x64xf32>
    %246 = vector.broadcast %225 : vector<1x64xf32> to vector<8x64xf32>
    %247 = arith.mulf %245, %246 : vector<8x64xf32>
    %248 = vector.broadcast %227 : vector<1x64xf32> to vector<8x64xf32>
    %249 = arith.addf %247, %248 : vector<8x64xf32>
    %250 = arith.addf %249, %3 : vector<8x64xf32>
    %251 = vector.shape_cast %250 : vector<8x64xf32> to vector<1x8x64xf32>
    %252 = vector.shape_cast %251 : vector<1x8x64xf32> to vector<1x8x64xf32>
    %253 = vector.broadcast %252 : vector<1x8x64xf32> to vector<8x8x64xf32>
    %254 = vector.shape_cast %249 : vector<8x64xf32> to vector<1x8x64xf32>
    %255 = vector.shape_cast %254 : vector<1x8x64xf32> to vector<1x8x64xf32>
    %256 = vector.broadcast %255 : vector<1x8x64xf32> to vector<8x8x64xf32>
    %c2 = arith.constant 2 : index
    %c0_144 = arith.constant 0 : index
    %c0_145 = arith.constant 0 : index
    %c0_146 = arith.constant 0 : index
    %257 = vector.load %arg4[%c2, %c0_144, %c0_145, %c0_146] : memref<4x8x16x64xf32, #tpu.memory_space<vmem>>, vector<1x8x16x64xf32>
    %258 = vector.shape_cast %257 : vector<1x8x16x64xf32> to vector<8x16x64xf32>
    "tpu.trace_start"() <{level = 10 : i32, message = "hsd,hed->hse"}> : () -> ()
    %cst_147 = arith.constant dense<0.000000e+00> : vector<8x8x16xf32>
    %259 = tpu.matmul %253, %258, %cst_147 {dimension_numbers = #tpu.dot_dimension_numbers<[2], [2], [1], [1], [0, 0, 0, 1, 1, 1], [0], [0]>} : vector<8x8x64xf32>, vector<8x16x64xf32>, vector<8x8x16xf32> -> vector<8x8x16xf32>
    "tpu.trace_stop"() : () -> ()
    %c2_148 = arith.constant 2 : index
    %c0_149 = arith.constant 0 : index
    %c0_150 = arith.constant 0 : index
    %c0_151 = arith.constant 0 : index
    %260 = vector.load %arg5[%c2_148, %c0_149, %c0_150, %c0_151] : memref<4x8x1x16xf32, #tpu.memory_space<vmem>>, vector<1x8x1x16xf32>
    %261 = vector.shape_cast %260 : vector<1x8x1x16xf32> to vector<8x1x16xf32>
    %262 = vector.broadcast %261 : vector<8x1x16xf32> to vector<8x8x16xf32>
    %263 = arith.addf %259, %262 : vector<8x8x16xf32>
    %264 = vector.extract_strided_slice %263 {offsets = [0, 0, 0], sizes = [8, 8, 8], strides = [1, 1, 1]} : vector<8x8x16xf32> to vector<8x8x8xf32>
    %cst_152 = arith.constant 0.353553385 : f32
    %265 = vector.broadcast %cst_152 : f32 to vector<8x8x8xf32>
    %266 = arith.mulf %264, %265 : vector<8x8x8xf32>
    %267 = vector.extract_strided_slice %263 {offsets = [0, 0, 8], sizes = [8, 8, 8], strides = [1, 1, 1]} : vector<8x8x16xf32> to vector<8x8x8xf32>
    %c2_153 = arith.constant 2 : index
    %c0_154 = arith.constant 0 : index
    %c0_155 = arith.constant 0 : index
    %c0_156 = arith.constant 0 : index
    %268 = vector.load %arg6[%c2_153, %c0_154, %c0_155, %c0_156] : memref<4x8x8x64xf32, #tpu.memory_space<vmem>>, vector<1x8x8x64xf32>
    %269 = vector.shape_cast %268 : vector<1x8x8x64xf32> to vector<8x8x64xf32>
    "tpu.trace_start"() <{level = 10 : i32, message = "hsd,hed->hse"}> : () -> ()
    %cst_157 = arith.constant dense<0.000000e+00> : vector<8x8x8xf32>
    %270 = tpu.matmul %256, %269, %cst_157 {dimension_numbers = #tpu.dot_dimension_numbers<[2], [2], [1], [1], [0, 0, 0, 1, 1, 1], [0], [0]>} : vector<8x8x64xf32>, vector<8x8x64xf32>, vector<8x8x8xf32> -> vector<8x8x8xf32>
    "tpu.trace_stop"() : () -> ()
    %c2_158 = arith.constant 2 : index
    %c0_159 = arith.constant 0 : index
    %c0_160 = arith.constant 0 : index
    %c0_161 = arith.constant 0 : index
    %271 = vector.load %arg7[%c2_158, %c0_159, %c0_160, %c0_161] : memref<4x8x1x8xf32, #tpu.memory_space<vmem>>, vector<1x8x1x8xf32>
    %272 = vector.shape_cast %271 : vector<1x8x1x8xf32> to vector<8x1x8xf32>
    %273 = vector.broadcast %272 : vector<8x1x8xf32> to vector<8x8x8xf32>
    %274 = arith.addf %270, %273 : vector<8x8x8xf32>
    "tpu.trace_start"() <{level = 10 : i32, message = "hqd,hkd->hqk"}> : () -> ()
    %cst_162 = arith.constant dense<0.000000e+00> : vector<8x8x8xf32>
    %275 = tpu.matmul %266, %267, %cst_162 {dimension_numbers = #tpu.dot_dimension_numbers<[2], [2], [1], [1], [0, 0, 0, 1, 1, 1], [0], [0]>} : vector<8x8x8xf32>, vector<8x8x8xf32>, vector<8x8x8xf32> -> vector<8x8x8xf32>
    "tpu.trace_stop"() : () -> ()
    %276 = vector.shape_cast %5 : vector<8x8xf32> to vector<1x8x8xf32>
    %277 = vector.broadcast %276 : vector<1x8x8xf32> to vector<8x8x8xf32>
    %278 = arith.addf %275, %277 : vector<8x8x8xf32>
    %cst_163 = arith.constant dense<0xFF800000> : vector<8x8xf32>
    %279 = vector.multi_reduction <maximumf>, %278, %cst_163 [2] : vector<8x8x8xf32> to vector<8x8xf32>
    %280 = vector.shape_cast %279 : vector<8x8xf32> to vector<8x8x1xf32>
    %281 = vector.broadcast %280 : vector<8x8x1xf32> to vector<8x8x8xf32>
    %282 = arith.subf %278, %281 : vector<8x8x8xf32>
    %283 = math.exp %282 : vector<8x8x8xf32>
    %cst_164 = arith.constant dense<0.000000e+00> : vector<8x8xf32>
    %284 = vector.multi_reduction <add>, %283, %cst_164 [2] : vector<8x8x8xf32> to vector<8x8xf32>
    %285 = vector.shape_cast %284 : vector<8x8xf32> to vector<8x8x1xf32>
    %286 = tpu.reciprocal %285 {approx = true} : vector<8x8x1xf32> -> vector<8x8x1xf32>
    %287 = vector.broadcast %286 : vector<8x8x1xf32> to vector<8x8x8xf32>
    %288 = arith.mulf %283, %287 : vector<8x8x8xf32>
    "tpu.trace_start"() <{level = 10 : i32, message = "hqk,hkd->hqd"}> : () -> ()
    %cst_165 = arith.constant dense<0.000000e+00> : vector<8x8x8xf32>
    %289 = tpu.matmul %288, %274, %cst_165 {dimension_numbers = #tpu.dot_dimension_numbers<[2], [1], [1], [2], [0, 0, 0, 1, 1, 2], [0], [0]>} : vector<8x8x8xf32>, vector<8x8x8xf32>, vector<8x8x8xf32> -> vector<8x8x8xf32>
    "tpu.trace_stop"() : () -> ()
    %c2_166 = arith.constant 2 : index
    %c0_167 = arith.constant 0 : index
    %c0_168 = arith.constant 0 : index
    %c0_169 = arith.constant 0 : index
    %290 = vector.load %arg8[%c2_166, %c0_167, %c0_168, %c0_169] : memref<4x8x8x64xf32, #tpu.memory_space<vmem>>, vector<1x8x8x64xf32>
    %291 = vector.shape_cast %290 : vector<1x8x8x64xf32> to vector<8x8x64xf32>
    "tpu.trace_start"() <{level = 10 : i32, message = "hqd,hde->hqe"}> : () -> ()
    %cst_170 = arith.constant dense<0.000000e+00> : vector<8x8x64xf32>
    %292 = tpu.matmul %289, %291, %cst_170 {dimension_numbers = #tpu.dot_dimension_numbers<[2], [1], [1], [2], [0, 0, 0, 1, 1, 2], [0], [0]>} : vector<8x8x8xf32>, vector<8x8x64xf32>, vector<8x8x64xf32> -> vector<8x8x64xf32>
    "tpu.trace_stop"() : () -> ()
    %cst_171 = arith.constant dense<0.000000e+00> : vector<8x64xf32>
    %293 = vector.multi_reduction <add>, %292, %cst_171 [0] : vector<8x8x64xf32> to vector<8x64xf32>
    %c2_172 = arith.constant 2 : index
    %c0_173 = arith.constant 0 : index
    %c0_174 = arith.constant 0 : index
    %294 = vector.load %arg9[%c2_172, %c0_173, %c0_174] : memref<4x1x64xf32, #tpu.memory_space<vmem>>, vector<1x1x64xf32>
    %295 = vector.shape_cast %294 : vector<1x1x64xf32> to vector<1x64xf32>
    %296 = vector.broadcast %295 : vector<1x64xf32> to vector<8x64xf32>
    %297 = arith.addf %293, %296 : vector<8x64xf32>
    %298 = arith.addf %249, %297 : vector<8x64xf32>
    %c2_175 = arith.constant 2 : index
    %c0_176 = arith.constant 0 : index
    %c0_177 = arith.constant 0 : index
    %299 = vector.load %arg10[%c2_175, %c0_176, %c0_177] : memref<4x1x64xf32, #tpu.memory_space<vmem>>, vector<1x1x64xf32>
    %300 = vector.shape_cast %299 : vector<1x1x64xf32> to vector<1x64xf32>
    %c2_178 = arith.constant 2 : index
    %c0_179 = arith.constant 0 : index
    %c0_180 = arith.constant 0 : index
    %301 = vector.load %arg11[%c2_178, %c0_179, %c0_180] : memref<4x1x64xf32, #tpu.memory_space<vmem>>, vector<1x1x64xf32>
    %302 = vector.shape_cast %301 : vector<1x1x64xf32> to vector<1x64xf32>
    %cst_181 = arith.constant dense<0.000000e+00> : vector<8xf32>
    %303 = vector.multi_reduction <add>, %298, %cst_181 [1] : vector<8x64xf32> to vector<8xf32>
    %304 = vector.shape_cast %303 : vector<8xf32> to vector<8x1xf32>
    %cst_182 = arith.constant 6.400000e+01 : f32
    %305 = vector.broadcast %cst_182 : f32 to vector<8x1xf32>
    %306 = arith.divf %304, %305 : vector<8x1xf32>
    %307 = vector.broadcast %306 : vector<8x1xf32> to vector<8x64xf32>
    %308 = arith.subf %298, %307 : vector<8x64xf32>
    %309 = arith.mulf %308, %308 : vector<8x64xf32>
    %cst_183 = arith.constant dense<0.000000e+00> : vector<8xf32>
    %310 = vector.multi_reduction <add>, %309, %cst_183 [1] : vector<8x64xf32> to vector<8xf32>
    %311 = vector.shape_cast %310 : vector<8xf32> to vector<8x1xf32>
    %cst_184 = arith.constant 6.400000e+01 : f32
    %312 = vector.broadcast %cst_184 : f32 to vector<8x1xf32>
    %313 = arith.divf %311, %312 : vector<8x1xf32>
    %314 = vector.broadcast %306 : vector<8x1xf32> to vector<8x64xf32>
    %315 = arith.subf %298, %314 : vector<8x64xf32>
    %cst_185 = arith.constant 9.99999974E-6 : f32
    %316 = vector.broadcast %cst_185 : f32 to vector<8x1xf32>
    %317 = arith.addf %313, %316 : vector<8x1xf32>
    %318 = math.rsqrt %317 : vector<8x1xf32>
    %319 = vector.broadcast %318 : vector<8x1xf32> to vector<8x64xf32>
    %320 = arith.mulf %315, %319 : vector<8x64xf32>
    %321 = vector.broadcast %300 : vector<1x64xf32> to vector<8x64xf32>
    %322 = arith.mulf %320, %321 : vector<8x64xf32>
    %323 = vector.broadcast %302 : vector<1x64xf32> to vector<8x64xf32>
    %324 = arith.addf %322, %323 : vector<8x64xf32>
    %c2_186 = arith.constant 2 : index
    %c0_187 = arith.constant 0 : index
    %c0_188 = arith.constant 0 : index
    %325 = vector.load %arg12[%c2_186, %c0_187, %c0_188] : memref<4x64x32xf32, #tpu.memory_space<vmem>>, vector<1x64x32xf32>
    %326 = vector.shape_cast %325 : vector<1x64x32xf32> to vector<64x32xf32>
    %cst_189 = arith.constant dense<0.000000e+00> : vector<8x32xf32>
    %327 = tpu.matmul %324, %326, %cst_189 {dimension_numbers = #tpu.dot_dimension_numbers<[1], [0], [0], [1], [0, 0, 1, 1], [], []>} : vector<8x64xf32>, vector<64x32xf32>, vector<8x32xf32> -> vector<8x32xf32>
    %c2_190 = arith.constant 2 : index
    %c0_191 = arith.constant 0 : index
    %c0_192 = arith.constant 0 : index
    %328 = vector.load %arg13[%c2_190, %c0_191, %c0_192] : memref<4x1x32xf32, #tpu.memory_space<vmem>>, vector<1x1x32xf32>
    %329 = vector.shape_cast %328 : vector<1x1x32xf32> to vector<1x32xf32>
    %330 = vector.broadcast %329 : vector<1x32xf32> to vector<8x32xf32>
    %331 = arith.addf %327, %330 : vector<8x32xf32>
    %332 = arith.negf %331 : vector<8x32xf32>
    %333 = math.exp %332 : vector<8x32xf32>
    %cst_193 = arith.constant 1.000000e+00 : f32
    %334 = vector.broadcast %cst_193 : f32 to vector<8x32xf32>
    %335 = arith.addf %334, %333 : vector<8x32xf32>
    %336 = arith.divf %334, %335 : vector<8x32xf32>
    %337 = arith.mulf %331, %336 : vector<8x32xf32>
    %c2_194 = arith.constant 2 : index
    %c0_195 = arith.constant 0 : index
    %c0_196 = arith.constant 0 : index
    %338 = vector.load %arg14[%c2_194, %c0_195, %c0_196] : memref<4x32x64xf32, #tpu.memory_space<vmem>>, vector<1x32x64xf32>
    %339 = vector.shape_cast %338 : vector<1x32x64xf32> to vector<32x64xf32>
    %cst_197 = arith.constant dense<0.000000e+00> : vector<8x64xf32>
    %340 = tpu.matmul %337, %339, %cst_197 {dimension_numbers = #tpu.dot_dimension_numbers<[1], [0], [0], [1], [0, 0, 1, 1], [], []>} : vector<8x32xf32>, vector<32x64xf32>, vector<8x64xf32> -> vector<8x64xf32>
    %c2_198 = arith.constant 2 : index
    %c0_199 = arith.constant 0 : index
    %c0_200 = arith.constant 0 : index
    %341 = vector.load %arg15[%c2_198, %c0_199, %c0_200] : memref<4x1x64xf32, #tpu.memory_space<vmem>>, vector<1x1x64xf32>
    %342 = vector.shape_cast %341 : vector<1x1x64xf32> to vector<1x64xf32>
    %343 = vector.broadcast %342 : vector<1x64xf32> to vector<8x64xf32>
    %344 = arith.addf %340, %343 : vector<8x64xf32>
    %345 = arith.addf %324, %344 : vector<8x64xf32>
    %c2_201 = arith.constant 2 : index
    %c0_202 = arith.constant 0 : index
    %c0_203 = arith.constant 0 : index
    %346 = vector.load %arg16[%c2_201, %c0_202, %c0_203] : memref<4x1x64xf32, #tpu.memory_space<vmem>>, vector<1x1x64xf32>
    %347 = vector.shape_cast %346 : vector<1x1x64xf32> to vector<1x64xf32>
    %c2_204 = arith.constant 2 : index
    %c0_205 = arith.constant 0 : index
    %c0_206 = arith.constant 0 : index
    %348 = vector.load %arg17[%c2_204, %c0_205, %c0_206] : memref<4x1x64xf32, #tpu.memory_space<vmem>>, vector<1x1x64xf32>
    %349 = vector.shape_cast %348 : vector<1x1x64xf32> to vector<1x64xf32>
    %cst_207 = arith.constant dense<0.000000e+00> : vector<8xf32>
    %350 = vector.multi_reduction <add>, %345, %cst_207 [1] : vector<8x64xf32> to vector<8xf32>
    %351 = vector.shape_cast %350 : vector<8xf32> to vector<8x1xf32>
    %cst_208 = arith.constant 6.400000e+01 : f32
    %352 = vector.broadcast %cst_208 : f32 to vector<8x1xf32>
    %353 = arith.divf %351, %352 : vector<8x1xf32>
    %354 = vector.broadcast %353 : vector<8x1xf32> to vector<8x64xf32>
    %355 = arith.subf %345, %354 : vector<8x64xf32>
    %356 = arith.mulf %355, %355 : vector<8x64xf32>
    %cst_209 = arith.constant dense<0.000000e+00> : vector<8xf32>
    %357 = vector.multi_reduction <add>, %356, %cst_209 [1] : vector<8x64xf32> to vector<8xf32>
    %358 = vector.shape_cast %357 : vector<8xf32> to vector<8x1xf32>
    %cst_210 = arith.constant 6.400000e+01 : f32
    %359 = vector.broadcast %cst_210 : f32 to vector<8x1xf32>
    %360 = arith.divf %358, %359 : vector<8x1xf32>
    %361 = vector.broadcast %353 : vector<8x1xf32> to vector<8x64xf32>
    %362 = arith.subf %345, %361 : vector<8x64xf32>
    %cst_211 = arith.constant 9.99999974E-6 : f32
    %363 = vector.broadcast %cst_211 : f32 to vector<8x1xf32>
    %364 = arith.addf %360, %363 : vector<8x1xf32>
    %365 = math.rsqrt %364 : vector<8x1xf32>
    %366 = vector.broadcast %365 : vector<8x1xf32> to vector<8x64xf32>
    %367 = arith.mulf %362, %366 : vector<8x64xf32>
    %368 = vector.broadcast %347 : vector<1x64xf32> to vector<8x64xf32>
    %369 = arith.mulf %367, %368 : vector<8x64xf32>
    %370 = vector.broadcast %349 : vector<1x64xf32> to vector<8x64xf32>
    %371 = arith.addf %369, %370 : vector<8x64xf32>
    %372 = arith.addf %371, %3 : vector<8x64xf32>
    %373 = vector.shape_cast %372 : vector<8x64xf32> to vector<1x8x64xf32>
    %374 = vector.shape_cast %373 : vector<1x8x64xf32> to vector<1x8x64xf32>
    %375 = vector.broadcast %374 : vector<1x8x64xf32> to vector<8x8x64xf32>
    %376 = vector.shape_cast %371 : vector<8x64xf32> to vector<1x8x64xf32>
    %377 = vector.shape_cast %376 : vector<1x8x64xf32> to vector<1x8x64xf32>
    %378 = vector.broadcast %377 : vector<1x8x64xf32> to vector<8x8x64xf32>
    %c3 = arith.constant 3 : index
    %c0_212 = arith.constant 0 : index
    %c0_213 = arith.constant 0 : index
    %c0_214 = arith.constant 0 : index
    %379 = vector.load %arg4[%c3, %c0_212, %c0_213, %c0_214] : memref<4x8x16x64xf32, #tpu.memory_space<vmem>>, vector<1x8x16x64xf32>
    %380 = vector.shape_cast %379 : vector<1x8x16x64xf32> to vector<8x16x64xf32>
    "tpu.trace_start"() <{level = 10 : i32, message = "hsd,hed->hse"}> : () -> ()
    %cst_215 = arith.constant dense<0.000000e+00> : vector<8x8x16xf32>
    %381 = tpu.matmul %375, %380, %cst_215 {dimension_numbers = #tpu.dot_dimension_numbers<[2], [2], [1], [1], [0, 0, 0, 1, 1, 1], [0], [0]>} : vector<8x8x64xf32>, vector<8x16x64xf32>, vector<8x8x16xf32> -> vector<8x8x16xf32>
    "tpu.trace_stop"() : () -> ()
    %c3_216 = arith.constant 3 : index
    %c0_217 = arith.constant 0 : index
    %c0_218 = arith.constant 0 : index
    %c0_219 = arith.constant 0 : index
    %382 = vector.load %arg5[%c3_216, %c0_217, %c0_218, %c0_219] : memref<4x8x1x16xf32, #tpu.memory_space<vmem>>, vector<1x8x1x16xf32>
    %383 = vector.shape_cast %382 : vector<1x8x1x16xf32> to vector<8x1x16xf32>
    %384 = vector.broadcast %383 : vector<8x1x16xf32> to vector<8x8x16xf32>
    %385 = arith.addf %381, %384 : vector<8x8x16xf32>
    %386 = vector.extract_strided_slice %385 {offsets = [0, 0, 0], sizes = [8, 8, 8], strides = [1, 1, 1]} : vector<8x8x16xf32> to vector<8x8x8xf32>
    %cst_220 = arith.constant 0.353553385 : f32
    %387 = vector.broadcast %cst_220 : f32 to vector<8x8x8xf32>
    %388 = arith.mulf %386, %387 : vector<8x8x8xf32>
    %389 = vector.extract_strided_slice %385 {offsets = [0, 0, 8], sizes = [8, 8, 8], strides = [1, 1, 1]} : vector<8x8x16xf32> to vector<8x8x8xf32>
    %c3_221 = arith.constant 3 : index
    %c0_222 = arith.constant 0 : index
    %c0_223 = arith.constant 0 : index
    %c0_224 = arith.constant 0 : index
    %390 = vector.load %arg6[%c3_221, %c0_222, %c0_223, %c0_224] : memref<4x8x8x64xf32, #tpu.memory_space<vmem>>, vector<1x8x8x64xf32>
    %391 = vector.shape_cast %390 : vector<1x8x8x64xf32> to vector<8x8x64xf32>
    "tpu.trace_start"() <{level = 10 : i32, message = "hsd,hed->hse"}> : () -> ()
    %cst_225 = arith.constant dense<0.000000e+00> : vector<8x8x8xf32>
    %392 = tpu.matmul %378, %391, %cst_225 {dimension_numbers = #tpu.dot_dimension_numbers<[2], [2], [1], [1], [0, 0, 0, 1, 1, 1], [0], [0]>} : vector<8x8x64xf32>, vector<8x8x64xf32>, vector<8x8x8xf32> -> vector<8x8x8xf32>
    "tpu.trace_stop"() : () -> ()
    %c3_226 = arith.constant 3 : index
    %c0_227 = arith.constant 0 : index
    %c0_228 = arith.constant 0 : index
    %c0_229 = arith.constant 0 : index
    %393 = vector.load %arg7[%c3_226, %c0_227, %c0_228, %c0_229] : memref<4x8x1x8xf32, #tpu.memory_space<vmem>>, vector<1x8x1x8xf32>
    %394 = vector.shape_cast %393 : vector<1x8x1x8xf32> to vector<8x1x8xf32>
    %395 = vector.broadcast %394 : vector<8x1x8xf32> to vector<8x8x8xf32>
    %396 = arith.addf %392, %395 : vector<8x8x8xf32>
    "tpu.trace_start"() <{level = 10 : i32, message = "hqd,hkd->hqk"}> : () -> ()
    %cst_230 = arith.constant dense<0.000000e+00> : vector<8x8x8xf32>
    %397 = tpu.matmul %388, %389, %cst_230 {dimension_numbers = #tpu.dot_dimension_numbers<[2], [2], [1], [1], [0, 0, 0, 1, 1, 1], [0], [0]>} : vector<8x8x8xf32>, vector<8x8x8xf32>, vector<8x8x8xf32> -> vector<8x8x8xf32>
    "tpu.trace_stop"() : () -> ()
    %398 = vector.shape_cast %5 : vector<8x8xf32> to vector<1x8x8xf32>
    %399 = vector.broadcast %398 : vector<1x8x8xf32> to vector<8x8x8xf32>
    %400 = arith.addf %397, %399 : vector<8x8x8xf32>
    %cst_231 = arith.constant dense<0xFF800000> : vector<8x8xf32>
    %401 = vector.multi_reduction <maximumf>, %400, %cst_231 [2] : vector<8x8x8xf32> to vector<8x8xf32>
    %402 = vector.shape_cast %401 : vector<8x8xf32> to vector<8x8x1xf32>
    %403 = vector.broadcast %402 : vector<8x8x1xf32> to vector<8x8x8xf32>
    %404 = arith.subf %400, %403 : vector<8x8x8xf32>
    %405 = math.exp %404 : vector<8x8x8xf32>
    %cst_232 = arith.constant dense<0.000000e+00> : vector<8x8xf32>
    %406 = vector.multi_reduction <add>, %405, %cst_232 [2] : vector<8x8x8xf32> to vector<8x8xf32>
    %407 = vector.shape_cast %406 : vector<8x8xf32> to vector<8x8x1xf32>
    %408 = tpu.reciprocal %407 {approx = true} : vector<8x8x1xf32> -> vector<8x8x1xf32>
    %409 = vector.broadcast %408 : vector<8x8x1xf32> to vector<8x8x8xf32>
    %410 = arith.mulf %405, %409 : vector<8x8x8xf32>
    "tpu.trace_start"() <{level = 10 : i32, message = "hqk,hkd->hqd"}> : () -> ()
    %cst_233 = arith.constant dense<0.000000e+00> : vector<8x8x8xf32>
    %411 = tpu.matmul %410, %396, %cst_233 {dimension_numbers = #tpu.dot_dimension_numbers<[2], [1], [1], [2], [0, 0, 0, 1, 1, 2], [0], [0]>} : vector<8x8x8xf32>, vector<8x8x8xf32>, vector<8x8x8xf32> -> vector<8x8x8xf32>
    "tpu.trace_stop"() : () -> ()
    %c3_234 = arith.constant 3 : index
    %c0_235 = arith.constant 0 : index
    %c0_236 = arith.constant 0 : index
    %c0_237 = arith.constant 0 : index
    %412 = vector.load %arg8[%c3_234, %c0_235, %c0_236, %c0_237] : memref<4x8x8x64xf32, #tpu.memory_space<vmem>>, vector<1x8x8x64xf32>
    %413 = vector.shape_cast %412 : vector<1x8x8x64xf32> to vector<8x8x64xf32>
    "tpu.trace_start"() <{level = 10 : i32, message = "hqd,hde->hqe"}> : () -> ()
    %cst_238 = arith.constant dense<0.000000e+00> : vector<8x8x64xf32>
    %414 = tpu.matmul %411, %413, %cst_238 {dimension_numbers = #tpu.dot_dimension_numbers<[2], [1], [1], [2], [0, 0, 0, 1, 1, 2], [0], [0]>} : vector<8x8x8xf32>, vector<8x8x64xf32>, vector<8x8x64xf32> -> vector<8x8x64xf32>
    "tpu.trace_stop"() : () -> ()
    %cst_239 = arith.constant dense<0.000000e+00> : vector<8x64xf32>
    %415 = vector.multi_reduction <add>, %414, %cst_239 [0] : vector<8x8x64xf32> to vector<8x64xf32>
    %c3_240 = arith.constant 3 : index
    %c0_241 = arith.constant 0 : index
    %c0_242 = arith.constant 0 : index
    %416 = vector.load %arg9[%c3_240, %c0_241, %c0_242] : memref<4x1x64xf32, #tpu.memory_space<vmem>>, vector<1x1x64xf32>
    %417 = vector.shape_cast %416 : vector<1x1x64xf32> to vector<1x64xf32>
    %418 = vector.broadcast %417 : vector<1x64xf32> to vector<8x64xf32>
    %419 = arith.addf %415, %418 : vector<8x64xf32>
    %420 = arith.addf %371, %419 : vector<8x64xf32>
    %c3_243 = arith.constant 3 : index
    %c0_244 = arith.constant 0 : index
    %c0_245 = arith.constant 0 : index
    %421 = vector.load %arg10[%c3_243, %c0_244, %c0_245] : memref<4x1x64xf32, #tpu.memory_space<vmem>>, vector<1x1x64xf32>
    %422 = vector.shape_cast %421 : vector<1x1x64xf32> to vector<1x64xf32>
    %c3_246 = arith.constant 3 : index
    %c0_247 = arith.constant 0 : index
    %c0_248 = arith.constant 0 : index
    %423 = vector.load %arg11[%c3_246, %c0_247, %c0_248] : memref<4x1x64xf32, #tpu.memory_space<vmem>>, vector<1x1x64xf32>
    %424 = vector.shape_cast %423 : vector<1x1x64xf32> to vector<1x64xf32>
    %cst_249 = arith.constant dense<0.000000e+00> : vector<8xf32>
    %425 = vector.multi_reduction <add>, %420, %cst_249 [1] : vector<8x64xf32> to vector<8xf32>
    %426 = vector.shape_cast %425 : vector<8xf32> to vector<8x1xf32>
    %cst_250 = arith.constant 6.400000e+01 : f32
    %427 = vector.broadcast %cst_250 : f32 to vector<8x1xf32>
    %428 = arith.divf %426, %427 : vector<8x1xf32>
    %429 = vector.broadcast %428 : vector<8x1xf32> to vector<8x64xf32>
    %430 = arith.subf %420, %429 : vector<8x64xf32>
    %431 = arith.mulf %430, %430 : vector<8x64xf32>
    %cst_251 = arith.constant dense<0.000000e+00> : vector<8xf32>
    %432 = vector.multi_reduction <add>, %431, %cst_251 [1] : vector<8x64xf32> to vector<8xf32>
    %433 = vector.shape_cast %432 : vector<8xf32> to vector<8x1xf32>
    %cst_252 = arith.constant 6.400000e+01 : f32
    %434 = vector.broadcast %cst_252 : f32 to vector<8x1xf32>
    %435 = arith.divf %433, %434 : vector<8x1xf32>
    %436 = vector.broadcast %428 : vector<8x1xf32> to vector<8x64xf32>
    %437 = arith.subf %420, %436 : vector<8x64xf32>
    %cst_253 = arith.constant 9.99999974E-6 : f32
    %438 = vector.broadcast %cst_253 : f32 to vector<8x1xf32>
    %439 = arith.addf %435, %438 : vector<8x1xf32>
    %440 = math.rsqrt %439 : vector<8x1xf32>
    %441 = vector.broadcast %440 : vector<8x1xf32> to vector<8x64xf32>
    %442 = arith.mulf %437, %441 : vector<8x64xf32>
    %443 = vector.broadcast %422 : vector<1x64xf32> to vector<8x64xf32>
    %444 = arith.mulf %442, %443 : vector<8x64xf32>
    %445 = vector.broadcast %424 : vector<1x64xf32> to vector<8x64xf32>
    %446 = arith.addf %444, %445 : vector<8x64xf32>
    %c3_254 = arith.constant 3 : index
    %c0_255 = arith.constant 0 : index
    %c0_256 = arith.constant 0 : index
    %447 = vector.load %arg12[%c3_254, %c0_255, %c0_256] : memref<4x64x32xf32, #tpu.memory_space<vmem>>, vector<1x64x32xf32>
    %448 = vector.shape_cast %447 : vector<1x64x32xf32> to vector<64x32xf32>
    %cst_257 = arith.constant dense<0.000000e+00> : vector<8x32xf32>
    %449 = tpu.matmul %446, %448, %cst_257 {dimension_numbers = #tpu.dot_dimension_numbers<[1], [0], [0], [1], [0, 0, 1, 1], [], []>} : vector<8x64xf32>, vector<64x32xf32>, vector<8x32xf32> -> vector<8x32xf32>
    %c3_258 = arith.constant 3 : index
    %c0_259 = arith.constant 0 : index
    %c0_260 = arith.constant 0 : index
    %450 = vector.load %arg13[%c3_258, %c0_259, %c0_260] : memref<4x1x32xf32, #tpu.memory_space<vmem>>, vector<1x1x32xf32>
    %451 = vector.shape_cast %450 : vector<1x1x32xf32> to vector<1x32xf32>
    %452 = vector.broadcast %451 : vector<1x32xf32> to vector<8x32xf32>
    %453 = arith.addf %449, %452 : vector<8x32xf32>
    %454 = arith.negf %453 : vector<8x32xf32>
    %455 = math.exp %454 : vector<8x32xf32>
    %cst_261 = arith.constant 1.000000e+00 : f32
    %456 = vector.broadcast %cst_261 : f32 to vector<8x32xf32>
    %457 = arith.addf %456, %455 : vector<8x32xf32>
    %458 = arith.divf %456, %457 : vector<8x32xf32>
    %459 = arith.mulf %453, %458 : vector<8x32xf32>
    %c3_262 = arith.constant 3 : index
    %c0_263 = arith.constant 0 : index
    %c0_264 = arith.constant 0 : index
    %460 = vector.load %arg14[%c3_262, %c0_263, %c0_264] : memref<4x32x64xf32, #tpu.memory_space<vmem>>, vector<1x32x64xf32>
    %461 = vector.shape_cast %460 : vector<1x32x64xf32> to vector<32x64xf32>
    %cst_265 = arith.constant dense<0.000000e+00> : vector<8x64xf32>
    %462 = tpu.matmul %459, %461, %cst_265 {dimension_numbers = #tpu.dot_dimension_numbers<[1], [0], [0], [1], [0, 0, 1, 1], [], []>} : vector<8x32xf32>, vector<32x64xf32>, vector<8x64xf32> -> vector<8x64xf32>
    %c3_266 = arith.constant 3 : index
    %c0_267 = arith.constant 0 : index
    %c0_268 = arith.constant 0 : index
    %463 = vector.load %arg15[%c3_266, %c0_267, %c0_268] : memref<4x1x64xf32, #tpu.memory_space<vmem>>, vector<1x1x64xf32>
    %464 = vector.shape_cast %463 : vector<1x1x64xf32> to vector<1x64xf32>
    %465 = vector.broadcast %464 : vector<1x64xf32> to vector<8x64xf32>
    %466 = arith.addf %462, %465 : vector<8x64xf32>
    %467 = arith.addf %446, %466 : vector<8x64xf32>
    %c3_269 = arith.constant 3 : index
    %c0_270 = arith.constant 0 : index
    %c0_271 = arith.constant 0 : index
    %468 = vector.load %arg16[%c3_269, %c0_270, %c0_271] : memref<4x1x64xf32, #tpu.memory_space<vmem>>, vector<1x1x64xf32>
    %469 = vector.shape_cast %468 : vector<1x1x64xf32> to vector<1x64xf32>
    %c3_272 = arith.constant 3 : index
    %c0_273 = arith.constant 0 : index
    %c0_274 = arith.constant 0 : index
    %470 = vector.load %arg17[%c3_272, %c0_273, %c0_274] : memref<4x1x64xf32, #tpu.memory_space<vmem>>, vector<1x1x64xf32>
    %471 = vector.shape_cast %470 : vector<1x1x64xf32> to vector<1x64xf32>
    %cst_275 = arith.constant dense<0.000000e+00> : vector<8xf32>
    %472 = vector.multi_reduction <add>, %467, %cst_275 [1] : vector<8x64xf32> to vector<8xf32>
    %473 = vector.shape_cast %472 : vector<8xf32> to vector<8x1xf32>
    %cst_276 = arith.constant 6.400000e+01 : f32
    %474 = vector.broadcast %cst_276 : f32 to vector<8x1xf32>
    %475 = arith.divf %473, %474 : vector<8x1xf32>
    %476 = vector.broadcast %475 : vector<8x1xf32> to vector<8x64xf32>
    %477 = arith.subf %467, %476 : vector<8x64xf32>
    %478 = arith.mulf %477, %477 : vector<8x64xf32>
    %cst_277 = arith.constant dense<0.000000e+00> : vector<8xf32>
    %479 = vector.multi_reduction <add>, %478, %cst_277 [1] : vector<8x64xf32> to vector<8xf32>
    %480 = vector.shape_cast %479 : vector<8xf32> to vector<8x1xf32>
    %cst_278 = arith.constant 6.400000e+01 : f32
    %481 = vector.broadcast %cst_278 : f32 to vector<8x1xf32>
    %482 = arith.divf %480, %481 : vector<8x1xf32>
    %483 = vector.broadcast %475 : vector<8x1xf32> to vector<8x64xf32>
    %484 = arith.subf %467, %483 : vector<8x64xf32>
    %cst_279 = arith.constant 9.99999974E-6 : f32
    %485 = vector.broadcast %cst_279 : f32 to vector<8x1xf32>
    %486 = arith.addf %482, %485 : vector<8x1xf32>
    %487 = math.rsqrt %486 : vector<8x1xf32>
    %488 = vector.broadcast %487 : vector<8x1xf32> to vector<8x64xf32>
    %489 = arith.mulf %484, %488 : vector<8x64xf32>
    %490 = vector.broadcast %469 : vector<1x64xf32> to vector<8x64xf32>
    %491 = arith.mulf %489, %490 : vector<8x64xf32>
    %492 = vector.broadcast %471 : vector<1x64xf32> to vector<8x64xf32>
    %493 = arith.addf %491, %492 : vector<8x64xf32>
    %c0_280 = arith.constant 0 : index
    %c0_281 = arith.constant 0 : index
    %c0_282 = arith.constant 0 : index
    %494 = vector.load %arg18[%c0_280, %c0_281, %c0_282] : memref<1x8x64xf32, #tpu.memory_space<vmem>>, vector<1x8x64xf32>
    %495 = vector.shape_cast %494 : vector<1x8x64xf32> to vector<8x64xf32>
    %496 = vector.shape_cast %493 : vector<8x64xf32> to vector<1x8x64xf32>
    tpu.vector_store %arg18[%c0_280, %c0_281, %c0_282], %496 {strides = array<i32>} : memref<1x8x64xf32, #tpu.memory_space<vmem>>, vector<1x8x64xf32>,
    return
  }
  func.func @transform_0(%arg0: i32) -> (i32, i32, i32) {
    %c0_i32 = arith.constant 0 : i32
    %c0_i32_0 = arith.constant 0 : i32
    %c0_i32_1 = arith.constant 0 : i32
    return %arg0, %c0_i32, %c0_i32_0 : i32, i32, i32
  }
  func.func @transform_1(%arg0: i32) -> (i32, i32, i32) {
    %c0_i32 = arith.constant 0 : i32
    %c0_i32_0 = arith.constant 0 : i32
    %c0_i32_1 = arith.constant 0 : i32
    return %arg0, %c0_i32, %c0_i32_0 : i32, i32, i32
  }
  func.func @transform_2(%arg0: i32) -> (i32, i32, i32) {
    %c0_i32 = arith.constant 0 : i32
    %c0_i32_0 = arith.constant 0 : i32
    %c0_i32_1 = arith.constant 0 : i32
    return %arg0, %c0_i32, %c0_i32_0 : i32, i32, i32
  }
  func.func @transform_3(%arg0: i32) -> (i32, i32, i32, i32) {
    %c0_i32 = arith.constant 0 : i32
    %c0_i32_0 = arith.constant 0 : i32
    %c0_i32_1 = arith.constant 0 : i32
    %c0_i32_2 = arith.constant 0 : i32
    %c0_i32_3 = arith.constant 0 : i32
    return %c0_i32, %c0_i32_0, %c0_i32_1, %c0_i32_2 : i32, i32, i32, i32
  }
  func.func @transform_4(%arg0: i32) -> (i32, i32, i32, i32) {
    %c0_i32 = arith.constant 0 : i32
    %c0_i32_0 = arith.constant 0 : i32
    %c0_i32_1 = arith.constant 0 : i32
    %c0_i32_2 = arith.constant 0 : i32
    %c0_i32_3 = arith.constant 0 : i32
    return %c0_i32, %c0_i32_0, %c0_i32_1, %c0_i32_2 : i32, i32, i32, i32
  }
  func.func @transform_5(%arg0: i32) -> (i32, i32, i32, i32) {
    %c0_i32 = arith.constant 0 : i32
    %c0_i32_0 = arith.constant 0 : i32
    %c0_i32_1 = arith.constant 0 : i32
    %c0_i32_2 = arith.constant 0 : i32
    %c0_i32_3 = arith.constant 0 : i32
    return %c0_i32, %c0_i32_0, %c0_i32_1, %c0_i32_2 : i32, i32, i32, i32
  }
  func.func @transform_6(%arg0: i32) -> (i32, i32, i32, i32) {
    %c0_i32 = arith.constant 0 : i32
    %c0_i32_0 = arith.constant 0 : i32
    %c0_i32_1 = arith.constant 0 : i32
    %c0_i32_2 = arith.constant 0 : i32
    %c0_i32_3 = arith.constant 0 : i32
    return %c0_i32, %c0_i32_0, %c0_i32_1, %c0_i32_2 : i32, i32, i32, i32
  }
  func.func @transform_7(%arg0: i32) -> (i32, i32, i32, i32) {
    %c0_i32 = arith.constant 0 : i32
    %c0_i32_0 = arith.constant 0 : i32
    %c0_i32_1 = arith.constant 0 : i32
    %c0_i32_2 = arith.constant 0 : i32
    %c0_i32_3 = arith.constant 0 : i32
    return %c0_i32, %c0_i32_0, %c0_i32_1, %c0_i32_2 : i32, i32, i32, i32
  }
  func.func @transform_8(%arg0: i32) -> (i32, i32, i32) {
    %c0_i32 = arith.constant 0 : i32
    %c0_i32_0 = arith.constant 0 : i32
    %c0_i32_1 = arith.constant 0 : i32
    %c0_i32_2 = arith.constant 0 : i32
    return %c0_i32, %c0_i32_0, %c0_i32_1 : i32, i32, i32
  }
  func.func @transform_9(%arg0: i32) -> (i32, i32, i32) {
    %c0_i32 = arith.constant 0 : i32
    %c0_i32_0 = arith.constant 0 : i32
    %c0_i32_1 = arith.constant 0 : i32
    %c0_i32_2 = arith.constant 0 : i32
    return %c0_i32, %c0_i32_0, %c0_i32_1 : i32, i32, i32
  }
  func.func @transform_10(%arg0: i32) -> (i32, i32, i32) {
    %c0_i32 = arith.constant 0 : i32
    %c0_i32_0 = arith.constant 0 : i32
    %c0_i32_1 = arith.constant 0 : i32
    %c0_i32_2 = arith.constant 0 : i32
    return %c0_i32, %c0_i32_0, %c0_i32_1 : i32, i32, i32
  }
  func.func @transform_11(%arg0: i32) -> (i32, i32, i32) {
    %c0_i32 = arith.constant 0 : i32
    %c0_i32_0 = arith.constant 0 : i32
    %c0_i32_1 = arith.constant 0 : i32
    %c0_i32_2 = arith.constant 0 : i32
    return %c0_i32, %c0_i32_0, %c0_i32_1 : i32, i32, i32
  }
  func.func @transform_12(%arg0: i32) -> (i32, i32, i32) {
    %c0_i32 = arith.constant 0 : i32
    %c0_i32_0 = arith.constant 0 : i32
    %c0_i32_1 = arith.constant 0 : i32
    %c0_i32_2 = arith.constant 0 : i32
    return %c0_i32, %c0_i32_0, %c0_i32_1 : i32, i32, i32
  }
  func.func @transform_13(%arg0: i32) -> (i32, i32, i32) {
    %c0_i32 = arith.constant 0 : i32
    %c0_i32_0 = arith.constant 0 : i32
    %c0_i32_1 = arith.constant 0 : i32
    %c0_i32_2 = arith.constant 0 : i32
    return %c0_i32, %c0_i32_0, %c0_i32_1 : i32, i32, i32
  }
  func.func @transform_14(%arg0: i32) -> (i32, i32, i32) {
    %c0_i32 = arith.constant 0 : i32
    %c0_i32_0 = arith.constant 0 : i32
    %c0_i32_1 = arith.constant 0 : i32
    %c0_i32_2 = arith.constant 0 : i32
    return %c0_i32, %c0_i32_0, %c0_i32_1 : i32, i32, i32
  }
  func.func @transform_15(%arg0: i32) -> (i32, i32, i32) {
    %c0_i32 = arith.constant 0 : i32
    %c0_i32_0 = arith.constant 0 : i32
    %c0_i32_1 = arith.constant 0 : i32
    %c0_i32_2 = arith.constant 0 : i32
    return %c0_i32, %c0_i32_0, %c0_i32_1 : i32, i32, i32
  }
  func.func @transform_16(%arg0: i32) -> (i32, i32, i32) {
    %c0_i32 = arith.constant 0 : i32
    %c0_i32_0 = arith.constant 0 : i32
    %c0_i32_1 = arith.constant 0 : i32
    %c0_i32_2 = arith.constant 0 : i32
    return %c0_i32, %c0_i32_0, %c0_i32_1 : i32, i32, i32
  }
  func.func @transform_17(%arg0: i32) -> (i32, i32, i32) {
    %c0_i32 = arith.constant 0 : i32
    %c0_i32_0 = arith.constant 0 : i32
    %c0_i32_1 = arith.constant 0 : i32
    return %arg0, %c0_i32, %c0_i32_0 : i32, i32, i32
  }
}

</mosaic_0001>

<bundles_post_ra>
// kernel: tpu_custom_call.1
= control target key start
LH: loop header
LB: loop body
LE: loop exit
PB: predicated region body
PF: predicated region fallthrough
CT: control target
= control target key end

     0   :  { %s19422_s0 = inlined_call_operand.vmem [shape: f32[2,8,64], index: 0, kind: input, shape index: {}]   ;;  %s19423_s1 = inlined_call_operand.hbm [shape: f32[2,8,64], index: 1, kind: input, shape index: {}]   ;;  %s19424_s2 = inlined_call_operand.hbm [shape: f32[2,8,8], index: 2, kind: input, shape index: {}]   ;;  %s19425_s3 = inlined_call_operand.hbm [shape: f32[4,8,16,64], index: 3, kind: input, shape index: {}]   ;;  %s19426_s4 = inlined_call_operand.hbm [shape: f32[4,8,1,16], index: 4, kind: input, shape index: {}]   ;;  %s19427_s5 = inlined_call_operand.vmem [shape: f32[4,8,8,64], index: 5, kind: input, shape index: {}]   ;;  %s19428_s6 = inlined_call_operand.hbm [shape: f32[4,8,1,8], index: 6, kind: input, shape index: {}]   ;;  %s19429_s7 = inlined_call_operand.hbm [shape: f32[4,8,8,64], index: 7, kind: input, shape index: {}]   ;;  %s19430_s8 = inlined_call_operand.vmem [shape: f32[4,1,64], index: 8, kind: input, shape index: {}]   ;;  %s19431_s9 = inlined_call_operand.vmem [shape: f32[4,1,64], index: 9, kind: input, shape index: {}]   ;;  %s19432_s10 = inlined_call_operand.vmem [shape: f32[4,1,64], index: 10, kind: input, shape index: {}]   ;;  %s19433_s11 = inlined_call_operand.vmem [shape: f32[4,64,32], index: 11, kind: input, shape index: {}]   ;;  %s19434_s12 = inlined_call_operand.vmem [shape: f32[4,1,32], index: 12, kind: input, shape index: {}]   ;;  %s19435_s13 = inlined_call_operand.vmem [shape: f32[4,32,64], index: 13, kind: input, shape index: {}]   ;;  %s19436_s14 = inlined_call_operand.vmem [shape: f32[4,1,64], index: 14, kind: input, shape index: {}]   ;;  %s19437_s15 = inlined_call_operand.vmem [shape: f32[4,1,64], index: 15, kind: input, shape index: {}]   ;;  %s19438_s16 = inlined_call_operand.vmem [shape: f32[4,1,64], index: 16, kind: input, shape index: {}]   ;;  %s19439_s17 = inlined_call_operand.hbm [shape: f32[2,8,64], index: 17, kind: output, shape index: {}]  }
   0x1   :  { %19457 = sst [smem:[#allocation22_spill]] %s19422_s0 }
   0x2   :  { %19458 = sst [smem:[#allocation23_spill]] %s19423_s1 }
   0x3   :  { %19459 = sst [smem:[#allocation24_spill]] %s19424_s2 }
   0x4   :  { %19460 = sst [smem:[#allocation25_spill]] %s19425_s3 }
   0x5   :  { %19461 = sst [smem:[#allocation26_spill]] %s19426_s4 }
   0x6   :  { %19462 = sst [smem:[#allocation27_spill]] %s19428_s6 }
   0x7   :  { %19463 = sst [smem:[#allocation28_spill]] %s19429_s7 }
   0x8   :  { %19464 = sst [smem:[#allocation29_spill]] %s19432_s10 }
   0x9   :  { %19465 = sst [smem:[#allocation30_spill]] %s19434_s12 }
   0xa   :  { %19466 = sst [smem:[#allocation31_spill]] %s19435_s13 }
   0xb   :  { %19467 = sst [smem:[#allocation32_spill]] %s19436_s14 }
   0xc   :  { %19468 = sst [smem:[#allocation33_spill]] %s19437_s15 }
   0xd   :  { %19469 = sst [smem:[#allocation34_spill]] %s19438_s16 }
   0xe   :  { %19470 = sst [smem:[#allocation35_spill]] %s19439_s17 }
   0xf   :  { %22 = vsyncpa [#allocation3], 0 }
  0x10   :  { %24 = vsyncpa [#allocation3 + $0x1], 0 }
  0x11   :  { %25 = vsyncpa [#allocation6], 0 }
  0x12   :  { %27 = vsyncpa [#allocation6 + $0x1], 0 }
  0x13   :  { %28 = vsyncpa [#allocation9], 0 }
  0x14   :  { %29 = vsyncpa [#allocation12], 0 }
  0x15   :  { %30 = vsyncpa [#allocation4], 0 }
  0x16   :  { %32 = vsyncpa [#allocation4 + $0x1], 0  ;;  %s17571_s24 = smov 0   ;;  %s17573_s25 = smov 0  }
  0x17   :  { %s17575_s26 = smov 0   ;;  %s17577_s27 = smov 0  }
  0x18 LB: > { %19471 = sst [smem:[#allocation20_spill]] %s17460_s26  ;;  %s17466_s28 = smov [#allocation7]   ;;  %s17464_s27 = sphi %s17577_s27, %s19516_s27   ;;  %s17460_s26 = sphi %s17575_s26, %s19513_s26   ;;  %s17456_s25 = sphi %s17573_s25, %s19515_s25   ;;  %s17452_s24 = sphi %s17571_s24, %s19514_s24  }
  0x19   : > { %s453_s29 = sshll.u32 %s17466_s28, 4  ;;  %s17592_s0 = sadd.s32 4294967295, %s17464_s27   ;;  %s17597_s29 = int_to_ptr.vmem [resolvable:$true] %s453_s29 }
  0x1a   : > { %p14856_p0 = scmp.ge.s32.totalorder %s17464_s27, 1  ;;  %p19449_p1 = scmp.eq.s32.totalorder %s17592_s0, 0 }
  0x1b   : > { %p441_p2 = scmp.lt.s32.totalorder %s17464_s27, 3  ;;  %s17467_s18 = smov [#allocation8]  }
  0x1c   : > { %s466_s19 = sshll.u32 %s17467_s18, 4  ;;  %s17468_s20 = smov [#allocation10]   ;;  %s17612_s19 = int_to_ptr.vmem [resolvable:$true] %s466_s19 }
  0x1d   : > { %p17599_p3 = pnand %p14856_p0, %p441_p2  ;;  %s17614_s21 = sshll.u32 %s17468_s20, 4  ;;  %s483_s21 = int_to_ptr.vmem [resolvable:$true] %s17614_s21 }
  0x1e   : > { %s19474_s3 = sld [smem:[#allocation25_spill]] }
  0x1f   : > { %s19472_s30 = scalar_select %p17599_p3, 1, 0 }
  0x20   : > { %p16966_p5 = pneg %p17599_p3 }
  0x22   : > { %p17608_p6 = pnand %p16966_p5, %p19449_p1 }
  0x24   : > { %s17210_s28 = scalar_lea.hbm %s19474_s3, 8192  ;;  %p17624_p8 = pneg %p17608_p6 }
  0x25   : > { %p17211_p7 = scmp.ne.s32.totalorder %s19474_s3, %s17210_s28  ;;  %p17217_p11 = scmp.lt.u32.totalorder %s17210_s28, %s19474_s3 }
  0x27   : > { %p17213_p9 = pnand %p17624_p8, %p17211_p7 }
  0x29   : > { %p17214_p10 = pneg %p17213_p9 }
  0x2b   : > { %p17219_p12 = pnand %p17217_p11, %p17214_p10 }
  0x2d   : > { %17222 = shalt.err (!%p17219_p12)
}
  0x2e   : > { %s17223_s16 = scalar_lea.vmem %s17597_s29, 8192  ;;  %p17231_p5 = scmp.lt.s32.totalorder %s17597_s29, %s17597_s29 }
  0x2f   : > { %p17224_p13 = scmp.ne.s32.totalorder %s17597_s29, %s17223_s16  ;;  %p17232_p4 = scmp.lt.s32.totalorder %s17223_s16, %s17223_s16 }
  0x31   : > { %p17226_p0 = pnand %p17224_p13, %p17624_p8  ;;  %p17233_p7 = por %p17232_p4, %p17231_p5 }
  0x33   : > { %p17227_p2 = pneg %p17226_p0 }
  0x35   : > { %p17234_p9 = pnand %p17233_p7, %p17227_p2 }
  0x37   : > { %17237 = shalt.err (!%p17234_p9)
}
  0x38   : > { %s19448_s17 = smov 128   ;;  %s19451_s15 = smov 8  }
  0x39   : > { %16969 = dma.hbm_to_vmem [thread:$0]  (!%p17608_p6), %s19474_s3, 8192, %s17597_s29, [#allocation6], %s19448_s17, %s19448_s17, %s19451_s15  }
  0x3a   : > { %s19476_s4 = sld [smem:[#allocation26_spill]] }
  0x40   : > { %s17238_s16 = scalar_lea.hbm %s19476_s4, 512 }
  0x41   : > { %p17239_p4 = scmp.ne.s32.totalorder %s19476_s4, %s17238_s16  ;;  %p17245_p12 = scmp.lt.u32.totalorder %s17238_s16, %s19476_s4 }
  0x43   : > { %p17241_p10 = pnand %p17239_p4, %p17624_p8 }
  0x45   : > { %p17242_p11 = pneg %p17241_p10 }
  0x47   : > { %p17247_p13 = pnand %p17245_p12, %p17242_p11 }
  0x49   : > { %17250 = shalt.err (!%p17247_p13)
}
  0x4a   : > { %s17251_s29 = scalar_lea.vmem %s17612_s19, 512  ;;  %p17259_p7 = scmp.lt.s32.totalorder %s17612_s19, %s17612_s19 }
  0x4b   : > { %p17252_p0 = scmp.ne.s32.totalorder %s17612_s19, %s17251_s29  ;;  %p17260_p9 = scmp.lt.s32.totalorder %s17251_s29, %s17251_s29 }
  0x4d   : > { %p17254_p2 = pnand %p17252_p0, %p17624_p8  ;;  %p17261_p4 = por %p17260_p9, %p17259_p7 }
  0x4f   : > { %p17255_p5 = pneg %p17254_p2 }
  0x51   : > { %p17262_p10 = pnand %p17261_p4, %p17255_p5 }
  0x53   : > { %17265 = shalt.err (!%p17262_p10)
}
  0x54   : > { %s17471_s12 = smov 16   ;;  %s17472_s10 = smov 1  }
  0x55   : > { %16972 = dma.hbm_to_vmem [thread:$0]  (!%p17608_p6), %s19476_s4, 512, %s17612_s19, [#allocation9], %s17471_s12, %s17471_s12, %s17472_s10  }
  0x56   : > { %s19477_s6 = sld [smem:[#allocation27_spill]] }
  0x5c   : > { %s17266_s28 = scalar_lea.hbm %s19477_s6, 512 }
  0x5d   : > { %p17267_p11 = scmp.ne.s32.totalorder %s19477_s6, %s17266_s28  ;;  %p17273_p0 = scmp.lt.u32.totalorder %s17266_s28, %s19477_s6 }
  0x5f   : > { %p17269_p12 = pnand %p17267_p11, %p17624_p8 }
  0x61   : > { %p17270_p13 = pneg %p17269_p12 }
  0x63   : > { %p17275_p2 = pnand %p17273_p0, %p17270_p13 }
  0x65   : > { %17278 = shalt.err (!%p17275_p2)
}
  0x66   : > { %s17279_s13 = scalar_lea.vmem %s483_s21, 512  ;;  %p17287_p4 = scmp.lt.s32.totalorder %s483_s21, %s483_s21 }
  0x67   : > { %p17280_p5 = scmp.ne.s32.totalorder %s483_s21, %s17279_s13  ;;  %p17288_p10 = scmp.lt.s32.totalorder %s17279_s13, %s17279_s13 }
  0x69   : > { %p17282_p7 = pnand %p17280_p5, %p17624_p8  ;;  %p17289_p1 = por %p17288_p10, %p17287_p4 }
  0x6b   : > { %p17283_p9 = pneg %p17282_p7 }
  0x6d   : > { %p17290_p3 = pnand %p17289_p1, %p17283_p9 }
  0x6f   : > { %17293 = shalt.err (!%p17290_p3)
}
  0x70   : > { %16975 = dma.hbm_to_vmem [thread:$0]  (!%p17608_p6), %s19477_s6, 512, %s483_s21, [#allocation9], %s17471_s12, %s17471_s12, %s17472_s10  }
  0x71   : > { %s17473_s17 = smov [#allocation11]   ;;  %s19478_s7 = sld [smem:[#allocation28_spill]] }
  0x72   : > { %s495_s22 = sshll.u32 %s17473_s17, 4  ;;  %s496_s22 = int_to_ptr.vmem [resolvable:$true] %s495_s22 }
  0x77   : > { %s17294_s20 = scalar_lea.hbm %s19478_s7, 4096 }
  0x78   : > { %p17295_p11 = scmp.ne.s32.totalorder %s19478_s7, %s17294_s20  ;;  %p17301_p12 = scmp.lt.u32.totalorder %s17294_s20, %s19478_s7 }
  0x7a   : > { %p17297_p1 = pnand %p17295_p11, %p17624_p8 }
  0x7c   : > { %p17298_p3 = pneg %p17297_p1 }
  0x7e   : > { %p17303_p13 = pnand %p17301_p12, %p17298_p3 }
  0x80   : > { %17306 = shalt.err (!%p17303_p13)
}
  0x81   : > { %s17307_s21 = scalar_lea.vmem %s496_s22, 4096  ;;  %p17315_p7 = scmp.lt.s32.totalorder %s496_s22, %s496_s22 }
  0x82   : > { %p17308_p0 = scmp.ne.s32.totalorder %s496_s22, %s17307_s21  ;;  %p17316_p9 = scmp.lt.s32.totalorder %s17307_s21, %s17307_s21 }
  0x84   : > { %p17310_p2 = pnand %p17308_p0, %p17624_p8  ;;  %p17317_p4 = por %p17316_p9, %p17315_p7 }
  0x86   : > { %p17311_p5 = pneg %p17310_p2 }
  0x88   : > { %p17318_p10 = pnand %p17317_p4, %p17311_p5 }
  0x8a   : > { %17321 = shalt.err (!%p17318_p10)
}
  0x8b   : > { %s19479_s12 = smov 8   ;;  %s19480_s10 = smov 128  }
  0x8c   : > { %16978 = dma.hbm_to_vmem [thread:$0]  (!%p17608_p6), %s19478_s7, 4096, %s496_s22, [#allocation12], %s19480_s10, %s19480_s10, %s19479_s12  }
  0x8d   : > { %s14855_s1 = sadd.s32 4294967294, %s17464_s27   ;;  %s17713_s18 = sadd.s32 1, %s17464_s27  }
  0x8e   : > { %s68_s14 = ssub.s32 %s17464_s27, %s17713_s18  ;;  %s71_s17 = sadd.s32 1, %s17460_s26 }
  0x8f   : > { %p69_p8 = scmp.eq.s32.totalorder %s68_s14, 0  ;;  %p78_p11 = scmp.ne.s32.totalorder %s17460_s26, %s17456_s25 }
  0x90   : > { %p79_p1 = scmp.eq.s32.totalorder %s17464_s27, 0  ;;  %p84_p3 = scmp.ne.s32.totalorder %s17456_s25, %s17452_s24 }
  0x91   : > { %s17724_s23 = scalar_select %p69_p8, %s17460_s26, %s71_s17  }
  0x92   : > { %p17726_p12 = por %p79_p1, %p78_p11  ;;  %p19483_p13 = scmp.eq.s32.totalorder %s17592_s0, 0 }
  0x93   : > { %19481 = sst [smem:[#allocation21_spill]] %s17724_s23  ;;  %p428_p0 = scmp.eq.s32.totalorder %s17592_s0, 1 }
  0x94   : > { %p17732_p6 = por %p19483_p13, %p84_p3  ;;  %p434_p2 = scmp.eq.s32.totalorder %s14855_s1, 1 }
  0x95   : > { %p16994_p5 = scmp.lt.s32.totalorder %s17464_s27, 2  ;;  %s543_s20 = sand.u32 1, %s17460_s26  }
  0x96   : > { %s19484_s22 = scalar_select %p17732_p6, 1, 0 }
  0x97   : > { %p17739_p7 = por %p428_p0, %p78_p11  ;;  %p17743_p9 = por %p434_p2, %p84_p3 }
  0x98   : > { %s17747_s13 = sshll.u32 %s543_s20, 3  ;;  %s14863_s21 = sshll.u32 %s17464_s27, 7 }
  0x99   : > { %s19485_s16 = scalar_select %p17739_p7, 1, 0 }
  0x9a   : > { %s19486_s29 = scalar_select %p17743_p9, 1, 0 }
  0x9b   : > { %s19487_s15 = sld [smem:[#allocation23_spill]]  ;;  %s547_s1 = scalar_lea.vmem [#allocation2], %s17747_s13 }
  0x9c   : > { %s554_s14 = sshll.u32 %s547_s1, 4  ;;  %p17760_p4 = pnand %p16994_p5, %p17726_p12  ;;  %s17756_s14 = int_to_ptr.vmem [resolvable:$true] %s554_s14 }
  0x9d   : > { %s19489_s2 = sld [smem:[#allocation24_spill]]  ;;  %s561_s10 = sand.u32 1, %s17464_s27  }
  0x9e   : > { %s544_s6 = scalar_lea.sflag [#allocation3], %s543_s20  ;;  %p17324_p8 = pneg %p17760_p4 }
  0xa1   : > { %s17753_s19 = scalar_lea.hbm %s19487_s15, %s14863_s21  ;;  %s17327_s23 = scalar_lea.hbm %s19487_s15, 256 }
  0xa2   : > { %s17322_s7 = scalar_lea.hbm %s17753_s19, 128  ;;  %p17328_p3 = scmp.lt.u32.totalorder %s17753_s19, %s19487_s15 }
  0xa3   : > { %s17767_s12 = scalar_lea.hbm %s19489_s2, %s14863_s21  ;;  %p17323_p10 = scmp.ne.s32.totalorder %s17753_s19, %s17322_s7 }
  0xa4   : > { %p17329_p12 = scmp.lt.u32.totalorder %s17327_s23, %s17322_s7  ;;  %p17331_p0 = scmp.lt.u32.totalorder %s17322_s7, %s17753_s19 }
  0xa5   : > { %p17325_p11 = pnand %p17324_p8, %p17323_p10 }
  0xa6   : > { %p17330_p13 = por %p17329_p12, %p17328_p3 }
  0xa7   : > { %p17326_p1 = pneg %p17325_p11 }
  0xa8   : > { %p17332_p2 = por %p17331_p0, %p17330_p13 }
  0xaa   : > { %p17333_p5 = pnand %p17332_p2, %p17326_p1 }
  0xac   : > { %17336 = shalt.err (!%p17333_p5)
}
  0xad   : > { %s17337_s4 = scalar_lea.vmem %s17756_s14, 128  ;;  %s17474_s20 = smov [#allocation2]  }
  0xae   : > { %p17338_p10 = scmp.ne.s32.totalorder %s17756_s14, %s17337_s4  ;;  %s17342_s21 = sshll.u32 %s17474_s20, 4  ;;  %s17343_s21 = int_to_ptr.vmem [resolvable:$false] %s17342_s21 }
  0xaf   : > { %s17344_s26 = scalar_lea.vmem %s17343_s21, 256  ;;  %p17345_p7 = scmp.lt.s32.totalorder %s17756_s14, %s17343_s21 }
  0xb0   : > { %p17340_p11 = pnand %p17338_p10, %p17324_p8  ;;  %p17346_p3 = scmp.lt.s32.totalorder %s17344_s26, %s17337_s4 }
  0xb2   : > { %p17341_p9 = pneg %p17340_p11  ;;  %p17347_p12 = por %p17346_p3, %p17345_p7 }
  0xb4   : > { %p17348_p13 = pnand %p17347_p12, %p17341_p9 }
  0xb6   : > { %17351 = shalt.err (!%p17348_p13)
}
  0xb7   : > { %16982 = dma.hbm_to_vmem [thread:$0]  (!%p17760_p4), %s17753_s19, 128, %s17756_s14, %s544_s6  }
  0xb8   : > { %s565_s7 = scalar_lea.vmem [#allocation5], %s17747_s13  ;;  %s562_s28 = scalar_lea.sflag [#allocation6], %s561_s10 }
  0xb9   : > { %s572_s23 = sshll.u32 %s565_s7, 4  ;;  %s17352_s1 = scalar_lea.hbm %s17767_s12, 128  ;;  %s573_s23 = int_to_ptr.vmem [resolvable:$true] %s572_s23 }
  0xba   : > { %p17353_p7 = scmp.ne.s32.totalorder %s17767_s12, %s17352_s1  ;;  %s17357_s20 = scalar_lea.hbm %s19489_s2, 256 }
  0xbb   : > { %p17358_p0 = scmp.lt.u32.totalorder %s17767_s12, %s19489_s2  ;;  %p17359_p2 = scmp.lt.u32.totalorder %s17357_s20, %s17352_s1 }
  0xbc   : > { %p17355_p9 = pnand %p17353_p7, %p17324_p8  ;;  %p17361_p10 = scmp.lt.u32.totalorder %s17352_s1, %s17767_s12 }
  0xbd   : > { %p17360_p5 = por %p17359_p2, %p17358_p0 }
  0xbe   : > { %p17356_p1 = pneg %p17355_p9 }
  0xbf   : > { %p17362_p11 = por %p17361_p10, %p17360_p5 }
  0xc1   : > { %p17363_p3 = pnand %p17362_p11, %p17356_p1 }
  0xc3   : > { %17366 = shalt.err (!%p17363_p3)
}
  0xc4   : > { %s17367_s6 = scalar_lea.vmem %s573_s23, 128  ;;  %s17475_s13 = smov [#allocation5]  }
  0xc5   : > { %p17368_p12 = scmp.ne.s32.totalorder %s573_s23, %s17367_s6  ;;  %s17372_s19 = sshll.u32 %s17475_s13, 4  ;;  %s17373_s19 = int_to_ptr.vmem [resolvable:$false] %s17372_s19 }
  0xc6   : > { %s17374_s14 = scalar_lea.vmem %s17373_s19, 256  ;;  %p17375_p9 = scmp.lt.s32.totalorder %s573_s23, %s17373_s19 }
  0xc7   : > { %p17370_p13 = pnand %p17368_p12, %p17324_p8  ;;  %p17376_p6 = scmp.lt.s32.totalorder %s17374_s14, %s17367_s6 }
  0xc9   : > { %p17371_p7 = pneg %p17370_p13  ;;  %p17377_p0 = por %p17376_p6, %p17375_p9 }
  0xcb   : > { %p17378_p2 = pnand %p17377_p0, %p17371_p7 }
  0xcd   : > { %17381 = shalt.err (!%p17378_p2)
}
  0xce   : > { %16985 = dma.hbm_to_vmem [thread:$0]  (!%p17760_p4), %s17767_s12, 128, %s573_s23, %s562_s28  }
  0xcf   : > { %p19490_p1 = scmp.ne.s32.totalorder %s19472_s30, 0 }
  0xd0   : > { %s17820_s10 = sand.u32 (!%p19490_p1), 1, %s17456_s25   ;;  %p19491_p6 = scmp.ne.s32.totalorder (!%p19490_p1), %s19484_s22, 0 }
  0xd1   : > { %581 = sbr.rel (%p19490_p1) target bundleno = 9867 (0x268b), region = 88  ;;  %s17823_s7 = sshll.u32 (!%p19490_p1), %s17820_s10, 3 }
  0xd2   : > { %s584_s1 = scalar_lea.sflag (!%p19490_p1), [#allocation3], %s17820_s10  ;;  %s17827_s3 = scalar_lea.vmem (!%p19490_p1), [#allocation2], %s17823_s7 }
  0xd8   : > { %17427 = dma.done.wait (%p19491_p6), %s584_s1, 128  }
  0xd9   : > { %17429 = vsyncadd (%p19491_p6), %s584_s1, 4294967168  ;;  %s592_s30 = sand.u32 1, %s17592_s0   ;;  %s17835_s12 = scalar_lea.vmem [#allocation5], %s17823_s7 }
  0xda   : > { %s593_s17 = scalar_lea.sflag [#allocation6], %s592_s30 }
  0xdb   : > { %17431 = dma.done.wait (%p19491_p6), %s593_s17, 128  }
  0xdc   : > { %17433 = vsyncadd (%p19491_p6), %s593_s17, 4294967168  ;;  %p19492_p4 = scmp.eq.s32.totalorder %s17592_s0, 0 }
  0xde   : > { %17435 = dma.done.wait (%p19492_p4), [#allocation6], 8192   ;;  %p19493_p8 = pmov %p19492_p4 }
  0xdf   : > { %p19494_p5 = pmov %p19492_p4 }
  0xe0   : > { %17437 = vsyncadd (%p19493_p8), [#allocation6], 4294959104 }
  0xe1   : > { %17439 = dma.done.wait (%p19494_p5), [#allocation9], 1024   ;;  %p19495_p10 = pmov %p19492_p4 }
  0xe2   : > { %p19496_p11 = pmov %p19492_p4 }
  0xe3   : > { %17441 = vsyncadd (%p19495_p10), [#allocation9], 4294966272 }
  0xe4   : > { %17443 = dma.done.wait (%p19496_p11), [#allocation12], 4096   ;;  %p19497_p3 = pmov %p19492_p4 }
  0xe5   : > { %v17476_v0 = vmov 0.0|0.0   ;;  %p672_p12 = scmp.lt.s32.totalorder %s17592_s0, 1  ;;  %vm17477_vm0 = vmmov 0   ;;  %v17478_v1 = vmov 0.0   ;;  %vm752_vm1 = vcmask 523264   ;;  %v680_v3 = vld [vmem:[#allocation7] sm:$0xff] }
  0xe6   : > { %17445 = vsyncadd (%p19497_p3), [#allocation12], 4294963200  ;;  %16744 = vmatprep.subr.bf16.mxu0 %v17476_v0  ;;  %16748 = vmatprep.subr.bf16.mxu1 %v17476_v0  ;;  %v681_v4 = vld [vmem:[#allocation7 + $0x8] sm:$0xff]  ;;  %v682_v5 = vld [vmem:[#allocation7 + $0x10] sm:$0xff]  ;;  %s19500_s20 = sld [smem:[#allocation22_spill]]  ;;  %s19455_s13 = smov 120  }
  0xe7   : > { %15764 = vmatprep.mubr.msk.f32.mxu0 %vm17477_vm0, %v17478_v1  ;;  %15771 = vmatprep.mubr.msk.f32.mxu1 %vm17477_vm0, %v17478_v1  ;;  %s673_s22 = scalar_select %p672_p12, %s17592_s0, 1  ;;  %vm17863_vm2 = vmpackc.low %vm752_vm1, %vm752_vm1  ;;  %v16745_v6 = vpack.c.bf16 %v681_v4, %v680_v3  ;;  %v683_v7 = vld [vmem:[#allocation7 + $0x18] sm:$0xff]  ;;  %v677_v10 = vld [vmem:[%s17827_s3] sm:$0xff]  ;;  %vm2026_vm3 = vcmask 64512   ;;  %vm4072_vm4 = vcmask 261120  }
  0xe8   : > { %v16749_v8 = vpack.c.bf16 %v683_v7, %v682_v5  ;;  %v684_v11 = vld [vmem:[#allocation7 + $0x20] sm:$0xff]  ;;  %v685_v12 = vld [vmem:[#allocation7 + $0x28] sm:$0xff]  ;;  %v686_v13 = vld [vmem:[#allocation7 + $0x30] sm:$0xff]  ;;  %s19502_s6 = sld [smem:[#allocation31_spill]]  ;;  %s19503_s4 = sld [smem:[#allocation30_spill]] }
  0xe9   : > { %s14874_s23 = sshll.u32 %s673_s22, 3  ;;  %16747 = vmatpush3.bf16.xpose.msk.msra.mxu0 %vm17863_vm2, %v16745_v6  ;;  %v687_v14 = vld [vmem:[#allocation7 + $0x38] sm:$0xff]  ;;  %v16753_v16 = vpack.c.bf16 %v685_v12, %v684_v11  ;;  %v688_v18 = vld [vmem:[#allocation7 + $0x40] sm:$0xff]  ;;  %v689_v19 = vld [vmem:[#allocation7 + $0x48] sm:$0xff]  ;;  %s19504_s19 = sld [smem:[#allocation32_spill]] }
  0xea   : > { %16751 = vmatpush3.bf16.xpose.msk.msra.mxu1 %vm17863_vm2, %v16749_v8  ;;  %16752 = vmatprep.subr.bf16.mxu0 %v17476_v0  ;;  %v16757_v17 = vpack.c.bf16 %v687_v14, %v686_v13  ;;  %v690_v20 = vld [vmem:[#allocation7 + $0x50] sm:$0xff]  ;;  %v691_v21 = vld [vmem:[#allocation7 + $0x58] sm:$0xff]  ;;  %v16761_v22 = vpack.c.bf16 %v689_v19, %v688_v18  ;;  %v692_v24 = vld [vmem:[#allocation7 + $0x60] sm:$0xff]  ;;  %s19505_s30 = sld [smem:[#allocation33_spill]]  ;;  %s15349_s28 = sshll.u32 %s17592_s0, 7 }
  0xeb   : > { %16756 = vmatprep.subr.bf16.mxu1 %v17476_v0  ;;  %v16765_v23 = vpack.c.bf16 %v691_v21, %v690_v20  ;;  %v693_v25 = vld [vmem:[#allocation7 + $0x68] sm:$0xff]  ;;  %v694_v26 = vld [vmem:[#allocation7 + $0x70] sm:$0xff]  ;;  %v695_v27 = vld [vmem:[#allocation7 + $0x78] sm:$0xff]  ;;  %s671_s26 = scalar_lea.vmem [#allocation13], %s17823_s7  ;;  %s19508_s1 = sld [smem:[#allocation35_spill]] }
  0xec   : > { %s675_s21 = scalar_lea.vmem %s19500_s20, %s14874_s23  ;;  %v16769_v28 = vpack.c.bf16 %v693_v25, %v692_v24  ;;  %v16773_v29 = vpack.c.bf16 %v695_v27, %v694_v26  ;;  %v1372_v30 = vld [vmem:[%s19427_s5] sm:$0xff]  ;;  %v1374_v31 = vld [vmem:[%s19427_s5 + $0x10] sm:$0xff]  ;;  %v1373_v32 = vld [vmem:[%s19427_s5 + $0x8] sm:$0xff]  ;;  %s19501_s20 = sld [smem:[#allocation29_spill]] }
  0xed   : > { %v17872_v9 = vld [vmem:[%s675_s21] sm:$0xff]  ;;  %v1375_v34 = vld [vmem:[%s19427_s5 + $0x18] sm:$0xff]  ;;  %v1378_v35 = vld [vmem:[%s19427_s5 + $0x30] sm:$0xff]  ;;  %s19506_s23 = sld [smem:[#allocation34_spill]]  ;;  %s19507_s21 = smov 120  }
  0xee   : > { %v679_v15 = vadd.f32 %v677_v10, %v17872_v9  ;;  %v1376_v33 = vld [vmem:[%s19427_s5 + $0x20] sm:$0xff]  ;;  %v1377_v36 = vld [vmem:[%s19427_s5 + $0x28] sm:$0xff]  ;;  %v1379_v37 = vld [vmem:[%s19427_s5 + $0x38] sm:$0xff]  ;;  %s14712_s2 = sshll.u32 %s671_s26, 4  ;;  %p19509_p7 = scmp.ne.s32.totalorder %s19485_s16, 0  ;;  %s19379_s2 = int_to_ptr.vmem [resolvable:$true] %s14712_s2 }
  0xef   : > { %v14875_v38 = vld [vmem:[#allocation8] ss:$0 sm:$0xff]  ;;  %v14876_v40 = vld [vmem:[#allocation8 + $0x1] ss:$0 sm:$0xff]  ;;  %v14877_v46 = vld [vmem:[#allocation8 + $0x2] ss:$0 sm:$0xff] }
  0xf0   : > { %15765 = vmatmul.mubr.msk.f32.vlgmr.msra.gmra.mrb[0].mxu0 %vm752_vm1, %v679_v15  ;;  %v14878_v48 = vld [vmem:[#allocation8 + $0x3] ss:$0 sm:$0xff]  ;;  %v14879_v54 = vld [vmem:[#allocation8 + $0x4] ss:$0 sm:$0xff]  ;;  %v14880_v55 = vld [vmem:[#allocation8 + $0x5] ss:$0 sm:$0xff] }
  0xf1   : > { %15772 = vmatmul.mubr.msk.f32.vlgmr.msra.gmra.mrb[0].mxu1 %vm752_vm1, %v679_v15  ;;  %16755 = vmatpush3.bf16.xpose.msk.msra.mxu0 %vm17863_vm2, %v16753_v16  ;;  %v14881_v62 = vld [vmem:[#allocation8 + $0x6] ss:$0 sm:$0xff]  ;;  %v14882_v63 = vld [vmem:[#allocation8 + $0x7] ss:$0 sm:$0xff]  ;;  %v15256_v2 = vld [vmem:[%s19427_s5 + $0xc8] sm:$0xff]  ;;  %s17382_s17 = scalar_lea.vmem %s19379_s2, 128 }
  0xf2   : > { %16759 = vmatpush3.bf16.xpose.msk.msra.mxu1 %vm17863_vm2, %v16757_v17  ;;  %15778 = vmatprep.mubr.msk.f32.mxu0 %vm17477_vm0, %v17478_v1  ;;  %p17383_p13 = scmp.ne.s32.totalorder %s19379_s2, %s17382_s17  ;;  %s17480_s0 = smov [#allocation13]  }
  0xf3   : > { %15785 = vmatprep.mubr.msk.f32.mxu1 %vm17477_vm0, %v17478_v1  ;;  %16760 = vmatprep.subr.bf16.mxu0 %v17476_v0  ;;  %s17386_s7 = sshll.u32 %s17480_s0, 4  ;;  %s17387_s7 = int_to_ptr.vmem [resolvable:$false] %s17386_s7 }
  0xf4   : > { %16764 = vmatprep.subr.bf16.mxu1 %v17476_v0  ;;  %p17384_p9 = pnand %p17383_p13, %p19509_p7  ;;  %s17388_s22 = scalar_lea.vmem %s17387_s7, 256 }
  0xf5   : > { %p17389_p2 = scmp.lt.s32.totalorder %s19379_s2, %s17387_s7  ;;  %p17390_p1 = scmp.lt.s32.totalorder %s17388_s22, %s17382_s17 }
  0xf6   : > { %p17385_p0 = pneg %p17384_p9 }
  0xf7   : > { %p17391_p6 = por %p17390_p1, %p17389_p2 }
  0xf8   : > { %15779 = vmatmul.mubr.msk.f32.vlgmr.msra.gmra.mrb[2].mxu0 %vm752_vm1, %v679_v15 }
  0xf9   : > { %15786 = vmatmul.mubr.msk.f32.vlgmr.msra.gmra.mrb[2].mxu1 %vm752_vm1, %v679_v15  ;;  %16763 = vmatpush3.bf16.xpose.msk.msra.mxu0 %vm17863_vm2, %v16761_v22  ;;  %p17392_p4 = pnand %p17391_p6, %p17385_p0 }
  0xfa   : > { %16767 = vmatpush3.bf16.xpose.msk.msra.mxu1 %vm17863_vm2, %v16765_v23  ;;  %15792 = vmatprep.mubr.msk.f32.mxu0 %vm17477_vm0, %v17478_v1 }
  0xfb   : > { %15799 = vmatprep.mubr.msk.f32.mxu1 %vm17477_vm0, %v17478_v1  ;;  %16768 = vmatprep.subr.bf16.mxu0 %v17476_v0 }
  0xfc   : > { %16772 = vmatprep.subr.bf16.mxu1 %v17476_v0 }
 0x100   : > { %15793 = vmatmul.mubr.msk.f32.vlgmr.msra.gmra.mrb[4].mxu0 %vm752_vm1, %v679_v15 }
 0x101   : > { %15800 = vmatmul.mubr.msk.f32.vlgmr.msra.gmra.mrb[4].mxu1 %vm752_vm1, %v679_v15  ;;  %16771 = vmatpush3.bf16.xpose.msk.msra.mxu0 %vm17863_vm2, %v16769_v28 }
 0x102   : > { %16775 = vmatpush3.bf16.xpose.msk.msra.mxu1 %vm17863_vm2, %v16773_v29  ;;  %15806 = vmatprep.mubr.msk.f32.mxu0 %vm17477_vm0, %v17478_v1 }
 0x103   : > { %15813 = vmatprep.mubr.msk.f32.mxu1 %vm17477_vm0, %v17478_v1  ;;  %15816 = vmatprep.subr.mxu1 %v17478_v1 }
 0x104   : > { %15826 = vmatprep.subr.mxu0 %v17478_v1 }
 0x108   : > { %15807 = vmatmul.mubr.msk.f32.vlgmr.msra.gmra.mrb[6].mxu0 %vm752_vm1, %v679_v15 }
 0x109   : > { %15814 = vmatmul.mubr.msk.f32.vlgmr.msra.gmra.mrb[6].mxu1 %vm752_vm1, %v679_v15  ;;  %15828 = vmatprep.mubr.msk.f32.mxu0 %vm17477_vm0, %v17478_v1 }
 0x10a   : > { %15818 = vmatprep.mubr.msk.f32.mxu1 %vm17477_vm0, %v17478_v1  ;;  %15817 = vmatpush3.xpose.msk.msra.mxu1 %vm752_vm1, %v1372_v30 }
 0x10b   : > { %15827 = vmatpush3.xpose.msk.msra.mxu0 %vm752_vm1, %v1374_v31  ;;  %15821 = vmatprep.subr.mxu1 %v17478_v1 }
 0x10c   : > { %15836 = vmatprep.subr.mxu0 %v17478_v1 }
 0x10d   : > { %15819 = vmatmul.mubr.msk.f32.vlgmr.msra.gmra.mrb[8].mxu1 %vm752_vm1, %v17872_v9 }
 0x10e   : > { %15829 = vmatmul.mubr.msk.f32.vlgmr.msra.gmra.mrb[8].mxu0 %vm752_vm1, %v17872_v9  ;;  %15822 = vmatpush3.xpose.msk.msra.mxu1 %vm752_vm1, %v1373_v32 }
 0x10f   : > { %15823 = vmatprep.mubr.msk.f32.mxu1 %vm17477_vm0, %v17478_v1  ;;  %15831 = vmatprep.subr.mxu1 %v17478_v1 }
 0x110   : > { %15837 = vmatpush3.xpose.msk.msra.mxu0 %vm752_vm1, %v1376_v33  ;;  %15838 = vmatprep.mubr.msk.f32.mxu0 %vm17477_vm0, %v17478_v1 }
 0x111   : > { %15846 = vmatprep.subr.mxu0 %v17478_v1  ;;  %15824 = vmatmul.mubr.msk.f32.vlgmr.msra.gmra.mrb[10].mxu1 %vm752_vm1, %v17872_v9 }
 0x112   : > { %15832 = vmatpush3.xpose.msk.msra.mxu1 %vm752_vm1, %v1375_v34  ;;  %15833 = vmatprep.mubr.msk.f32.mxu1 %vm17477_vm0, %v17478_v1 }
 0x113   : > { %15839 = vmatmul.mubr.msk.f32.vlgmr.msra.gmra.mrb[10].mxu0 %vm752_vm1, %v17872_v9  ;;  %15841 = vmatprep.subr.mxu1 %v17478_v1 }
 0x114   : > { %15847 = vmatpush3.xpose.msk.msra.mxu0 %vm752_vm1, %v1378_v35  ;;  %15848 = vmatprep.mubr.msk.f32.mxu0 %vm17477_vm0, %v17478_v1 }
 0x115   : > { %15834 = vmatmul.mubr.msk.f32.vlgmr.msra.gmra.mrb[12].mxu1 %vm752_vm1, %v17872_v9  ;;  %15856 = vmatprep.subr.mxu0 %v17478_v1 }
 0x116   : > { %15842 = vmatpush3.xpose.msk.msra.mxu1 %vm752_vm1, %v1377_v36  ;;  %15843 = vmatprep.mubr.msk.f32.mxu1 %vm17477_vm0, %v17478_v1  ;;  %v14907_v36 = vld [vmem:[#allocation10] ss:$0 sm:$0xff] }
 0x117   : > { %15849 = vmatmul.mubr.msk.f32.vlgmr.msra.gmra.mrb[12].mxu0 %vm752_vm1, %v17872_v9  ;;  %15851 = vmatprep.subr.mxu1 %v17478_v1 }
 0x118   : > { %15858 = vmatprep.mubr.msk.f32.mxu0 %vm17477_vm0, %v17478_v1 }
 0x119   : > { %15844 = vmatmul.mubr.msk.f32.vlgmr.msra.gmra.mrb[14].mxu1 %vm752_vm1, %v17872_v9 }
 0x11a   : > { %15853 = vmatprep.mubr.msk.f32.mxu1 %vm17477_vm0, %v17478_v1  ;;  %15852 = vmatpush3.xpose.msk.msra.mxu1 %vm752_vm1, %v1379_v37  ;;  %v14908_v37 = vld [vmem:[#allocation10 + $0x1] ss:$0 sm:$0xff] }
 0x11b   : > { %15861 = vmatprep.subr.mxu1 %v17478_v1 }
 0x11d   : > { %15854 = vmatmul.mubr.msk.f32.vlgmr.msra.gmra.mrb[16].mxu1 %vm752_vm1, %v17872_v9 }
 0x11e   : > { %15863 = vmatprep.mubr.msk.f32.mxu1 %vm17477_vm0, %v17478_v1 }
 0x1c3   : > { %v828_v39 = vpop.f32.mrb[0].mxu0 }
 0x1c4   : > { %v829_v41 = vadd.f32 %v14875_v38, %v828_v39  ;;  %v15766_v42 = vpop.f32.mrb[1].mxu0  ;;  %v904_v43 = vpop.f32.mrb[0].mxu1 }
 0x1c5   : > { %v15773_v44 = vpop.f32.mrb[1].mxu1  ;;  %v905_v45 = vadd.f32 %v14876_v40, %v904_v43 }
 0x1c6   : > { %2024 = vrot.lane.b32.xlu0 %v829_v41, %s19455_s13  ;;  %v1364_v15 = vmul.f32 0.35355338, %v829_v41 }
 0x1c7   : > { %v1365_v21 = vmul.f32 0.35355338, %v905_v45 }
 0x1ca   : > { %2103 = vrot.lane.b32.xlu0 %v905_v45, %s19455_s13 }
 0x1cb   : > { %v980_v47 = vpop.f32.mrb[2].mxu0 }
 0x1cc   : > { %v981_v49 = vadd.f32 %v14877_v46, %v980_v47  ;;  %v15780_v50 = vpop.f32.mrb[3].mxu0  ;;  %v1056_v51 = vpop.f32.mrb[2].mxu1  ;;  %v678_v46 = vld [vmem:[%s17835_s12] sm:$0xff] }
 0x1cd   : > { %v15787_v52 = vpop.f32.mrb[3].mxu1  ;;  %v1057_v53 = vadd.f32 %v14878_v48, %v1056_v51 }
 0x1ce   : > { %2181 = vrot.lane.b32.xlu1 %v981_v49, %s19455_s13  ;;  %v1366_v27 = vmul.f32 0.35355338, %v981_v49 }
 0x1cf   : > { %v1367_v31 = vmul.f32 0.35355338, %v1057_v53 }
 0x1d2   : > { %2259 = vrot.lane.b32.xlu1 %v1057_v53, %s19455_s13 }
 0x1d3   : > { %v1132_v56 = vpop.f32.mrb[4].mxu0 }
 0x1d4   : > { %v1133_v57 = vadd.f32 %v14879_v54, %v1132_v56  ;;  %v1208_v58 = vpop.f32.mrb[4].mxu1  ;;  %v15794_v59 = vpop.f32.mrb[5].mxu0 }
 0x1d5   : > { %v1209_v60 = vadd.f32 %v14880_v55, %v1208_v58  ;;  %v15801_v61 = vpop.f32.mrb[5].mxu1 }
 0x1d6   : > { %2337 = vrot.lane.b32.xlu0 %v1133_v57, %s19455_s13  ;;  %v1368_v34 = vmul.f32 0.35355338, %v1133_v57 }
 0x1d7   : > { %2415 = vrot.lane.b32.xlu1 %v1209_v60, %s19455_s13  ;;  %v1369_v35 = vmul.f32 0.35355338, %v1209_v60 }
 0x1db   : > { %v1284_v3 = vpop.f32.mrb[6].mxu0 }
 0x1dc   : > { %v18000_v4 = vadd.f32 %v14881_v62, %v1284_v3  ;;  %v1360_v5 = vpop.f32.mrb[6].mxu1  ;;  %v15808_v6 = vpop.f32.mrb[7].mxu0 }
 0x1dd   : > { %v18002_v7 = vadd.f32 %v14882_v63, %v1360_v5  ;;  %v15815_v8 = vpop.f32.mrb[7].mxu1 }
 0x1de   : > { %2493 = vrot.lane.b32.xlu0 %v18000_v4, %s19455_s13  ;;  %v1370_v41 = vmul.f32 0.35355338, %v18000_v4 }
 0x1df   : > { %2571 = vrot.lane.b32.xlu1 %v18002_v7, %s19455_s13  ;;  %v1371_v43 = vmul.f32 0.35355338, %v18002_v7 }
 0x1e0   : > { %v1508_v10 = vpop.f32.mrb[8].mxu1 }
 0x1e1   : > { %v18008_v11 = vpop.f32.mrb[8].mxu0  ;;  %v15820_v12 = vpop.f32.mrb[9].mxu1  ;;  %v1509_v40 = vadd.f32 %v14907_v36, %v1508_v10 }
 0x1e2   : > { %v15830_v13 = vpop.f32.mrb[9].mxu0 }
 0x1e4   : > { %v1581_v16 = vpop.f32.mrb[10].mxu1 }
 0x1e5   : > { %v15825_v17 = vpop.f32.mrb[11].mxu1  ;;  %v1582_v42 = vadd.f32 %v14908_v37, %v1581_v16 }
 0x1e6   : > { %v18013_v19 = vpop.f32.mrb[10].mxu0 }
 0x1e7   : > { %v15840_v20 = vpop.f32.mrb[11].mxu0 }
 0x1e8   : > { %v18019_v22 = vpop.f32.mrb[12].mxu1 }
 0x1e9   : > { %v15835_v23 = vpop.f32.mrb[13].mxu1 }
 0x1ea   : > { %v18022_v25 = vpop.f32.mrb[12].mxu0 }
 0x1eb   : > { %v15850_v26 = vpop.f32.mrb[13].mxu0 }
 0x1ec   : > { %v18028_v28 = vpop.f32.mrb[14].mxu1 }
 0x1ed   : > { %v15845_v29 = vpop.f32.mrb[15].mxu1 }
 0x1f0   : > { %v18062_v44 = vpop.f32.mrb[16].mxu1 }
 0x1f1   : > { %v15855_v45 = vpop.f32.mrb[17].mxu1 }
 0x238   : > { %v2025_v14 = vpop.permute.xlu0 %2024 }
 0x239   : > { %15857 = vmatpush3.xpose.msk.msra.mxu0 %vm2026_vm3, %v2025_v14 }
 0x23a   : > { %15866 = vmatprep.subr.mxu0 %v17478_v1 }
 0x23c   : > { %v2104_v18 = vpop.permute.xlu0 %2103  ;;  %15859 = vmatmul.mubr.msk.f32.vlgmr.msra.gmra.mrb[14].mxu0 %vm2026_vm3, %v1364_v15 }
 0x23d   : > { %15862 = vmatpush3.xpose.msk.msra.mxu1 %vm2026_vm3, %v2104_v18  ;;  %15868 = vmatprep.mubr.msk.f32.mxu0 %vm17477_vm0, %v17478_v1 }
 0x23e   : > { %15871 = vmatprep.subr.mxu1 %v17478_v1 }
 0x240   : > { %15864 = vmatmul.mubr.msk.f32.vlgmr.msra.gmra.mrb[18].mxu1 %vm2026_vm3, %v1365_v21  ;;  %v2182_v24 = vpop.permute.xlu1 %2181 }
 0x241   : > { %15867 = vmatpush3.xpose.msk.msra.mxu0 %vm2026_vm3, %v2182_v24  ;;  %15873 = vmatprep.mubr.msk.f32.mxu1 %vm17477_vm0, %v17478_v1 }
 0x242   : > { %15876 = vmatprep.subr.mxu0 %v17478_v1 }
 0x244   : > { %v2260_v30 = vpop.permute.xlu1 %2259  ;;  %15869 = vmatmul.mubr.msk.f32.vlgmr.msra.gmra.mrb[16].mxu0 %vm2026_vm3, %v1366_v27 }
 0x245   : > { %15872 = vmatpush3.xpose.msk.msra.mxu1 %vm2026_vm3, %v2260_v30  ;;  %15878 = vmatprep.mubr.msk.f32.mxu0 %vm17477_vm0, %v17478_v1 }
 0x246   : > { %15881 = vmatprep.subr.mxu1 %v17478_v1 }
 0x248   : > { %15874 = vmatmul.mubr.msk.f32.vlgmr.msra.gmra.mrb[20].mxu1 %vm2026_vm3, %v1367_v31  ;;  %v2338_v32 = vpop.permute.xlu0 %2337 }
 0x249   : > { %v2416_v33 = vpop.permute.xlu1 %2415  ;;  %15877 = vmatpush3.xpose.msk.msra.mxu0 %vm2026_vm3, %v2338_v32  ;;  %15883 = vmatprep.mubr.msk.f32.mxu1 %vm17477_vm0, %v17478_v1 }
 0x24a   : > { %15882 = vmatpush3.xpose.msk.msra.mxu1 %vm2026_vm3, %v2416_v33  ;;  %15886 = vmatprep.subr.mxu0 %v17478_v1 }
 0x24b   : > { %15891 = vmatprep.subr.mxu1 %v17478_v1 }
 0x24c   : > { %15879 = vmatmul.mubr.msk.f32.vlgmr.msra.gmra.mrb[18].mxu0 %vm2026_vm3, %v1368_v34 }
 0x24d   : > { %15884 = vmatmul.mubr.msk.f32.vlgmr.msra.gmra.mrb[22].mxu1 %vm2026_vm3, %v1369_v35  ;;  %15888 = vmatprep.mubr.msk.f32.mxu0 %vm17477_vm0, %v17478_v1 }
 0x24e   : > { %15893 = vmatprep.mubr.msk.f32.mxu1 %vm17477_vm0, %v17478_v1 }
 0x250   : > { %v2494_v38 = vpop.permute.xlu0 %2493 }
 0x251   : > { %v2572_v39 = vpop.permute.xlu1 %2571  ;;  %15887 = vmatpush3.xpose.msk.msra.mxu0 %vm2026_vm3, %v2494_v38 }
 0x252   : > { %15892 = vmatpush3.xpose.msk.msra.mxu1 %vm2026_vm3, %v2572_v39  ;;  %15896 = vmatprep.subr.mxu0 %v17478_v1 }
 0x253   : > { %15901 = vmatprep.subr.mxu1 %v17478_v1 }
 0x254   : > { %15889 = vmatmul.mubr.msk.f32.vlgmr.msra.gmra.mrb[20].mxu0 %vm2026_vm3, %v1370_v41 }
 0x255   : > { %15894 = vmatmul.mubr.msk.f32.vlgmr.msra.gmra.mrb[24].mxu1 %vm2026_vm3, %v1371_v43  ;;  %15897 = vmatpush3.msra.mxu0 %v1509_v40 }
 0x256   : > { %15902 = vmatpush3.msra.mxu1 %v1582_v42  ;;  %15898 = vmatprep.mubr.msk.f32.mxu0 %vm17477_vm0, %v17478_v1 }
 0x257   : > { %15906 = vmatprep.subr.mxu0 %v17478_v1  ;;  %15903 = vmatprep.mubr.msk.f32.mxu1 %vm17477_vm0, %v17478_v1 }
 0x258   : > { %15911 = vmatprep.subr.mxu1 %v17478_v1 }
 0x30f   : > { %v2098_v47 = vpop.f32.mrb[14].mxu0 }
 0x310   : > { %v2099_v48 = vadd.f32 %v2098_v47, %v678_v46  ;;  %v15860_v49 = vpop.f32.mrb[15].mxu0 }
 0x312   : > { %v2648_v50 = vsel %vm2026_vm3, %v2099_v48, -inf }
 0x313   : > { %v2176_v51 = vpop.f32.mrb[18].mxu1  ;;  %2649 = vmax.xlane.f32.xlu0 %v2648_v50 }
 0x314   : > { %v2177_v52 = vadd.f32 %v2176_v51, %v678_v46  ;;  %v15865_v53 = vpop.f32.mrb[19].mxu1 }
 0x316   : > { %v2651_v54 = vsel %vm2026_vm3, %v2177_v52, -inf }
 0x317   : > { %2652 = vmax.xlane.f32.xlu1 %v2651_v54  ;;  %v2254_v55 = vpop.f32.mrb[16].mxu0 }
 0x318   : > { %v2255_v56 = vadd.f32 %v2254_v55, %v678_v46  ;;  %v15870_v57 = vpop.f32.mrb[17].mxu0 }
 0x31a   : > { %v2654_v58 = vsel %vm2026_vm3, %v2255_v56, -inf }
 0x31b   : > { %v2332_v59 = vpop.f32.mrb[20].mxu1  ;;  %2655 = vmax.xlane.f32.xlu0 %v2654_v58 }
 0x31c   : > { %v2333_v60 = vadd.f32 %v2332_v59, %v678_v46  ;;  %v15875_v61 = vpop.f32.mrb[21].mxu1 }
 0x31e   : > { %v2657_v62 = vsel %vm2026_vm3, %v2333_v60, -inf }
 0x31f   : > { %2658 = vmax.xlane.f32.xlu0 %v2657_v62  ;;  %v2410_v63 = vpop.f32.mrb[18].mxu0 }
 0x320   : > { %v2488_v3 = vpop.f32.mrb[22].mxu1  ;;  %v2411_v4 = vadd.f32 %v2410_v63, %v678_v46  ;;  %v15880_v5 = vpop.f32.mrb[19].mxu0 }
 0x321   : > { %v2489_v6 = vadd.f32 %v2488_v3, %v678_v46  ;;  %v15885_v7 = vpop.f32.mrb[23].mxu1 }
 0x322   : > { %v2660_v8 = vsel %vm2026_vm3, %v2411_v4, -inf  ;;  %v14909_v7 = vld [vmem:[#allocation10 + $0x2] ss:$0 sm:$0xff] }
 0x323   : > { %v2663_v10 = vsel %vm2026_vm3, %v2489_v6, -inf  ;;  %2661 = vmax.xlane.f32.xlu1 %v2660_v8 }
 0x324   : > { %2664 = vmax.xlane.f32.xlu0 %v2663_v10 }
 0x327   : > { %v2566_v12 = vpop.f32.mrb[20].mxu0 }
 0x328   : > { %v2567_v13 = vadd.f32 %v2566_v12, %v678_v46  ;;  %v2644_v14 = vpop.f32.mrb[24].mxu1  ;;  %v15890_v15 = vpop.f32.mrb[21].mxu0 }
 0x329   : > { %v2645_v16 = vadd.f32 %v2644_v14, %v678_v46  ;;  %v15895_v17 = vpop.f32.mrb[25].mxu1  ;;  %v14910_v14 = vld [vmem:[#allocation10 + $0x3] ss:$0 sm:$0xff] }
 0x32a   : > { %v2666_v18 = vsel %vm2026_vm3, %v2567_v13, -inf }
 0x32b   : > { %v2669_v20 = vsel %vm2026_vm3, %v2645_v16, -inf  ;;  %2667 = vmax.xlane.f32.xlu1 %v2666_v18  ;;  %v1728_v18 = vadd.f32 %v14910_v14, %v18019_v22 }
 0x32c   : > { %2670 = vmax.xlane.f32.xlu0 %v2669_v20 }
 0x3a0   : > { %v2650_v21 = vpop.xlane.xlu0 %2649 }
 0x3a1   : > { %v2672_v23 = vsub.f32 %v2099_v48, %v2650_v21  ;;  %v14911_v21 = vld [vmem:[#allocation10 + $0x4] ss:$0 sm:$0xff] }
 0x3a3   : > { %v2680_v24 = vmul.f32 1.442695, %v2672_v23 }
 0x3a4   : > { %v2653_v26 = vpop.xlane.xlu1 %2652 }
 0x3a5   : > { %17044 = vpow2.f32 %v2680_v24  ;;  %v2673_v27 = vsub.f32 %v2177_v52, %v2653_v26  ;;  %v1801_v24 = vadd.f32 %v14911_v21, %v18013_v19  ;;  %v14912_v26 = vld [vmem:[#allocation10 + $0x5] ss:$0 sm:$0xff] }
 0x3a7   : > { %v2682_v29 = vmul.f32 1.442695, %v2673_v27 }
 0x3a8   : > { %v2656_v30 = vpop.xlane.xlu0 %2655 }
 0x3a9   : > { %17046 = vpow2.f32 %v2682_v29  ;;  %v2674_v31 = vsub.f32 %v2255_v56, %v2656_v30  ;;  %v1874_v30 = vadd.f32 %v14912_v26, %v18028_v28 }
 0x3ab   : > { %v2684_v32 = vmul.f32 1.442695, %v2674_v31 }
 0x3ac   : > { %v2659_v33 = vpop.xlane.xlu0 %2658 }
 0x3ad   : > { %17048 = vpow2.f32 %v2684_v32  ;;  %v2675_v34 = vsub.f32 %v2333_v60, %v2659_v33  ;;  %v14913_v32 = vld [vmem:[#allocation10 + $0x6] ss:$0 sm:$0xff]  ;;  %v14914_v33 = vld [vmem:[#allocation10 + $0x7] ss:$0 sm:$0xff] }
 0x3af   : > { %v17045_v35 = vpop.eup %17044  ;;  %v2686_v36 = vmul.f32 1.442695, %v2675_v34 }
 0x3b0   : > { %v2662_v37 = vpop.xlane.xlu1 %2661  ;;  %v2696_v38 = vsel %vm2026_vm3, %v17045_v35, 0.0 }
 0x3b1   : > { %17050 = vpow2.f32 %v2686_v36  ;;  %v2665_v39 = vpop.xlane.xlu0 %2664  ;;  %v2676_v40 = vsub.f32 %v2411_v4, %v2662_v37  ;;  %2697 = vadd.xlane.f32.xlu1 %v2696_v38  ;;  %v1947_v36 = vadd.f32 %v14913_v32, %v18022_v25  ;;  %v2020_v37 = vadd.f32 %v14914_v33, %v18062_v44 }
 0x3b2   : > { %v2677_v41 = vsub.f32 %v2489_v6, %v2665_v39 }
 0x3b3   : > { %v17047_v42 = vpop.eup %17046  ;;  %v2688_v43 = vmul.f32 1.442695, %v2676_v40  ;;  %v3320_v40 = vld [vmem:[#allocation11] sm:$0xff] }
 0x3b4   : > { %v2690_v45 = vmul.f32 1.442695, %v2677_v41  ;;  %v2699_v46 = vsel %vm2026_vm3, %v17047_v42, 0.0  ;;  %v3321_v41 = vld [vmem:[#allocation11 + $0x8] sm:$0xff] }
 0x3b5   : > { %17052 = vpow2.f32 %v2688_v43  ;;  %2700 = vadd.xlane.f32.xlu0 %v2699_v46  ;;  %v3323_v46 = vld [vmem:[#allocation11 + $0x18] sm:$0xff] }
 0x3b6   : > { %17054 = vpow2.f32 %v2690_v45 }
 0x3b7   : > { %v17049_v47 = vpop.eup %17048 }
 0x3b8   : > { %v2668_v48 = vpop.xlane.xlu1 %2667  ;;  %v2702_v49 = vsel %vm2026_vm3, %v17049_v47, 0.0 }
 0x3b9   : > { %v2671_v50 = vpop.xlane.xlu0 %2670  ;;  %v2678_v51 = vsub.f32 %v2567_v13, %v2668_v48  ;;  %2703 = vadd.xlane.f32.xlu1 %v2702_v49  ;;  %v1655_v13 = vadd.f32 %v14909_v7, %v18008_v11  ;;  %v3324_v49 = vld [vmem:[#allocation11 + $0x20] sm:$0xff] }
 0x3ba   : > { %v2679_v52 = vsub.f32 %v2645_v16, %v2671_v50 }
 0x3bb   : > { %v17051_v53 = vpop.eup %17050  ;;  %v2692_v54 = vmul.f32 1.442695, %v2678_v51 }
 0x3bc   : > { %v2694_v55 = vmul.f32 1.442695, %v2679_v52  ;;  %v2705_v56 = vsel %vm2026_vm3, %v17051_v53, 0.0  ;;  %v3325_v52 = vld [vmem:[#allocation11 + $0x28] sm:$0xff] }
 0x3bd   : > { %17056 = vpow2.f32 %v2692_v54  ;;  %2706 = vadd.xlane.f32.xlu0 %v2705_v56 }
 0x3be   : > { %17058 = vpow2.f32 %v2694_v55  ;;  %v3326_v55 = vld [vmem:[#allocation11 + $0x30] sm:$0xff] }
 0x3bf   : > { %v18077_v57 = vpop.eup %17052 }
 0x3c0   : > { %v18079_v58 = vpop.eup %17054  ;;  %v2708_v59 = vsel %vm2026_vm3, %v18077_v57, 0.0 }
 0x3c1   : > { %v2711_v60 = vsel %vm2026_vm3, %v18079_v58, 0.0  ;;  %2709 = vadd.xlane.f32.xlu1 %v2708_v59 }
 0x3c2   : > { %2712 = vadd.xlane.f32.xlu0 %v2711_v60 }
 0x3c7   : > { %v18085_v61 = vpop.eup %17056 }
 0x3c8   : > { %v18087_v62 = vpop.eup %17058  ;;  %v2714_v63 = vsel %vm2026_vm3, %v18085_v61, 0.0 }
 0x3c9   : > { %v2717_v3 = vsel %vm2026_vm3, %v18087_v62, 0.0  ;;  %2715 = vadd.xlane.f32.xlu1 %v2714_v63 }
 0x3ca   : > { %2718 = vadd.xlane.f32.xlu0 %v2717_v3 }
 0x43e   : > { %v2698_v4 = vpop.xlane.xlu1 %2697 }
 0x43f   : > { %17060 = vrcp.f32 %v2698_v4 }
 0x442   : > { %v2701_v5 = vpop.xlane.xlu0 %2700 }
 0x443   : > { %17062 = vrcp.f32 %v2701_v5 }
 0x446   : > { %v2704_v6 = vpop.xlane.xlu1 %2703 }
 0x447   : > { %17064 = vrcp.f32 %v2704_v6 }
 0x449   : > { %v17061_v8 = vpop.eup %17060 }
 0x44a   : > { %v2728_v10 = vmul.f32 %v17061_v8, %v17045_v35  ;;  %v2707_v12 = vpop.xlane.xlu0 %2706 }
 0x44b   : > { %17066 = vrcp.f32 %v2707_v12 }
 0x44c   : > { %15899 = vmatmul.mubr.msk.f32.vlgmr.msra.gmra.mrb[22].mxu0 %vm2026_vm3, %v2728_v10 }
 0x44d   : > { %v17063_v15 = vpop.eup %17062  ;;  %15907 = vmatpush3.msra.mxu0 %v1655_v13  ;;  %15908 = vmatprep.mubr.msk.f32.mxu0 %vm17477_vm0, %v17478_v1 }
 0x44e   : > { %v2729_v16 = vmul.f32 %v17063_v15, %v17047_v42  ;;  %v2710_v17 = vpop.xlane.xlu1 %2709  ;;  %15916 = vmatprep.subr.mxu0 %v17478_v1  ;;  %v3322_v42 = vld [vmem:[#allocation11 + $0x10] sm:$0xff] }
 0x44f   : > { %v2713_v20 = vpop.xlane.xlu0 %2712  ;;  %17068 = vrcp.f32 %v2710_v17 }
 0x450   : > { %17070 = vrcp.f32 %v2713_v20  ;;  %15904 = vmatmul.mubr.msk.f32.vlgmr.msra.gmra.mrb[26].mxu1 %vm2026_vm3, %v2729_v16 }
 0x451   : > { %v17065_v11 = vpop.eup %17064  ;;  %15912 = vmatpush3.msra.mxu1 %v1728_v18  ;;  %15913 = vmatprep.mubr.msk.f32.mxu1 %vm17477_vm0, %v17478_v1 }
 0x452   : > { %v2730_v23 = vmul.f32 %v17065_v11, %v17049_v47  ;;  %15921 = vmatprep.subr.mxu1 %v17478_v1 }
 0x454   : > { %15909 = vmatmul.mubr.msk.f32.vlgmr.msra.gmra.mrb[24].mxu0 %vm2026_vm3, %v2730_v23 }
 0x455   : > { %v17067_v22 = vpop.eup %17066  ;;  %15917 = vmatpush3.msra.mxu0 %v1801_v24  ;;  %15918 = vmatprep.mubr.msk.f32.mxu0 %vm17477_vm0, %v17478_v1 }
 0x456   : > { %v2731_v27 = vmul.f32 %v17067_v22, %v17051_v53  ;;  %v2716_v29 = vpop.xlane.xlu1 %2715  ;;  %15926 = vmatprep.subr.mxu0 %v17478_v1 }
 0x457   : > { %v2719_v31 = vpop.xlane.xlu0 %2718  ;;  %17072 = vrcp.f32 %v2716_v29 }
 0x458   : > { %17074 = vrcp.f32 %v2719_v31  ;;  %15914 = vmatmul.mubr.msk.f32.vlgmr.msra.gmra.mrb[28].mxu1 %vm2026_vm3, %v2731_v27 }
 0x459   : > { %v17069_v19 = vpop.eup %17068  ;;  %15922 = vmatpush3.msra.mxu1 %v1874_v30  ;;  %15923 = vmatprep.mubr.msk.f32.mxu1 %vm17477_vm0, %v17478_v1 }
 0x45a   : > { %v17071_v34 = vpop.eup %17070  ;;  %v2732_v35 = vmul.f32 %v17069_v19, %v18077_v57  ;;  %15931 = vmatprep.subr.mxu1 %v17478_v1  ;;  %v3327_v57 = vld [vmem:[#allocation11 + $0x38] sm:$0xff] }
 0x45b   : > { %v2733_v28 = vmul.f32 %v17071_v34, %v18079_v58 }
 0x45c   : > { %15919 = vmatmul.mubr.msk.f32.vlgmr.msra.gmra.mrb[26].mxu0 %vm2026_vm3, %v2732_v35 }
 0x45d   : > { %15924 = vmatmul.mubr.msk.f32.vlgmr.msra.gmra.mrb[30].mxu1 %vm2026_vm3, %v2733_v28  ;;  %15927 = vmatpush3.msra.mxu0 %v1947_v36  ;;  %v14963_v28 = vld [vmem:[%s19430_s8] ss:$0 sm:$0xff] }
 0x45e   : > { %15932 = vmatpush3.msra.mxu1 %v2020_v37  ;;  %15928 = vmatprep.mubr.msk.f32.mxu0 %vm17477_vm0, %v17478_v1 }
 0x45f   : > { %15933 = vmatprep.mubr.msk.f32.mxu1 %vm17477_vm0, %v17478_v1  ;;  %15936 = vmatprep.subr.mxu0 %v17478_v1 }
 0x460   : > { %15941 = vmatprep.subr.mxu1 %v17478_v1 }
 0x461   : > { %v17073_v25 = vpop.eup %17072 }
 0x462   : > { %v17075_v38 = vpop.eup %17074  ;;  %v2734_v44 = vmul.f32 %v17073_v25, %v18085_v61 }
 0x463   : > { %v2735_v39 = vmul.f32 %v17075_v38, %v18087_v62 }
 0x464   : > { %15929 = vmatmul.mubr.msk.f32.vlgmr.msra.gmra.mrb[28].mxu0 %vm2026_vm3, %v2734_v44 }
 0x465   : > { %15934 = vmatmul.mubr.msk.f32.vlgmr.msra.gmra.mrb[32].mxu1 %vm2026_vm3, %v2735_v39  ;;  %15938 = vmatprep.mubr.msk.f32.mxu0 %vm17477_vm0, %v17478_v1 }
 0x466   : > { %15943 = vmatprep.mubr.msk.f32.mxu1 %vm17477_vm0, %v17478_v1  ;;  %15937 = vmatpush3.msra.mxu0 %v3320_v40 }
 0x467   : > { %15946 = vmatprep.subr.mxu0 %v17478_v1  ;;  %15942 = vmatpush3.msra.mxu1 %v3321_v41 }
 0x468   : > { %15951 = vmatprep.subr.mxu1 %v17478_v1 }
 0x51f   : > { %v2805_v43 = vpop.f32.mrb[22].mxu0 }
 0x520   : > { %v15900_v45 = vpop.f32.mrb[23].mxu0  ;;  %15939 = vmatmul.mubr.msk.f32.vlgmr.msra.gmra.mrb[30].mxu0 %vm2026_vm3, %v2805_v43 }
 0x521   : > { %15947 = vmatpush3.msra.mxu0 %v3322_v42  ;;  %15948 = vmatprep.mubr.msk.f32.mxu0 %vm17477_vm0, %v17478_v1  ;;  %v3966_v45 = vld [vmem:[%s19433_s11] sm:$0xff] }
 0x522   : > { %15956 = vmatprep.subr.mxu0 %v17478_v1 }
 0x523   : > { %v2878_v47 = vpop.f32.mrb[26].mxu1 }
 0x524   : > { %v15905_v48 = vpop.f32.mrb[27].mxu1  ;;  %15944 = vmatmul.mubr.msk.f32.vlgmr.msra.gmra.mrb[34].mxu1 %vm2026_vm3, %v2878_v47 }
 0x525   : > { %15952 = vmatpush3.msra.mxu1 %v3323_v46  ;;  %15953 = vmatprep.mubr.msk.f32.mxu1 %vm17477_vm0, %v17478_v1  ;;  %v3967_v46 = vld [vmem:[%s19433_s11 + $0x8] sm:$0xff]  ;;  %v3969_v48 = vld [vmem:[%s19433_s11 + $0x18] sm:$0xff] }
 0x526   : > { %15961 = vmatprep.subr.mxu1 %v17478_v1  ;;  %v16777_v47 = vpack.c.bf16 %v3967_v46, %v3966_v45  ;;  %v4183_v46 = vld [vmem:[#allocation7 + $0xa8] sm:$0xff] }
 0x527   : > { %v2951_v50 = vpop.f32.mrb[24].mxu0 }
 0x528   : > { %v15910_v51 = vpop.f32.mrb[25].mxu0  ;;  %15949 = vmatmul.mubr.msk.f32.vlgmr.msra.gmra.mrb[32].mxu0 %vm2026_vm3, %v2951_v50  ;;  %v3970_v50 = vld [vmem:[%s19433_s11 + $0x20] sm:$0xff] }
 0x529   : > { %15957 = vmatpush3.msra.mxu0 %v3324_v49  ;;  %15958 = vmatprep.mubr.msk.f32.mxu0 %vm17477_vm0, %v17478_v1  ;;  %v3971_v51 = vld [vmem:[%s19433_s11 + $0x28] sm:$0xff] }
 0x52a   : > { %15966 = vmatprep.subr.mxu0 %v17478_v1 }
 0x52b   : > { %v3024_v53 = vpop.f32.mrb[28].mxu1 }
 0x52c   : > { %v15915_v54 = vpop.f32.mrb[29].mxu1  ;;  %15954 = vmatmul.mubr.msk.f32.vlgmr.msra.gmra.mrb[36].mxu1 %vm2026_vm3, %v3024_v53  ;;  %v3972_v53 = vld [vmem:[%s19433_s11 + $0x30] sm:$0xff] }
 0x52d   : > { %15962 = vmatpush3.msra.mxu1 %v3325_v52  ;;  %15963 = vmatprep.mubr.msk.f32.mxu1 %vm17477_vm0, %v17478_v1  ;;  %v16783_v52 = vpack.c.bf16 %v3971_v51, %v3970_v50  ;;  %v3973_v54 = vld [vmem:[%s19433_s11 + $0x38] sm:$0xff]  ;;  %v17204_v51 = vld [vmem:[%s17827_s3] sm:$0xff] }
 0x52e   : > { %15971 = vmatprep.subr.mxu1 %v17478_v1 }
 0x52f   : > { %v3097_v56 = vpop.f32.mrb[26].mxu0 }
 0x530   : > { %v3170_v58 = vpop.f32.mrb[30].mxu1  ;;  %v15920_v59 = vpop.f32.mrb[27].mxu0  ;;  %15959 = vmatmul.mubr.msk.f32.vlgmr.msra.gmra.mrb[34].mxu0 %vm2026_vm3, %v3097_v56 }
 0x531   : > { %v15925_v60 = vpop.f32.mrb[31].mxu1  ;;  %15964 = vmatmul.mubr.msk.f32.vlgmr.msra.gmra.mrb[38].mxu1 %vm2026_vm3, %v3170_v58  ;;  %15967 = vmatpush3.msra.mxu0 %v3326_v55  ;;  %v16786_v55 = vpack.c.bf16 %v3973_v54, %v3972_v53  ;;  %v4186_v53 = vld [vmem:[#allocation7 + $0xc0] sm:$0xff]  ;;  %v4187_v54 = vld [vmem:[#allocation7 + $0xc8] sm:$0xff] }
 0x532   : > { %15968 = vmatprep.mubr.msk.f32.mxu0 %vm17477_vm0, %v17478_v1  ;;  %15972 = vmatpush3.msra.mxu1 %v3327_v57  ;;  %v14964_v60 = vld [vmem:[%s19431_s9] ss:$0 sm:$0xff] }
 0x533   : > { %15973 = vmatprep.mubr.msk.f32.mxu1 %vm17477_vm0, %v17478_v1  ;;  %16776 = vmatprep.subr.bf16.mxu0 %v17476_v0 }
 0x534   : > { %16788 = vmatprep.subr.bf16.mxu1 %v17476_v0 }
 0x537   : > { %v3243_v61 = vpop.f32.mrb[28].mxu0 }
 0x538   : > { %v3316_v62 = vpop.f32.mrb[32].mxu1  ;;  %v15930_v63 = vpop.f32.mrb[29].mxu0  ;;  %15969 = vmatmul.mubr.msk.f32.vlgmr.msra.gmra.mrb[36].mxu0 %vm2026_vm3, %v3243_v61 }
 0x539   : > { %v15935_v3 = vpop.f32.mrb[33].mxu1  ;;  %15974 = vmatmul.mubr.msk.f32.vlgmr.msra.gmra.mrb[40].mxu1 %vm2026_vm3, %v3316_v62  ;;  %15992 = vmatprep.mubr.msk.f32.mxu0 %vm17477_vm0, %v17478_v1  ;;  %v14965_v62 = vld [vmem:[%s19501_s20] ss:$0 sm:$0xff] }
 0x53a   : > { %16003 = vmatprep.mubr.msk.f32.mxu1 %vm17477_vm0, %v17478_v1  ;;  %16778 = vmatpush3.bf16.msra.mxu0 %v16777_v47  ;;  %v4184_v47 = vld [vmem:[#allocation7 + $0xb0] sm:$0xff] }
 0x53b   : > { %16779 = vmatprep.subr.bf16.mxu0 %v17476_v0 }
 0x5f3   : > { %v3397_v4 = vpop.f32.mrb[30].mxu0 }
 0x5f4   : > { %v15940_v5 = vpop.f32.mrb[31].mxu0  ;;  %v3912_v7 = vsel %vm752_vm1, %v3397_v4, 0.0  ;;  %v4061_v4 = vld [vmem:[%s19502_s6] sm:$0xff] }
 0x5f5   : > { %v4062_v5 = vld [vmem:[%s19502_s6 + $0x8] sm:$0xff] }
 0x5f7   : > { %v3470_v6 = vpop.f32.mrb[34].mxu1 }
 0x5f8   : > { %v3913_v8 = vsel %vm752_vm1, %v3470_v6, 0.0  ;;  %v15945_v10 = vpop.f32.mrb[35].mxu1  ;;  %v16789_v6 = vpack.c.bf16 %v4062_v5, %v4061_v4  ;;  %v15005_v4 = vld [vmem:[%s19427_s5 + $0x40] sm:$0xff]  ;;  %v15007_v5 = vld [vmem:[%s19427_s5 + $0x50] sm:$0xff] }
 0x5f9   : > { %v3914_v12 = vadd.f32 %v3913_v8, %v3912_v7  ;;  %v4063_v7 = vld [vmem:[%s19502_s6 + $0x10] sm:$0xff]  ;;  %v4064_v8 = vld [vmem:[%s19502_s6 + $0x18] sm:$0xff] }
 0x5fa   : > { %16790 = vmatpush3.bf16.msra.mxu1 %v16789_v6  ;;  %v16792_v10 = vpack.c.bf16 %v4064_v8, %v4063_v7  ;;  %v15006_v6 = vld [vmem:[%s19427_s5 + $0x48] sm:$0xff]  ;;  %v15009_v7 = vld [vmem:[%s19427_s5 + $0x60] sm:$0xff]  ;;  %v15008_v8 = vld [vmem:[%s19427_s5 + $0x58] sm:$0xff] }
 0x5fb   : > { %v3543_v13 = vpop.f32.mrb[32].mxu0  ;;  %16791 = vmatprep.subr.bf16.mxu1 %v17476_v0 }
 0x5fc   : > { %v3915_v14 = vsel %vm752_vm1, %v3543_v13, 0.0  ;;  %v15950_v15 = vpop.f32.mrb[33].mxu0 }
 0x5fd   : > { %v3916_v16 = vadd.f32 %v3915_v14, %v3914_v12  ;;  %v14966_v12 = vld [vmem:[%s19503_s4] ss:$0 sm:$0xff] }
 0x5fe   : > { %16793 = vmatpush3.bf16.msra.mxu1 %v16792_v10  ;;  %v15011_v10 = vld [vmem:[%s19427_s5 + $0x70] sm:$0xff] }
 0x5ff   : > { %v3616_v17 = vpop.f32.mrb[36].mxu1  ;;  %16794 = vmatprep.subr.bf16.mxu1 %v17476_v0 }
 0x600   : > { %v3917_v18 = vsel %vm752_vm1, %v3616_v17, 0.0  ;;  %v15955_v20 = vpop.f32.mrb[37].mxu1 }
 0x601   : > { %v3918_v21 = vadd.f32 %v3917_v18, %v3916_v16 }
 0x603   : > { %v3689_v11 = vpop.f32.mrb[34].mxu0 }
 0x604   : > { %v3919_v23 = vsel %vm752_vm1, %v3689_v11, 0.0  ;;  %v3762_v24 = vpop.f32.mrb[38].mxu1  ;;  %v15960_v26 = vpop.f32.mrb[35].mxu0  ;;  %v14969_v11 = vld [vmem:[%s19504_s19] ss:$0 sm:$0xff] }
 0x605   : > { %v3920_v22 = vadd.f32 %v3919_v23, %v3918_v21  ;;  %v15965_v27 = vpop.f32.mrb[39].mxu1  ;;  %v3921_v29 = vsel %vm752_vm1, %v3762_v24, 0.0 }
 0x607   : > { %v3922_v30 = vadd.f32 %v3921_v29, %v3920_v22 }
 0x60b   : > { %v3835_v31 = vpop.f32.mrb[36].mxu0 }
 0x60c   : > { %v3923_v32 = vsel %vm752_vm1, %v3835_v31, 0.0  ;;  %v3908_v19 = vpop.f32.mrb[40].mxu1  ;;  %v15970_v33 = vpop.f32.mrb[37].mxu0 }
 0x60d   : > { %v3924_v34 = vadd.f32 %v3923_v32, %v3922_v30  ;;  %v15975_v35 = vpop.f32.mrb[41].mxu1  ;;  %v3925_v36 = vsel %vm752_vm1, %v3908_v19, 0.0  ;;  %v4178_v33 = vld [vmem:[#allocation7 + $0x80] sm:$0xff] }
 0x60e   : > { %v4180_v35 = vld [vmem:[#allocation7 + $0x90] sm:$0xff] }
 0x60f   : > { %v3926_v37 = vadd.f32 %v3925_v36, %v3924_v34  ;;  %v4179_v34 = vld [vmem:[#allocation7 + $0x88] sm:$0xff] }
 0x610   : > { %v16795_v36 = vpack.c.bf16 %v4179_v34, %v4178_v33 }
 0x611   : > { %v3934_v25 = vadd.f32 %v14963_v28, %v3926_v37  ;;  %v4181_v28 = vld [vmem:[#allocation7 + $0x98] sm:$0xff] }
 0x612   : > { %v16799_v37 = vpack.c.bf16 %v4181_v28, %v4180_v35 }
 0x613   : > { %v3935_v38 = vadd.f32 %v3934_v25, %v17872_v9  ;;  %v3968_v9 = vld [vmem:[%s19433_s11 + $0x10] sm:$0xff] }
 0x614   : > { %v16780_v49 = vpack.c.bf16 %v3969_v48, %v3968_v9  ;;  %v4185_v9 = vld [vmem:[#allocation7 + $0xb8] sm:$0xff] }
 0x615   : > { %v3938_v44 = vsel %vm752_vm1, %v3935_v38, 0.0  ;;  %v16807_v50 = vpack.c.bf16 %v4185_v9, %v4184_v47 }
 0x616   : > { %3939 = vadd.xlane.f32.xlu1 %v3938_v44  ;;  %16781 = vmatpush3.bf16.msra.mxu0 %v16780_v49 }
 0x617   : > { %16782 = vmatprep.subr.bf16.mxu0 %v17476_v0 }
 0x61a   : > { %16784 = vmatpush3.bf16.msra.mxu0 %v16783_v52 }
 0x61b   : > { %16785 = vmatprep.subr.bf16.mxu0 %v17476_v0 }
 0x61e   : > { %16787 = vmatpush3.bf16.msra.mxu0 %v16786_v55  ;;  %v4188_v55 = vld [vmem:[#allocation7 + $0xd0] sm:$0xff] }
 0x61f   : > { %16798 = vmatprep.subr.bf16.mxu0 %v17476_v0 }
 0x6a3   : > { %v3940_v39 = vpop.xlane.xlu1 %3939 }
 0x6a4   : > { %v3942_v40 = vmul.f32 0.015625, %v3940_v39 }
 0x6a6   : > { %v3943_v41 = vsub.f32 %v3935_v38, %v3942_v40  ;;  %v14971_v40 = vld [vmem:[%s19505_s30] ss:$0 sm:$0xff] }
 0x6a8   : > { %v3944_v42 = vmul.f32 %v3943_v41, %v3943_v41 }
 0x6aa   : > { %v3945_v43 = vsel %vm752_vm1, %v3944_v42, 0.0  ;;  %v14972_v42 = vld [vmem:[%s19506_s23] ss:$0 sm:$0xff] }
 0x6ab   : > { %3946 = vadd.xlane.f32.xlu0 %v3945_v43  ;;  %v4182_v43 = vld [vmem:[#allocation7 + $0xa0] sm:$0xff] }
 0x6ac   : > { %v16803_v49 = vpack.c.bf16 %v4183_v46, %v4182_v43 }
 0x738   : > { %v3947_v56 = vpop.xlane.xlu0 %3946 }
 0x739   : > { %v3948_v57 = vmul.f32 0.015625, %v3947_v56  ;;  %v4189_v56 = vld [vmem:[#allocation7 + $0xd8] sm:$0xff] }
 0x73b   : > { %v3949_v58 = vadd.f32 1e-05, %v3948_v57  ;;  %v16811_v57 = vpack.c.bf16 %v4187_v54, %v4186_v53 }
 0x73d   : > { %17076 = vrsqrt.f32 %v3949_v58  ;;  %v16815_v58 = vpack.c.bf16 %v4189_v56, %v4188_v55 }
 0x747   : > { %v17077_v59 = vpop.eup %17076 }
 0x748   : > { %v3951_v61 = vmul.f32 %v17077_v59, %v3943_v41  ;;  %v4190_v59 = vld [vmem:[#allocation7 + $0xe0] sm:$0xff] }
 0x74a   : > { %v3958_v63 = vmul.f32 %v14964_v60, %v3951_v61  ;;  %v4191_v60 = vld [vmem:[#allocation7 + $0xe8] sm:$0xff]  ;;  %v4192_v61 = vld [vmem:[#allocation7 + $0xf0] sm:$0xff] }
 0x74c   : > { %v3965_v3 = vadd.f32 %v14965_v62, %v3958_v63  ;;  %v4193_v62 = vld [vmem:[#allocation7 + $0xf8] sm:$0xff]  ;;  %v16819_v63 = vpack.c.bf16 %v4191_v60, %v4190_v59 }
 0x74e   : > { %15993 = vmatmul.mubr.msk.f32.vlgmr.msra.gmra.mrb[38].mxu0 %vm752_vm1, %v3965_v3 }
 0x74f   : > { %16017 = vmatprep.mubr.msk.f32.mxu0 %vm17477_vm0, %v17478_v1  ;;  %16801 = vmatpush3.bf16.xpose.msk.msra.mxu0 %vm17863_vm2, %v16799_v37 }
 0x750   : > { %16806 = vmatprep.subr.bf16.mxu0 %v17476_v0 }
 0x821   : > { %v4050_v13 = vpop.f32.mrb[38].mxu0 }
 0x822   : > { %v4051_v14 = vadd.f32 %v14966_v12, %v4050_v13  ;;  %v15994_v15 = vpop.f32.mrb[39].mxu0  ;;  %v15010_v12 = vld [vmem:[%s19427_s5 + $0x68] sm:$0xff]  ;;  %v15012_v13 = vld [vmem:[%s19427_s5 + $0x78] sm:$0xff] }
 0x823   : > { %v14974_v15 = vld [vmem:[#allocation8 + $0x9] ss:$0 sm:$0xff] }
 0x824   : > { %v14968_v16 = vmul.f32 -1.442695, %v4051_v14 }
 0x826   : > { %17078 = vpow2.f32 %v14968_v16 }
 0x830   : > { %v17079_v17 = vpop.eup %17078 }
 0x831   : > { %v4057_v18 = vadd.f32 1.0, %v17079_v17 }
 0x833   : > { %17080 = vrcp.f32 %v4057_v18 }
 0x83d   : > { %v17081_v20 = vpop.eup %17080 }
 0x83e   : > { %v4060_v21 = vmul.f32 %v17081_v20, %v4051_v14  ;;  %v14973_v14 = vld [vmem:[#allocation8 + $0x8] ss:$0 sm:$0xff] }
 0x840   : > { %16004 = vmatmul.mubr.msk.f32.vlgmr.msra.gmra.mrb[42].mxu1 %vm4072_vm4, %v4060_v21 }
 0x841   : > { %16010 = vmatprep.mubr.msk.f32.mxu1 %vm17477_vm0, %v17478_v1  ;;  %16797 = vmatpush3.bf16.xpose.msk.msra.mxu1 %vm17863_vm2, %v16795_v36 }
 0x842   : > { %16802 = vmatprep.subr.bf16.mxu1 %v17476_v0 }
 0x913   : > { %v4142_v23 = vpop.f32.mrb[42].mxu1 }
 0x914   : > { %v4143_v24 = vadd.f32 %v14969_v11, %v4142_v23  ;;  %v16005_v26 = vpop.f32.mrb[43].mxu1  ;;  %v14975_v23 = vld [vmem:[#allocation8 + $0xa] ss:$0 sm:$0xff] }
 0x916   : > { %v4146_v22 = vadd.f32 %v4143_v24, %v3965_v3  ;;  %v16823_v3 = vpack.c.bf16 %v4193_v62, %v4192_v61 }
 0x918   : > { %v4149_v27 = vsel %vm752_vm1, %v4146_v22, 0.0 }
 0x919   : > { %4150 = vadd.xlane.f32.xlu1 %v4149_v27 }
 0x9a6   : > { %v4151_v29 = vpop.xlane.xlu1 %4150 }
 0x9a7   : > { %v4152_v30 = vmul.f32 0.015625, %v4151_v29 }
 0x9a9   : > { %v4153_v31 = vsub.f32 %v4146_v22, %v4152_v30  ;;  %v14976_v30 = vld [vmem:[#allocation8 + $0xb] ss:$0 sm:$0xff] }
 0x9ab   : > { %v4154_v32 = vmul.f32 %v4153_v31, %v4153_v31 }
 0x9ad   : > { %v4155_v19 = vsel %vm752_vm1, %v4154_v32, 0.0  ;;  %v14977_v32 = vld [vmem:[#allocation8 + $0xc] ss:$0 sm:$0xff] }
 0x9ae   : > { %4156 = vadd.xlane.f32.xlu0 %v4155_v19  ;;  %v14978_v19 = vld [vmem:[#allocation8 + $0xd] ss:$0 sm:$0xff] }
 0xa3b   : > { %v4157_v25 = vpop.xlane.xlu0 %4156 }
 0xa3c   : > { %v4158_v38 = vmul.f32 0.015625, %v4157_v25  ;;  %v14979_v25 = vld [vmem:[#allocation8 + $0xe] ss:$0 sm:$0xff] }
 0xa3e   : > { %v4159_v44 = vadd.f32 1e-05, %v4158_v38  ;;  %v14980_v38 = vld [vmem:[#allocation8 + $0xf] ss:$0 sm:$0xff] }
 0xa40   : > { %17082 = vrsqrt.f32 %v4159_v44 }
 0xa4a   : > { %v17083_v39 = vpop.eup %17082 }
 0xa4b   : > { %v4161_v41 = vmul.f32 %v17083_v39, %v4153_v31 }
 0xa4d   : > { %v4168_v45 = vmul.f32 %v14971_v40, %v4161_v41 }
 0xa4f   : > { %v18253_v48 = vadd.f32 %v14972_v42, %v4168_v45 }
 0xa51   : > { %v4176_v52 = vadd.f32 %v17204_v51, %v18253_v48 }
 0xa53   : > { %16011 = vmatmul.mubr.msk.f32.vlgmr.msra.gmra.mrb[44].mxu1 %vm752_vm1, %v4176_v52  ;;  %16018 = vmatmul.mubr.msk.f32.vlgmr.msra.gmra.mrb[40].mxu0 %vm752_vm1, %v4176_v52 }
 0xa54   : > { %16805 = vmatpush3.bf16.xpose.msk.msra.mxu1 %vm17863_vm2, %v16803_v49  ;;  %16809 = vmatpush3.bf16.xpose.msk.msra.mxu0 %vm17863_vm2, %v16807_v50 }
 0xa55   : > { %16024 = vmatprep.mubr.msk.f32.mxu1 %vm17477_vm0, %v17478_v1  ;;  %16031 = vmatprep.mubr.msk.f32.mxu0 %vm17477_vm0, %v17478_v1 }
 0xa56   : > { %16810 = vmatprep.subr.bf16.mxu1 %v17476_v0  ;;  %16814 = vmatprep.subr.bf16.mxu0 %v17476_v0 }
 0xa5b   : > { %16025 = vmatmul.mubr.msk.f32.vlgmr.msra.gmra.mrb[46].mxu1 %vm752_vm1, %v4176_v52  ;;  %16032 = vmatmul.mubr.msk.f32.vlgmr.msra.gmra.mrb[42].mxu0 %vm752_vm1, %v4176_v52 }
 0xa5c   : > { %16813 = vmatpush3.bf16.xpose.msk.msra.mxu1 %vm17863_vm2, %v16811_v57  ;;  %16817 = vmatpush3.bf16.xpose.msk.msra.mxu0 %vm17863_vm2, %v16815_v58 }
 0xa5d   : > { %16038 = vmatprep.mubr.msk.f32.mxu1 %vm17477_vm0, %v17478_v1  ;;  %16045 = vmatprep.mubr.msk.f32.mxu0 %vm17477_vm0, %v17478_v1 }
 0xa5e   : > { %16818 = vmatprep.subr.bf16.mxu1 %v17476_v0  ;;  %16822 = vmatprep.subr.bf16.mxu0 %v17476_v0 }
 0xa63   : > { %16039 = vmatmul.mubr.msk.f32.vlgmr.msra.gmra.mrb[48].mxu1 %vm752_vm1, %v4176_v52  ;;  %16046 = vmatmul.mubr.msk.f32.vlgmr.msra.gmra.mrb[44].mxu0 %vm752_vm1, %v4176_v52 }
 0xa64   : > { %16821 = vmatpush3.bf16.xpose.msk.msra.mxu1 %vm17863_vm2, %v16819_v63  ;;  %16825 = vmatpush3.bf16.xpose.msk.msra.mxu0 %vm17863_vm2, %v16823_v3 }
 0xa65   : > { %16052 = vmatprep.mubr.msk.f32.mxu1 %vm17477_vm0, %v17478_v1  ;;  %16059 = vmatprep.mubr.msk.f32.mxu0 %vm17477_vm0, %v17478_v1 }
 0xa66   : > { %16062 = vmatprep.subr.mxu1 %v17478_v1  ;;  %16072 = vmatprep.subr.mxu0 %v17478_v1 }
 0xa6b   : > { %16053 = vmatmul.mubr.msk.f32.vlgmr.msra.gmra.mrb[50].mxu1 %vm752_vm1, %v4176_v52  ;;  %16060 = vmatmul.mubr.msk.f32.vlgmr.msra.gmra.mrb[46].mxu0 %vm752_vm1, %v4176_v52 }
 0xa6c   : > { %16063 = vmatpush3.xpose.msk.msra.mxu1 %vm752_vm1, %v15005_v4  ;;  %16073 = vmatpush3.xpose.msk.msra.mxu0 %vm752_vm1, %v15007_v5 }
 0xa6d   : > { %16064 = vmatprep.mubr.msk.f32.mxu1 %vm17477_vm0, %v17478_v1  ;;  %16074 = vmatprep.mubr.msk.f32.mxu0 %vm17477_vm0, %v17478_v1 }
 0xa6e   : > { %16067 = vmatprep.subr.mxu1 %v17478_v1  ;;  %16082 = vmatprep.subr.mxu0 %v17478_v1 }
 0xa6f   : > { %16065 = vmatmul.mubr.msk.f32.vlgmr.msra.gmra.mrb[52].mxu1 %vm752_vm1, %v18253_v48  ;;  %16075 = vmatmul.mubr.msk.f32.vlgmr.msra.gmra.mrb[48].mxu0 %vm752_vm1, %v18253_v48 }
 0xa70   : > { %16068 = vmatpush3.xpose.msk.msra.mxu1 %vm752_vm1, %v15006_v6  ;;  %16083 = vmatpush3.xpose.msk.msra.mxu0 %vm752_vm1, %v15009_v7 }
 0xa71   : > { %16069 = vmatprep.mubr.msk.f32.mxu1 %vm17477_vm0, %v17478_v1  ;;  %16084 = vmatprep.mubr.msk.f32.mxu0 %vm17477_vm0, %v17478_v1 }
 0xa72   : > { %16077 = vmatprep.subr.mxu1 %v17478_v1  ;;  %16092 = vmatprep.subr.mxu0 %v17478_v1 }
 0xa73   : > { %16070 = vmatmul.mubr.msk.f32.vlgmr.msra.gmra.mrb[54].mxu1 %vm752_vm1, %v18253_v48  ;;  %16085 = vmatmul.mubr.msk.f32.vlgmr.msra.gmra.mrb[50].mxu0 %vm752_vm1, %v18253_v48 }
 0xa74   : > { %16078 = vmatpush3.xpose.msk.msra.mxu1 %vm752_vm1, %v15008_v8  ;;  %16093 = vmatpush3.xpose.msk.msra.mxu0 %vm752_vm1, %v15011_v10 }
 0xa75   : > { %16079 = vmatprep.mubr.msk.f32.mxu1 %vm17477_vm0, %v17478_v1  ;;  %16094 = vmatprep.mubr.msk.f32.mxu0 %vm17477_vm0, %v17478_v1 }
 0xa76   : > { %16087 = vmatprep.subr.mxu1 %v17478_v1  ;;  %16102 = vmatprep.subr.mxu0 %v17478_v1 }
 0xa77   : > { %16080 = vmatmul.mubr.msk.f32.vlgmr.msra.gmra.mrb[56].mxu1 %vm752_vm1, %v18253_v48  ;;  %16095 = vmatmul.mubr.msk.f32.vlgmr.msra.gmra.mrb[52].mxu0 %vm752_vm1, %v18253_v48 }
 0xa78   : > { %16088 = vmatpush3.xpose.msk.msra.mxu1 %vm752_vm1, %v15010_v12  ;;  %16089 = vmatprep.mubr.msk.f32.mxu1 %vm17477_vm0, %v17478_v1 }
 0xa79   : > { %16097 = vmatprep.subr.mxu1 %v17478_v1  ;;  %16104 = vmatprep.mubr.msk.f32.mxu0 %vm17477_vm0, %v17478_v1 }
 0xa7b   : > { %16090 = vmatmul.mubr.msk.f32.vlgmr.msra.gmra.mrb[58].mxu1 %vm752_vm1, %v18253_v48 }
 0xa7c   : > { %16098 = vmatpush3.xpose.msk.msra.mxu1 %vm752_vm1, %v15012_v13  ;;  %16099 = vmatprep.mubr.msk.f32.mxu1 %vm17477_vm0, %v17478_v1 }
 0xa7d   : > { %16107 = vmatprep.subr.mxu1 %v17478_v1 }
 0xa7f   : > { %16100 = vmatmul.mubr.msk.f32.vlgmr.msra.gmra.mrb[60].mxu1 %vm752_vm1, %v18253_v48 }
 0xa80   : > { %16109 = vmatprep.mubr.msk.f32.mxu1 %vm17477_vm0, %v17478_v1 }
 0xb26   : > { %v4326_v16 = vpop.f32.mrb[44].mxu1  ;;  %v4402_v17 = vpop.f32.mrb[40].mxu0 }
 0xb27   : > { %v4327_v18 = vadd.f32 %v14973_v14, %v4326_v16  ;;  %v4403_v20 = vadd.f32 %v14974_v15, %v4402_v17  ;;  %v16012_v21 = vpop.f32.mrb[45].mxu1  ;;  %v16019_v11 = vpop.f32.mrb[41].mxu0  ;;  %v15013_v14 = vld [vmem:[#allocation10 + $0x8] ss:$0 sm:$0xff]  ;;  %v15014_v15 = vld [vmem:[#allocation10 + $0x9] ss:$0 sm:$0xff] }
 0xb29   : > { %5524 = vrot.lane.b32.xlu1 %v4327_v18, %s19455_s13  ;;  %5602 = vrot.lane.b32.xlu0 %v4403_v20, %s19455_s13  ;;  %v4862_v63 = vmul.f32 0.35355338, %v4327_v18  ;;  %v4863_v3 = vmul.f32 0.35355338, %v4403_v20 }
 0xb2e   : > { %v4478_v24 = vpop.f32.mrb[46].mxu1  ;;  %v4554_v26 = vpop.f32.mrb[42].mxu0 }
 0xb2f   : > { %v4479_v22 = vadd.f32 %v14975_v23, %v4478_v24  ;;  %v16026_v27 = vpop.f32.mrb[47].mxu1  ;;  %v16033_v29 = vpop.f32.mrb[43].mxu0  ;;  %v4555_v31 = vadd.f32 %v14976_v30, %v4554_v26  ;;  %v17205_v26 = vld [vmem:[%s17835_s12] sm:$0xff] }
 0xb31   : > { %5680 = vrot.lane.b32.xlu1 %v4479_v22, %s19455_s13  ;;  %v4864_v5 = vmul.f32 0.35355338, %v4479_v22  ;;  %v4865_v7 = vmul.f32 0.35355338, %v4555_v31 }
 0xb35   : > { %5758 = vrot.lane.b32.xlu1 %v4555_v31, %s19455_s13 }
 0xb36   : > { %v4630_v33 = vpop.f32.mrb[48].mxu1  ;;  %v4706_v34 = vpop.f32.mrb[44].mxu0 }
 0xb37   : > { %v4631_v35 = vadd.f32 %v14977_v32, %v4630_v33  ;;  %v4707_v36 = vadd.f32 %v14978_v19, %v4706_v34  ;;  %v16040_v28 = vpop.f32.mrb[49].mxu1  ;;  %v16047_v37 = vpop.f32.mrb[45].mxu0 }
 0xb39   : > { %5836 = vrot.lane.b32.xlu0 %v4631_v35, %s19455_s13  ;;  %5914 = vrot.lane.b32.xlu1 %v4707_v36, %s19455_s13  ;;  %v4866_v12 = vmul.f32 0.35355338, %v4631_v35  ;;  %v4867_v13 = vmul.f32 0.35355338, %v4707_v36 }
 0xb3e   : > { %v4782_v44 = vpop.f32.mrb[50].mxu1  ;;  %v4858_v39 = vpop.f32.mrb[46].mxu0 }
 0xb3f   : > { %v18377_v40 = vadd.f32 %v14979_v25, %v4782_v44  ;;  %v18379_v41 = vadd.f32 %v14980_v38, %v4858_v39  ;;  %v16054_v42 = vpop.f32.mrb[51].mxu1  ;;  %v16061_v43 = vpop.f32.mrb[47].mxu0 }
 0xb41   : > { %5992 = vrot.lane.b32.xlu0 %v18377_v40, %s19455_s13  ;;  %6070 = vrot.lane.b32.xlu1 %v18379_v41, %s19455_s13  ;;  %v4868_v18 = vmul.f32 0.35355338, %v18377_v40  ;;  %v4869_v20 = vmul.f32 0.35355338, %v18379_v41 }
 0xb42   : > { %v5008_v45 = vpop.f32.mrb[52].mxu1  ;;  %v18385_v46 = vpop.f32.mrb[48].mxu0 }
 0xb43   : > { %v16066_v47 = vpop.f32.mrb[53].mxu1  ;;  %v16076_v9 = vpop.f32.mrb[49].mxu0  ;;  %v5009_v21 = vadd.f32 %v15013_v14, %v5008_v45 }
 0xb46   : > { %v5081_v49 = vpop.f32.mrb[54].mxu1  ;;  %v18387_v50 = vpop.f32.mrb[50].mxu0 }
 0xb47   : > { %v16071_v51 = vpop.f32.mrb[55].mxu1  ;;  %v16086_v52 = vpop.f32.mrb[51].mxu0  ;;  %v5082_v11 = vadd.f32 %v15014_v15, %v5081_v49 }
 0xb4a   : > { %v18389_v53 = vpop.f32.mrb[56].mxu1  ;;  %v18391_v54 = vpop.f32.mrb[52].mxu0 }
 0xb4b   : > { %v16081_v55 = vpop.f32.mrb[57].mxu1  ;;  %v16096_v56 = vpop.f32.mrb[53].mxu0 }
 0xb4e   : > { %v18393_v57 = vpop.f32.mrb[58].mxu1 }
 0xb4f   : > { %v16091_v58 = vpop.f32.mrb[59].mxu1 }
 0xb52   : > { %v18395_v59 = vpop.f32.mrb[60].mxu1 }
 0xb53   : > { %v16101_v60 = vpop.f32.mrb[61].mxu1 }
 0xb9b   : > { %v5525_v61 = vpop.permute.xlu1 %5524  ;;  %v5603_v62 = vpop.permute.xlu0 %5602 }
 0xb9c   : > { %16103 = vmatpush3.xpose.msk.msra.mxu0 %vm2026_vm3, %v5525_v61  ;;  %16108 = vmatpush3.xpose.msk.msra.mxu1 %vm2026_vm3, %v5603_v62 }
 0xb9d   : > { %16112 = vmatprep.subr.mxu0 %v17478_v1  ;;  %16117 = vmatprep.subr.mxu1 %v17478_v1 }
 0xb9f   : > { %16105 = vmatmul.mubr.msk.f32.vlgmr.msra.gmra.mrb[54].mxu0 %vm2026_vm3, %v4862_v63  ;;  %16110 = vmatmul.mubr.msk.f32.vlgmr.msra.gmra.mrb[62].mxu1 %vm2026_vm3, %v4863_v3 }
 0xba0   : > { %16114 = vmatprep.mubr.msk.f32.mxu0 %vm17477_vm0, %v17478_v1  ;;  %16119 = vmatprep.mubr.msk.f32.mxu1 %vm17477_vm0, %v17478_v1 }
 0xba3   : > { %v5681_v4 = vpop.permute.xlu1 %5680 }
 0xba4   : > { %16113 = vmatpush3.xpose.msk.msra.mxu0 %vm2026_vm3, %v5681_v4 }
 0xba5   : > { %16122 = vmatprep.subr.mxu0 %v17478_v1 }
 0xba7   : > { %16115 = vmatmul.mubr.msk.f32.vlgmr.msra.gmra.mrb[56].mxu0 %vm2026_vm3, %v4864_v5  ;;  %v5759_v6 = vpop.permute.xlu1 %5758 }
 0xba8   : > { %16118 = vmatpush3.xpose.msk.msra.mxu1 %vm2026_vm3, %v5759_v6  ;;  %16124 = vmatprep.mubr.msk.f32.mxu0 %vm17477_vm0, %v17478_v1 }
 0xba9   : > { %16127 = vmatprep.subr.mxu1 %v17478_v1 }
 0xbab   : > { %v5837_v8 = vpop.permute.xlu0 %5836  ;;  %16120 = vmatmul.mubr.msk.f32.vlgmr.msra.gmra.mrb[64].mxu1 %vm2026_vm3, %v4865_v7  ;;  %v5915_v10 = vpop.permute.xlu1 %5914 }
 0xbac   : > { %16123 = vmatpush3.xpose.msk.msra.mxu0 %vm2026_vm3, %v5837_v8  ;;  %16128 = vmatpush3.xpose.msk.msra.mxu1 %vm2026_vm3, %v5915_v10 }
 0xbad   : > { %16129 = vmatprep.mubr.msk.f32.mxu1 %vm17477_vm0, %v17478_v1  ;;  %16132 = vmatprep.subr.mxu0 %v17478_v1 }
 0xbae   : > { %16137 = vmatprep.subr.mxu1 %v17478_v1 }
 0xbaf   : > { %16125 = vmatmul.mubr.msk.f32.vlgmr.msra.gmra.mrb[58].mxu0 %vm2026_vm3, %v4866_v12  ;;  %16130 = vmatmul.mubr.msk.f32.vlgmr.msra.gmra.mrb[66].mxu1 %vm2026_vm3, %v4867_v13 }
 0xbb0   : > { %16134 = vmatprep.mubr.msk.f32.mxu0 %vm17477_vm0, %v17478_v1  ;;  %16139 = vmatprep.mubr.msk.f32.mxu1 %vm17477_vm0, %v17478_v1 }
 0xbb3   : > { %v5993_v16 = vpop.permute.xlu0 %5992  ;;  %v6071_v17 = vpop.permute.xlu1 %6070 }
 0xbb4   : > { %16133 = vmatpush3.xpose.msk.msra.mxu0 %vm2026_vm3, %v5993_v16  ;;  %16138 = vmatpush3.xpose.msk.msra.mxu1 %vm2026_vm3, %v6071_v17 }
 0xbb5   : > { %16142 = vmatprep.subr.mxu0 %v17478_v1  ;;  %16147 = vmatprep.subr.mxu1 %v17478_v1 }
 0xbb7   : > { %16135 = vmatmul.mubr.msk.f32.vlgmr.msra.gmra.mrb[60].mxu0 %vm2026_vm3, %v4868_v18  ;;  %16140 = vmatmul.mubr.msk.f32.vlgmr.msra.gmra.mrb[68].mxu1 %vm2026_vm3, %v4869_v20 }
 0xbb8   : > { %16143 = vmatpush3.msra.mxu0 %v5009_v21  ;;  %16148 = vmatpush3.msra.mxu1 %v5082_v11 }
 0xbb9   : > { %16144 = vmatprep.mubr.msk.f32.mxu0 %vm17477_vm0, %v17478_v1  ;;  %16149 = vmatprep.mubr.msk.f32.mxu1 %vm17477_vm0, %v17478_v1 }
 0xbba   : > { %16152 = vmatprep.subr.mxu0 %v17478_v1  ;;  %16157 = vmatprep.subr.mxu1 %v17478_v1 }
 0xc72   : > { %v5597_v23 = vpop.f32.mrb[54].mxu0  ;;  %v5675_v24 = vpop.f32.mrb[62].mxu1 }
 0xc73   : > { %v5598_v22 = vadd.f32 %v17205_v26, %v5597_v23  ;;  %v5676_v27 = vadd.f32 %v17205_v26, %v5675_v24  ;;  %v16106_v29 = vpop.f32.mrb[55].mxu0  ;;  %v16111_v30 = vpop.f32.mrb[63].mxu1 }
 0xc75   : > { %v6150_v31 = vsel %vm2026_vm3, %v5676_v27, -inf  ;;  %v6147_v32 = vsel %vm2026_vm3, %v5598_v22, -inf }
 0xc76   : > { %6151 = vmax.xlane.f32.xlu1 %v6150_v31  ;;  %6148 = vmax.xlane.f32.xlu0 %v6147_v32 }
 0xc7a   : > { %v5753_v19 = vpop.f32.mrb[56].mxu0 }
 0xc7b   : > { %v5754_v33 = vadd.f32 %v17205_v26, %v5753_v19  ;;  %v16116_v34 = vpop.f32.mrb[57].mxu0 }
 0xc7d   : > { %v6153_v35 = vsel %vm2026_vm3, %v5754_v33, -inf }
 0xc7e   : > { %v5831_v36 = vpop.f32.mrb[64].mxu1  ;;  %6154 = vmax.xlane.f32.xlu0 %v6153_v35 }
 0xc7f   : > { %v5832_v28 = vadd.f32 %v17205_v26, %v5831_v36  ;;  %v16121_v37 = vpop.f32.mrb[65].mxu1 }
 0xc81   : > { %v6156_v25 = vsel %vm2026_vm3, %v5832_v28, -inf }
 0xc82   : > { %v5987_v38 = vpop.f32.mrb[66].mxu1  ;;  %6157 = vmax.xlane.f32.xlu0 %v6156_v25  ;;  %v5909_v44 = vpop.f32.mrb[58].mxu0 }
 0xc83   : > { %v5988_v39 = vadd.f32 %v17205_v26, %v5987_v38  ;;  %v5910_v40 = vadd.f32 %v17205_v26, %v5909_v44  ;;  %v16126_v41 = vpop.f32.mrb[59].mxu0  ;;  %v16131_v42 = vpop.f32.mrb[67].mxu1 }
 0xc84   : > { %v15016_v42 = vld [vmem:[#allocation10 + $0xb] ss:$0 sm:$0xff] }
 0xc85   : > { %v6162_v43 = vsel %vm2026_vm3, %v5988_v39, -inf  ;;  %v6159_v45 = vsel %vm2026_vm3, %v5910_v40, -inf }
 0xc86   : > { %6163 = vmax.xlane.f32.xlu0 %v6162_v43  ;;  %6160 = vmax.xlane.f32.xlu1 %v6159_v45  ;;  %v15015_v45 = vld [vmem:[#allocation10 + $0xa] ss:$0 sm:$0xff] }
 0xc8a   : > { %v6065_v47 = vpop.f32.mrb[60].mxu0  ;;  %v6143_v9 = vpop.f32.mrb[68].mxu1 }
 0xc8b   : > { %v6066_v49 = vadd.f32 %v17205_v26, %v6065_v47  ;;  %v6144_v51 = vadd.f32 %v17205_v26, %v6143_v9  ;;  %v16136_v52 = vpop.f32.mrb[61].mxu0  ;;  %v16141_v55 = vpop.f32.mrb[69].mxu1 }
 0xc8c   : > { %v5155_v55 = vadd.f32 %v15015_v45, %v18385_v46 }
 0xc8d   : > { %v6168_v56 = vsel %vm2026_vm3, %v6144_v51, -inf  ;;  %v6165_v58 = vsel %vm2026_vm3, %v6066_v49, -inf }
 0xc8e   : > { %6169 = vmax.xlane.f32.xlu0 %v6168_v56  ;;  %6166 = vmax.xlane.f32.xlu1 %v6165_v58 }
 0xd03   : > { %v6152_v60 = vpop.xlane.xlu1 %6151  ;;  %v6149_v61 = vpop.xlane.xlu0 %6148 }
 0xd04   : > { %v6172_v62 = vsub.f32 %v5676_v27, %v6152_v60  ;;  %v6171_v63 = vsub.f32 %v5598_v22, %v6149_v61 }
 0xd06   : > { %v6181_v3 = vmul.f32 1.442695, %v6172_v62  ;;  %v6179_v4 = vmul.f32 1.442695, %v6171_v63  ;;  %v15018_v62 = vld [vmem:[#allocation10 + $0xd] ss:$0 sm:$0xff] }
 0xd08   : > { %17084 = vpow2.f32 %v6181_v3 }
 0xd09   : > { %17086 = vpow2.f32 %v6179_v4 }
 0xd0b   : > { %v6155_v5 = vpop.xlane.xlu0 %6154 }
 0xd0c   : > { %v6173_v6 = vsub.f32 %v5754_v33, %v6155_v5  ;;  %v5374_v5 = vadd.f32 %v15018_v62, %v18393_v57 }
 0xd0e   : > { %v6183_v7 = vmul.f32 1.442695, %v6173_v6 }
 0xd0f   : > { %v6158_v8 = vpop.xlane.xlu0 %6157 }
 0xd10   : > { %17088 = vpow2.f32 %v6183_v7  ;;  %v6174_v10 = vsub.f32 %v5832_v28, %v6158_v8  ;;  %v15020_v7 = vld [vmem:[#allocation10 + $0xf] ss:$0 sm:$0xff]  ;;  %v15019_v8 = vld [vmem:[#allocation10 + $0xe] ss:$0 sm:$0xff] }
 0xd12   : > { %v17085_v12 = vpop.eup %17084  ;;  %v6185_v13 = vmul.f32 1.442695, %v6174_v10 }
 0xd13   : > { %v17087_v14 = vpop.eup %17086  ;;  %v6164_v15 = vpop.xlane.xlu0 %6163  ;;  %v6198_v17 = vsel %vm2026_vm3, %v17085_v12, 0.0 }
 0xd14   : > { %v6161_v16 = vpop.xlane.xlu1 %6160  ;;  %17090 = vpow2.f32 %v6185_v13  ;;  %v6176_v18 = vsub.f32 %v5988_v39, %v6164_v15  ;;  %6199 = vadd.xlane.f32.xlu0 %v6198_v17  ;;  %v6195_v21 = vsel %vm2026_vm3, %v17087_v14, 0.0  ;;  %v5520_v13 = vadd.f32 %v15020_v7, %v18395_v59  ;;  %v6820_v17 = vld [vmem:[#allocation11 + $0x40] sm:$0xff] }
 0xd15   : > { %v6175_v20 = vsub.f32 %v5910_v40, %v6161_v16  ;;  %6196 = vadd.xlane.f32.xlu1 %v6195_v21 }
 0xd16   : > { %v6189_v11 = vmul.f32 1.442695, %v6176_v18  ;;  %v6821_v18 = vld [vmem:[#allocation11 + $0x48] sm:$0xff] }
 0xd17   : > { %v6187_v23 = vmul.f32 1.442695, %v6175_v20  ;;  %v6823_v20 = vld [vmem:[#allocation11 + $0x58] sm:$0xff] }
 0xd18   : > { %17092 = vpow2.f32 %v6189_v11  ;;  %v6822_v11 = vld [vmem:[#allocation11 + $0x50] sm:$0xff] }
 0xd19   : > { %17094 = vpow2.f32 %v6187_v23 }
 0xd1a   : > { %v17089_v24 = vpop.eup %17088 }
 0xd1b   : > { %v6170_v26 = vpop.xlane.xlu0 %6169  ;;  %v6167_v22 = vpop.xlane.xlu1 %6166  ;;  %v6201_v27 = vsel %vm2026_vm3, %v17089_v24, 0.0 }
 0xd1c   : > { %v6178_v29 = vsub.f32 %v6144_v51, %v6170_v26  ;;  %v6177_v30 = vsub.f32 %v6066_v49, %v6167_v22  ;;  %6202 = vadd.xlane.f32.xlu1 %v6201_v27  ;;  %v5228_v51 = vadd.f32 %v15016_v42, %v18389_v53  ;;  %v15017_v53 = vld [vmem:[#allocation10 + $0xc] ss:$0 sm:$0xff]  ;;  %v6824_v22 = vld [vmem:[#allocation11 + $0x60] sm:$0xff] }
 0xd1d   : > { %v5301_v61 = vadd.f32 %v15017_v53, %v18387_v50 }
 0xd1e   : > { %v17091_v31 = vpop.eup %17090  ;;  %v6193_v32 = vmul.f32 1.442695, %v6178_v29  ;;  %v6191_v19 = vmul.f32 1.442695, %v6177_v30  ;;  %v6825_v30 = vld [vmem:[#allocation11 + $0x68] sm:$0xff] }
 0xd1f   : > { %v6204_v33 = vsel %vm2026_vm3, %v17091_v31, 0.0 }
 0xd20   : > { %17096 = vpow2.f32 %v6193_v32  ;;  %6205 = vadd.xlane.f32.xlu0 %v6204_v33 }
 0xd21   : > { %17098 = vpow2.f32 %v6191_v19  ;;  %v6827_v19 = vld [vmem:[#allocation11 + $0x78] sm:$0xff] }
 0xd22   : > { %v18454_v34 = vpop.eup %17092 }
 0xd23   : > { %v18456_v35 = vpop.eup %17094  ;;  %v6210_v36 = vsel %vm2026_vm3, %v18454_v34, 0.0 }
 0xd24   : > { %6211 = vadd.xlane.f32.xlu0 %v6210_v36  ;;  %v6207_v28 = vsel %vm2026_vm3, %v18456_v35, 0.0 }
 0xd25   : > { %6208 = vadd.xlane.f32.xlu1 %v6207_v28 }
 0xd2a   : > { %v18462_v37 = vpop.eup %17096 }
 0xd2b   : > { %v18464_v25 = vpop.eup %17098  ;;  %v6216_v38 = vsel %vm2026_vm3, %v18462_v37, 0.0 }
 0xd2c   : > { %6217 = vadd.xlane.f32.xlu0 %v6216_v38  ;;  %v6213_v44 = vsel %vm2026_vm3, %v18464_v25, 0.0 }
 0xd2d   : > { %6214 = vadd.xlane.f32.xlu1 %v6213_v44 }
 0xda1   : > { %v6200_v39 = vpop.xlane.xlu0 %6199 }
 0xda2   : > { %17100 = vrcp.f32 %v6200_v39  ;;  %v6197_v40 = vpop.xlane.xlu1 %6196 }
 0xda3   : > { %17102 = vrcp.f32 %v6197_v40 }
 0xda9   : > { %v6203_v41 = vpop.xlane.xlu1 %6202 }
 0xdaa   : > { %17104 = vrcp.f32 %v6203_v41 }
 0xdac   : > { %v17101_v43 = vpop.eup %17100 }
 0xdad   : > { %v17103_v47 = vpop.eup %17102  ;;  %v6228_v9 = vmul.f32 %v17101_v43, %v17085_v12  ;;  %v6206_v49 = vpop.xlane.xlu0 %6205 }
 0xdae   : > { %v6227_v52 = vmul.f32 %v17103_v47, %v17087_v14  ;;  %17106 = vrcp.f32 %v6206_v49  ;;  %v5447_v14 = vadd.f32 %v15019_v8, %v18391_v54 }
 0xdaf   : > { %16150 = vmatmul.mubr.msk.f32.vlgmr.msra.gmra.mrb[70].mxu1 %vm2026_vm3, %v6228_v9 }
 0xdb0   : > { %16145 = vmatmul.mubr.msk.f32.vlgmr.msra.gmra.mrb[62].mxu0 %vm2026_vm3, %v6227_v52  ;;  %16158 = vmatpush3.msra.mxu1 %v5228_v51 }
 0xdb1   : > { %16153 = vmatpush3.msra.mxu0 %v5155_v55  ;;  %v6212_v56 = vpop.xlane.xlu0 %6211  ;;  %16154 = vmatprep.mubr.msk.f32.mxu0 %vm17477_vm0, %v17478_v1 }
 0xdb2   : > { %17108 = vrcp.f32 %v6212_v56  ;;  %v6209_v58 = vpop.xlane.xlu1 %6208  ;;  %16162 = vmatprep.subr.mxu0 %v17478_v1  ;;  %16159 = vmatprep.mubr.msk.f32.mxu1 %vm17477_vm0, %v17478_v1 }
 0xdb3   : > { %17110 = vrcp.f32 %v6209_v58  ;;  %16167 = vmatprep.subr.mxu1 %v17478_v1 }
 0xdb4   : > { %v17105_v46 = vpop.eup %17104 }
 0xdb5   : > { %v6229_v60 = vmul.f32 %v17105_v46, %v17089_v24 }
 0xdb7   : > { %16155 = vmatmul.mubr.msk.f32.vlgmr.msra.gmra.mrb[64].mxu0 %vm2026_vm3, %v6229_v60 }
 0xdb8   : > { %v17107_v63 = vpop.eup %17106  ;;  %16163 = vmatpush3.msra.mxu0 %v5301_v61  ;;  %16164 = vmatprep.mubr.msk.f32.mxu0 %vm17477_vm0, %v17478_v1 }
 0xdb9   : > { %v6230_v3 = vmul.f32 %v17107_v63, %v17091_v31  ;;  %v6218_v4 = vpop.xlane.xlu0 %6217  ;;  %16172 = vmatprep.subr.mxu0 %v17478_v1 }
 0xdba   : > { %17112 = vrcp.f32 %v6218_v4  ;;  %v6215_v6 = vpop.xlane.xlu1 %6214 }
 0xdbb   : > { %17114 = vrcp.f32 %v6215_v6  ;;  %16160 = vmatmul.mubr.msk.f32.vlgmr.msra.gmra.mrb[72].mxu1 %vm2026_vm3, %v6230_v3 }
 0xdbc   : > { %v17109_v50 = vpop.eup %17108  ;;  %16168 = vmatpush3.msra.mxu1 %v5374_v5  ;;  %16169 = vmatprep.mubr.msk.f32.mxu1 %vm17477_vm0, %v17478_v1 }
 0xdbd   : > { %v17111_v10 = vpop.eup %17110  ;;  %v6232_v12 = vmul.f32 %v17109_v50, %v18454_v34  ;;  %16177 = vmatprep.subr.mxu1 %v17478_v1  ;;  %v6826_v34 = vld [vmem:[#allocation11 + $0x70] sm:$0xff] }
 0xdbe   : > { %v6231_v57 = vmul.f32 %v17111_v10, %v18456_v35 }
 0xdbf   : > { %16170 = vmatmul.mubr.msk.f32.vlgmr.msra.gmra.mrb[74].mxu1 %vm2026_vm3, %v6232_v12 }
 0xdc0   : > { %16165 = vmatmul.mubr.msk.f32.vlgmr.msra.gmra.mrb[66].mxu0 %vm2026_vm3, %v6231_v57  ;;  %16178 = vmatpush3.msra.mxu1 %v5520_v13  ;;  %v15070_v57 = vld [vmem:[%s19430_s8 + $0x1] ss:$0 sm:$0xff] }
 0xdc1   : > { %16173 = vmatpush3.msra.mxu0 %v5447_v14  ;;  %16174 = vmatprep.mubr.msk.f32.mxu0 %vm17477_vm0, %v17478_v1 }
 0xdc2   : > { %16179 = vmatprep.mubr.msk.f32.mxu1 %vm17477_vm0, %v17478_v1  ;;  %16182 = vmatprep.subr.mxu0 %v17478_v1 }
 0xdc3   : > { %16187 = vmatprep.subr.mxu1 %v17478_v1 }
 0xdc4   : > { %v17113_v59 = vpop.eup %17112 }
 0xdc5   : > { %v17115_v15 = vpop.eup %17114  ;;  %v6234_v54 = vmul.f32 %v17113_v59, %v18462_v37 }
 0xdc6   : > { %v6233_v16 = vmul.f32 %v17115_v15, %v18464_v25 }
 0xdc7   : > { %16180 = vmatmul.mubr.msk.f32.vlgmr.msra.gmra.mrb[76].mxu1 %vm2026_vm3, %v6234_v54 }
 0xdc8   : > { %16175 = vmatmul.mubr.msk.f32.vlgmr.msra.gmra.mrb[68].mxu0 %vm2026_vm3, %v6233_v16  ;;  %16189 = vmatprep.mubr.msk.f32.mxu1 %vm17477_vm0, %v17478_v1 }
 0xdc9   : > { %16184 = vmatprep.mubr.msk.f32.mxu0 %vm17477_vm0, %v17478_v1  ;;  %16183 = vmatpush3.msra.mxu0 %v6820_v17 }
 0xdca   : > { %16188 = vmatpush3.msra.mxu1 %v6821_v18  ;;  %16192 = vmatprep.subr.mxu0 %v17478_v1 }
 0xdcb   : > { %16197 = vmatprep.subr.mxu1 %v17478_v1 }
 0xe82   : > { %v6377_v21 = vpop.f32.mrb[70].mxu1 }
 0xe83   : > { %v6304_v23 = vpop.f32.mrb[62].mxu0  ;;  %v16151_v24 = vpop.f32.mrb[71].mxu1  ;;  %16190 = vmatmul.mubr.msk.f32.vlgmr.msra.gmra.mrb[78].mxu1 %vm2026_vm3, %v6377_v21 }
 0xe84   : > { %v16146_v26 = vpop.f32.mrb[63].mxu0  ;;  %16185 = vmatmul.mubr.msk.f32.vlgmr.msra.gmra.mrb[70].mxu0 %vm2026_vm3, %v6304_v23  ;;  %16198 = vmatpush3.msra.mxu1 %v6823_v20  ;;  %v15076_v23 = vld [vmem:[%s19433_s11 + $0x48] sm:$0xff] }
 0xe85   : > { %16193 = vmatpush3.msra.mxu0 %v6822_v11  ;;  %16194 = vmatprep.mubr.msk.f32.mxu0 %vm17477_vm0, %v17478_v1  ;;  %v15075_v11 = vld [vmem:[%s19433_s11 + $0x40] sm:$0xff]  ;;  %v15078_v26 = vld [vmem:[%s19433_s11 + $0x58] sm:$0xff] }
 0xe86   : > { %16199 = vmatprep.mubr.msk.f32.mxu1 %vm17477_vm0, %v17478_v1  ;;  %16202 = vmatprep.subr.mxu0 %v17478_v1  ;;  %v16827_v24 = vpack.c.bf16 %v15076_v23, %v15075_v11  ;;  %v7690_v23 = vld [vmem:[#allocation7 + $0x128] sm:$0xff] }
 0xe87   : > { %16207 = vmatprep.subr.mxu1 %v17478_v1 }
 0xe8a   : > { %v6450_v27 = vpop.f32.mrb[64].mxu0 }
 0xe8b   : > { %v16156_v29 = vpop.f32.mrb[65].mxu0  ;;  %16195 = vmatmul.mubr.msk.f32.vlgmr.msra.gmra.mrb[72].mxu0 %vm2026_vm3, %v6450_v27  ;;  %v15079_v27 = vld [vmem:[%s19433_s11 + $0x60] sm:$0xff] }
 0xe8c   : > { %16203 = vmatpush3.msra.mxu0 %v6824_v22  ;;  %16204 = vmatprep.mubr.msk.f32.mxu0 %vm17477_vm0, %v17478_v1  ;;  %v15080_v29 = vld [vmem:[%s19433_s11 + $0x68] sm:$0xff] }
 0xe8d   : > { %16212 = vmatprep.subr.mxu0 %v17478_v1 }
 0xe8e   : > { %v6523_v31 = vpop.f32.mrb[72].mxu1 }
 0xe8f   : > { %v16161_v32 = vpop.f32.mrb[73].mxu1  ;;  %16200 = vmatmul.mubr.msk.f32.vlgmr.msra.gmra.mrb[80].mxu1 %vm2026_vm3, %v6523_v31  ;;  %v15081_v31 = vld [vmem:[%s19433_s11 + $0x70] sm:$0xff] }
 0xe90   : > { %16208 = vmatpush3.msra.mxu1 %v6825_v30  ;;  %16209 = vmatprep.mubr.msk.f32.mxu1 %vm17477_vm0, %v17478_v1  ;;  %v16833_v30 = vpack.c.bf16 %v15080_v29, %v15079_v27  ;;  %v15082_v32 = vld [vmem:[%s19433_s11 + $0x78] sm:$0xff]  ;;  %v17206_v29 = vld [vmem:[%s17827_s3] sm:$0xff] }
 0xe91   : > { %16217 = vmatprep.subr.mxu1 %v17478_v1 }
 0xe92   : > { %v6669_v33 = vpop.f32.mrb[74].mxu1 }
 0xe93   : > { %v6596_v35 = vpop.f32.mrb[66].mxu0  ;;  %v16171_v36 = vpop.f32.mrb[75].mxu1  ;;  %16210 = vmatmul.mubr.msk.f32.vlgmr.msra.gmra.mrb[82].mxu1 %vm2026_vm3, %v6669_v33 }
 0xe94   : > { %v16166_v28 = vpop.f32.mrb[67].mxu0  ;;  %16205 = vmatmul.mubr.msk.f32.vlgmr.msra.gmra.mrb[74].mxu0 %vm2026_vm3, %v6596_v35  ;;  %16218 = vmatpush3.msra.mxu1 %v6827_v19  ;;  %v16836_v19 = vpack.c.bf16 %v15082_v32, %v15081_v31  ;;  %v7693_v31 = vld [vmem:[#allocation7 + $0x140] sm:$0xff]  ;;  %v7694_v32 = vld [vmem:[#allocation7 + $0x148] sm:$0xff] }
 0xe95   : > { %16213 = vmatpush3.msra.mxu0 %v6826_v34  ;;  %16214 = vmatprep.mubr.msk.f32.mxu0 %vm17477_vm0, %v17478_v1  ;;  %v15073_v28 = vld [vmem:[%s19431_s9 + $0x1] ss:$0 sm:$0xff] }
 0xe96   : > { %16219 = vmatprep.mubr.msk.f32.mxu1 %vm17477_vm0, %v17478_v1  ;;  %16826 = vmatprep.subr.bf16.mxu0 %v17476_v0 }
 0xe97   : > { %16838 = vmatprep.subr.bf16.mxu1 %v17476_v0 }
 0xe9a   : > { %v6815_v37 = vpop.f32.mrb[76].mxu1 }
 0xe9b   : > { %v6742_v25 = vpop.f32.mrb[68].mxu0  ;;  %v16181_v38 = vpop.f32.mrb[77].mxu1  ;;  %16220 = vmatmul.mubr.msk.f32.vlgmr.msra.gmra.mrb[84].mxu1 %vm2026_vm3, %v6815_v37 }
 0xe9c   : > { %v16176_v44 = vpop.f32.mrb[69].mxu0  ;;  %16215 = vmatmul.mubr.msk.f32.vlgmr.msra.gmra.mrb[76].mxu0 %vm2026_vm3, %v6742_v25  ;;  %16249 = vmatprep.mubr.msk.f32.mxu1 %vm17477_vm0, %v17478_v1  ;;  %v15074_v25 = vld [vmem:[%s19501_s20 + $0x1] ss:$0 sm:$0xff] }
 0xe9d   : > { %16238 = vmatprep.mubr.msk.f32.mxu0 %vm17477_vm0, %v17478_v1  ;;  %16828 = vmatpush3.bf16.msra.mxu0 %v16827_v24  ;;  %v7691_v24 = vld [vmem:[#allocation7 + $0x130] sm:$0xff] }
 0xe9e   : > { %16829 = vmatprep.subr.bf16.mxu0 %v17476_v0 }
 0xf56   : > { %v6970_v39 = vpop.f32.mrb[78].mxu1 }
 0xf57   : > { %v6897_v40 = vpop.f32.mrb[70].mxu0  ;;  %v7413_v41 = vsel %vm752_vm1, %v6970_v39, 0.0  ;;  %v16191_v42 = vpop.f32.mrb[79].mxu1  ;;  %v15087_v39 = vld [vmem:[%s19502_s6 + $0x20] sm:$0xff] }
 0xf58   : > { %v7412_v43 = vsel %vm752_vm1, %v6897_v40, 0.0  ;;  %v16186_v45 = vpop.f32.mrb[71].mxu0  ;;  %v15088_v40 = vld [vmem:[%s19502_s6 + $0x28] sm:$0xff]  ;;  %v15089_v42 = vld [vmem:[%s19502_s6 + $0x30] sm:$0xff] }
 0xf59   : > { %v7414_v47 = vadd.f32 %v7413_v41, %v7412_v43  ;;  %v16839_v41 = vpack.c.bf16 %v15088_v40, %v15087_v39  ;;  %v15090_v43 = vld [vmem:[%s19502_s6 + $0x38] sm:$0xff]  ;;  %v15130_v39 = vld [vmem:[%s19427_s5 + $0x80] sm:$0xff]  ;;  %v15132_v40 = vld [vmem:[%s19427_s5 + $0x90] sm:$0xff] }
 0xf5a   : > { %v16842_v45 = vpack.c.bf16 %v15090_v43, %v15089_v42  ;;  %v15134_v42 = vld [vmem:[%s19427_s5 + $0xa0] sm:$0xff]  ;;  %v15133_v43 = vld [vmem:[%s19427_s5 + $0x98] sm:$0xff] }
 0xf5b   : > { %16840 = vmatpush3.bf16.msra.mxu1 %v16839_v41  ;;  %v15131_v41 = vld [vmem:[%s19427_s5 + $0x88] sm:$0xff] }
 0xf5c   : > { %16841 = vmatprep.subr.bf16.mxu1 %v17476_v0 }
 0xf5e   : > { %v7043_v9 = vpop.f32.mrb[72].mxu0 }
 0xf5f   : > { %v7415_v49 = vsel %vm752_vm1, %v7043_v9, 0.0  ;;  %v16196_v51 = vpop.f32.mrb[73].mxu0  ;;  %16843 = vmatpush3.bf16.msra.mxu1 %v16842_v45  ;;  %v15136_v45 = vld [vmem:[%s19427_s5 + $0xb0] sm:$0xff] }
 0xf60   : > { %v7416_v52 = vadd.f32 %v7415_v49, %v7414_v47  ;;  %16844 = vmatprep.subr.bf16.mxu1 %v17476_v0  ;;  %v15084_v47 = vld [vmem:[%s19503_s4 + $0x1] ss:$0 sm:$0xff] }
 0xf62   : > { %v7116_v55 = vpop.f32.mrb[80].mxu1 }
 0xf63   : > { %v7417_v56 = vsel %vm752_vm1, %v7116_v55, 0.0  ;;  %v16201_v58 = vpop.f32.mrb[81].mxu1 }
 0xf64   : > { %v7418_v53 = vadd.f32 %v7417_v56, %v7416_v52 }
 0xf66   : > { %v7262_v46 = vpop.f32.mrb[82].mxu1 }
 0xf67   : > { %v7189_v60 = vpop.f32.mrb[74].mxu0  ;;  %v16211_v61 = vpop.f32.mrb[83].mxu1  ;;  %v7421_v4 = vsel %vm752_vm1, %v7262_v46, 0.0  ;;  %v15092_v46 = vld [vmem:[%s19504_s19 + $0x1] ss:$0 sm:$0xff] }
 0xf68   : > { %v7419_v62 = vsel %vm752_vm1, %v7189_v60, 0.0  ;;  %v16206_v63 = vpop.f32.mrb[75].mxu0 }
 0xf69   : > { %v7420_v3 = vadd.f32 %v7419_v62, %v7418_v53 }
 0xf6b   : > { %v7422_v5 = vadd.f32 %v7421_v4, %v7420_v3 }
 0xf6e   : > { %v7408_v6 = vpop.f32.mrb[84].mxu1 }
 0xf6f   : > { %v7335_v7 = vpop.f32.mrb[76].mxu0  ;;  %v16221_v50 = vpop.f32.mrb[85].mxu1  ;;  %v7425_v13 = vsel %vm752_vm1, %v7408_v6, 0.0 }
 0xf70   : > { %v7423_v8 = vsel %vm752_vm1, %v7335_v7, 0.0  ;;  %v16216_v10 = vpop.f32.mrb[77].mxu0 }
 0xf71   : > { %v7424_v12 = vadd.f32 %v7423_v8, %v7422_v5  ;;  %v7685_v8 = vld [vmem:[#allocation7 + $0x100] sm:$0xff]  ;;  %v7686_v10 = vld [vmem:[#allocation7 + $0x108] sm:$0xff] }
 0xf73   : > { %v7426_v14 = vadd.f32 %v7425_v13, %v7424_v12  ;;  %v7687_v12 = vld [vmem:[#allocation7 + $0x110] sm:$0xff]  ;;  %v16845_v13 = vpack.c.bf16 %v7686_v10, %v7685_v8 }
 0xf75   : > { %v7435_v59 = vadd.f32 %v15070_v57, %v7426_v14  ;;  %v7688_v57 = vld [vmem:[#allocation7 + $0x118] sm:$0xff] }
 0xf76   : > { %v16849_v14 = vpack.c.bf16 %v7688_v57, %v7687_v12 }
 0xf77   : > { %v7436_v15 = vadd.f32 %v7435_v59, %v18253_v48  ;;  %v15077_v48 = vld [vmem:[%s19433_s11 + $0x50] sm:$0xff] }
 0xf78   : > { %v16830_v22 = vpack.c.bf16 %v15078_v26, %v15077_v48  ;;  %v7692_v48 = vld [vmem:[#allocation7 + $0x138] sm:$0xff] }
 0xf79   : > { %v7441_v54 = vsel %vm752_vm1, %v7436_v15, 0.0  ;;  %v16857_v27 = vpack.c.bf16 %v7692_v48, %v7691_v24 }
 0xf7a   : > { %7442 = vadd.xlane.f32.xlu1 %v7441_v54  ;;  %16831 = vmatpush3.bf16.msra.mxu0 %v16830_v22 }
 0xf7b   : > { %16832 = vmatprep.subr.bf16.mxu0 %v17476_v0 }
 0xf7e   : > { %16834 = vmatpush3.bf16.msra.mxu0 %v16833_v30 }
 0xf7f   : > { %16835 = vmatprep.subr.bf16.mxu0 %v17476_v0 }
 0xf82   : > { %16837 = vmatpush3.bf16.msra.mxu0 %v16836_v19  ;;  %v7695_v19 = vld [vmem:[#allocation7 + $0x150] sm:$0xff] }
 0xf83   : > { %16848 = vmatprep.subr.bf16.mxu0 %v17476_v0 }
0x1007   : > { %v7443_v16 = vpop.xlane.xlu1 %7442 }
0x1008   : > { %v7444_v17 = vmul.f32 0.015625, %v7443_v16 }
0x100a   : > { %v7445_v18 = vsub.f32 %v7436_v15, %v7444_v17  ;;  %v15096_v17 = vld [vmem:[%s19505_s30 + $0x1] ss:$0 sm:$0xff] }
0x100c   : > { %v7446_v20 = vmul.f32 %v7445_v18, %v7445_v18 }
0x100e   : > { %v7447_v21 = vsel %vm752_vm1, %v7446_v20, 0.0  ;;  %v15097_v20 = vld [vmem:[%s19506_s23 + $0x1] ss:$0 sm:$0xff] }
0x100f   : > { %7448 = vadd.xlane.f32.xlu0 %v7447_v21  ;;  %v7689_v21 = vld [vmem:[#allocation7 + $0x120] sm:$0xff] }
0x1010   : > { %v16853_v22 = vpack.c.bf16 %v7690_v23, %v7689_v21 }
0x109c   : > { %v7449_v33 = vpop.xlane.xlu0 %7448 }
0x109d   : > { %v7450_v34 = vmul.f32 0.015625, %v7449_v33  ;;  %v7696_v33 = vld [vmem:[#allocation7 + $0x158] sm:$0xff] }
0x109f   : > { %v7451_v35 = vadd.f32 1e-05, %v7450_v34  ;;  %v16861_v34 = vpack.c.bf16 %v7694_v32, %v7693_v31 }
0x10a1   : > { %17116 = vrsqrt.f32 %v7451_v35  ;;  %v16865_v35 = vpack.c.bf16 %v7696_v33, %v7695_v19 }
0x10ab   : > { %v17117_v36 = vpop.eup %17116 }
0x10ac   : > { %v7453_v37 = vmul.f32 %v17117_v36, %v7445_v18  ;;  %v7697_v36 = vld [vmem:[#allocation7 + $0x160] sm:$0xff] }
0x10ae   : > { %v7460_v38 = vmul.f32 %v15073_v28, %v7453_v37  ;;  %v7698_v28 = vld [vmem:[#allocation7 + $0x168] sm:$0xff]  ;;  %v7699_v37 = vld [vmem:[#allocation7 + $0x170] sm:$0xff] }
0x10b0   : > { %v7467_v44 = vadd.f32 %v15074_v25, %v7460_v38  ;;  %v7700_v25 = vld [vmem:[#allocation7 + $0x178] sm:$0xff]  ;;  %v16869_v38 = vpack.c.bf16 %v7698_v28, %v7697_v36 }
0x10b2   : > { %16239 = vmatmul.mubr.msk.f32.vlgmr.msra.gmra.mrb[78].mxu0 %vm752_vm1, %v7467_v44 }
0x10b3   : > { %16263 = vmatprep.mubr.msk.f32.mxu0 %vm17477_vm0, %v17478_v1  ;;  %16851 = vmatpush3.bf16.xpose.msk.msra.mxu0 %vm17863_vm2, %v16849_v14 }
0x10b4   : > { %16856 = vmatprep.subr.bf16.mxu0 %v17476_v0 }
0x1185   : > { %v7554_v9 = vpop.f32.mrb[78].mxu0 }
0x1186   : > { %v7555_v49 = vadd.f32 %v15084_v47, %v7554_v9  ;;  %v16240_v51 = vpop.f32.mrb[79].mxu0  ;;  %v15135_v47 = vld [vmem:[%s19427_s5 + $0xa8] sm:$0xff]  ;;  %v15137_v9 = vld [vmem:[%s19427_s5 + $0xb8] sm:$0xff] }
0x1187   : > { %v15099_v51 = vld [vmem:[#allocation8 + $0x11] ss:$0 sm:$0xff] }
0x1188   : > { %v15086_v52 = vmul.f32 -1.442695, %v7555_v49 }
0x118a   : > { %17118 = vpow2.f32 %v15086_v52 }
0x1194   : > { %v17119_v55 = vpop.eup %17118 }
0x1195   : > { %v7561_v56 = vadd.f32 1.0, %v17119_v55 }
0x1197   : > { %17120 = vrcp.f32 %v7561_v56 }
0x11a1   : > { %v17121_v58 = vpop.eup %17120 }
0x11a2   : > { %v7564_v53 = vmul.f32 %v17121_v58, %v7555_v49  ;;  %v15098_v49 = vld [vmem:[#allocation8 + $0x10] ss:$0 sm:$0xff] }
0x11a4   : > { %16250 = vmatmul.mubr.msk.f32.vlgmr.msra.gmra.mrb[86].mxu1 %vm4072_vm4, %v7564_v53 }
0x11a5   : > { %16256 = vmatprep.mubr.msk.f32.mxu1 %vm17477_vm0, %v17478_v1  ;;  %16847 = vmatpush3.bf16.xpose.msk.msra.mxu1 %vm17863_vm2, %v16845_v13 }
0x11a6   : > { %16852 = vmatprep.subr.bf16.mxu1 %v17476_v0 }
0x1277   : > { %v7647_v60 = vpop.f32.mrb[86].mxu1 }
0x1278   : > { %v7648_v61 = vadd.f32 %v15092_v46, %v7647_v60  ;;  %v16251_v62 = vpop.f32.mrb[87].mxu1  ;;  %v15100_v60 = vld [vmem:[#allocation8 + $0x12] ss:$0 sm:$0xff] }
0x127a   : > { %v7651_v63 = vadd.f32 %v7648_v61, %v7467_v44  ;;  %v16873_v44 = vpack.c.bf16 %v7700_v25, %v7699_v37 }
0x127c   : > { %v7656_v3 = vsel %vm752_vm1, %v7651_v63, 0.0 }
0x127d   : > { %7657 = vadd.xlane.f32.xlu1 %v7656_v3 }
0x130a   : > { %v7658_v4 = vpop.xlane.xlu1 %7657 }
0x130b   : > { %v7659_v5 = vmul.f32 0.015625, %v7658_v4 }
0x130d   : > { %v7660_v6 = vsub.f32 %v7651_v63, %v7659_v5  ;;  %v15101_v5 = vld [vmem:[#allocation8 + $0x13] ss:$0 sm:$0xff] }
0x130f   : > { %v7661_v7 = vmul.f32 %v7660_v6, %v7660_v6 }
0x1311   : > { %v7662_v50 = vsel %vm752_vm1, %v7661_v7, 0.0  ;;  %v15102_v7 = vld [vmem:[#allocation8 + $0x14] ss:$0 sm:$0xff] }
0x1312   : > { %7663 = vadd.xlane.f32.xlu0 %v7662_v50  ;;  %v15103_v50 = vld [vmem:[#allocation8 + $0x15] ss:$0 sm:$0xff] }
0x139f   : > { %v7664_v59 = vpop.xlane.xlu0 %7663 }
0x13a0   : > { %v7665_v15 = vmul.f32 0.015625, %v7664_v59  ;;  %v15104_v59 = vld [vmem:[#allocation8 + $0x16] ss:$0 sm:$0xff] }
0x13a2   : > { %v7666_v54 = vadd.f32 1e-05, %v7665_v15  ;;  %v15105_v15 = vld [vmem:[#allocation8 + $0x17] ss:$0 sm:$0xff] }
0x13a4   : > { %17122 = vrsqrt.f32 %v7666_v54 }
0x13ae   : > { %v17123_v16 = vpop.eup %17122 }
0x13af   : > { %v7668_v18 = vmul.f32 %v17123_v16, %v7660_v6 }
0x13b1   : > { %v7675_v11 = vmul.f32 %v15096_v17, %v7668_v18 }
0x13b3   : > { %v18630_v26 = vadd.f32 %v15097_v20, %v7675_v11 }
0x13b5   : > { %v7683_v30 = vadd.f32 %v17206_v29, %v18630_v26 }
0x13b7   : > { %16257 = vmatmul.mubr.msk.f32.vlgmr.msra.gmra.mrb[88].mxu1 %vm752_vm1, %v7683_v30  ;;  %16264 = vmatmul.mubr.msk.f32.vlgmr.msra.gmra.mrb[80].mxu0 %vm752_vm1, %v7683_v30 }
0x13b8   : > { %16855 = vmatpush3.bf16.xpose.msk.msra.mxu1 %vm17863_vm2, %v16853_v22  ;;  %16859 = vmatpush3.bf16.xpose.msk.msra.mxu0 %vm17863_vm2, %v16857_v27 }
0x13b9   : > { %16270 = vmatprep.mubr.msk.f32.mxu1 %vm17477_vm0, %v17478_v1  ;;  %16277 = vmatprep.mubr.msk.f32.mxu0 %vm17477_vm0, %v17478_v1 }
0x13ba   : > { %16860 = vmatprep.subr.bf16.mxu1 %v17476_v0  ;;  %16864 = vmatprep.subr.bf16.mxu0 %v17476_v0 }
0x13bf   : > { %16271 = vmatmul.mubr.msk.f32.vlgmr.msra.gmra.mrb[90].mxu1 %vm752_vm1, %v7683_v30  ;;  %16278 = vmatmul.mubr.msk.f32.vlgmr.msra.gmra.mrb[82].mxu0 %vm752_vm1, %v7683_v30 }
0x13c0   : > { %16863 = vmatpush3.bf16.xpose.msk.msra.mxu1 %vm17863_vm2, %v16861_v34  ;;  %16867 = vmatpush3.bf16.xpose.msk.msra.mxu0 %vm17863_vm2, %v16865_v35 }
0x13c1   : > { %16284 = vmatprep.mubr.msk.f32.mxu1 %vm17477_vm0, %v17478_v1  ;;  %16291 = vmatprep.mubr.msk.f32.mxu0 %vm17477_vm0, %v17478_v1 }
0x13c2   : > { %16868 = vmatprep.subr.bf16.mxu1 %v17476_v0  ;;  %16872 = vmatprep.subr.bf16.mxu0 %v17476_v0 }
0x13c7   : > { %16285 = vmatmul.mubr.msk.f32.vlgmr.msra.gmra.mrb[92].mxu1 %vm752_vm1, %v7683_v30  ;;  %16292 = vmatmul.mubr.msk.f32.vlgmr.msra.gmra.mrb[84].mxu0 %vm752_vm1, %v7683_v30 }
0x13c8   : > { %16871 = vmatpush3.bf16.xpose.msk.msra.mxu1 %vm17863_vm2, %v16869_v38  ;;  %16875 = vmatpush3.bf16.xpose.msk.msra.mxu0 %vm17863_vm2, %v16873_v44 }
0x13c9   : > { %16298 = vmatprep.mubr.msk.f32.mxu1 %vm17477_vm0, %v17478_v1  ;;  %16305 = vmatprep.mubr.msk.f32.mxu0 %vm17477_vm0, %v17478_v1 }
0x13ca   : > { %16308 = vmatprep.subr.mxu1 %v17478_v1  ;;  %16318 = vmatprep.subr.mxu0 %v17478_v1 }
0x13cf   : > { %16299 = vmatmul.mubr.msk.f32.vlgmr.msra.gmra.mrb[94].mxu1 %vm752_vm1, %v7683_v30  ;;  %16306 = vmatmul.mubr.msk.f32.vlgmr.msra.gmra.mrb[86].mxu0 %vm752_vm1, %v7683_v30 }
0x13d0   : > { %16309 = vmatpush3.xpose.msk.msra.mxu1 %vm752_vm1, %v15130_v39  ;;  %16319 = vmatpush3.xpose.msk.msra.mxu0 %vm752_vm1, %v15132_v40 }
0x13d1   : > { %16310 = vmatprep.mubr.msk.f32.mxu1 %vm17477_vm0, %v17478_v1  ;;  %16320 = vmatprep.mubr.msk.f32.mxu0 %vm17477_vm0, %v17478_v1 }
0x13d2   : > { %16313 = vmatprep.subr.mxu1 %v17478_v1  ;;  %16328 = vmatprep.subr.mxu0 %v17478_v1 }
0x13d3   : > { %16311 = vmatmul.mubr.msk.f32.vlgmr.msra.gmra.mrb[96].mxu1 %vm752_vm1, %v18630_v26  ;;  %16321 = vmatmul.mubr.msk.f32.vlgmr.msra.gmra.mrb[88].mxu0 %vm752_vm1, %v18630_v26 }
0x13d4   : > { %16314 = vmatpush3.xpose.msk.msra.mxu1 %vm752_vm1, %v15131_v41  ;;  %16329 = vmatpush3.xpose.msk.msra.mxu0 %vm752_vm1, %v15134_v42 }
0x13d5   : > { %16315 = vmatprep.mubr.msk.f32.mxu1 %vm17477_vm0, %v17478_v1  ;;  %16330 = vmatprep.mubr.msk.f32.mxu0 %vm17477_vm0, %v17478_v1 }
0x13d6   : > { %16323 = vmatprep.subr.mxu1 %v17478_v1  ;;  %16338 = vmatprep.subr.mxu0 %v17478_v1 }
0x13d7   : > { %16316 = vmatmul.mubr.msk.f32.vlgmr.msra.gmra.mrb[98].mxu1 %vm752_vm1, %v18630_v26  ;;  %16331 = vmatmul.mubr.msk.f32.vlgmr.msra.gmra.mrb[90].mxu0 %vm752_vm1, %v18630_v26 }
0x13d8   : > { %16324 = vmatpush3.xpose.msk.msra.mxu1 %vm752_vm1, %v15133_v43  ;;  %16339 = vmatpush3.xpose.msk.msra.mxu0 %vm752_vm1, %v15136_v45 }
0x13d9   : > { %16325 = vmatprep.mubr.msk.f32.mxu1 %vm17477_vm0, %v17478_v1  ;;  %16340 = vmatprep.mubr.msk.f32.mxu0 %vm17477_vm0, %v17478_v1 }
0x13da   : > { %16333 = vmatprep.subr.mxu1 %v17478_v1  ;;  %16348 = vmatprep.subr.mxu0 %v17478_v1 }
0x13db   : > { %16326 = vmatmul.mubr.msk.f32.vlgmr.msra.gmra.mrb[100].mxu1 %vm752_vm1, %v18630_v26  ;;  %16341 = vmatmul.mubr.msk.f32.vlgmr.msra.gmra.mrb[92].mxu0 %vm752_vm1, %v18630_v26 }
0x13dc   : > { %16334 = vmatpush3.xpose.msk.msra.mxu1 %vm752_vm1, %v15135_v47  ;;  %16335 = vmatprep.mubr.msk.f32.mxu1 %vm17477_vm0, %v17478_v1 }
0x13dd   : > { %16343 = vmatprep.subr.mxu1 %v17478_v1  ;;  %16350 = vmatprep.mubr.msk.f32.mxu0 %vm17477_vm0, %v17478_v1 }
0x13df   : > { %16336 = vmatmul.mubr.msk.f32.vlgmr.msra.gmra.mrb[102].mxu1 %vm752_vm1, %v18630_v26 }
0x13e0   : > { %16344 = vmatpush3.xpose.msk.msra.mxu1 %vm752_vm1, %v15137_v9  ;;  %16345 = vmatprep.mubr.msk.f32.mxu1 %vm17477_vm0, %v17478_v1 }
0x13e1   : > { %16353 = vmatprep.subr.mxu1 %v17478_v1 }
0x13e3   : > { %16346 = vmatmul.mubr.msk.f32.vlgmr.msra.gmra.mrb[104].mxu1 %vm752_vm1, %v18630_v26 }
0x13e4   : > { %16355 = vmatprep.mubr.msk.f32.mxu1 %vm17477_vm0, %v17478_v1 }
0x148a   : > { %v7833_v52 = vpop.f32.mrb[88].mxu1  ;;  %v7909_v55 = vpop.f32.mrb[80].mxu0 }
0x148b   : > { %v7834_v56 = vadd.f32 %v15098_v49, %v7833_v52  ;;  %v7910_v58 = vadd.f32 %v15099_v51, %v7909_v55  ;;  %v16258_v53 = vpop.f32.mrb[89].mxu1  ;;  %v16265_v46 = vpop.f32.mrb[81].mxu0  ;;  %v15138_v49 = vld [vmem:[#allocation10 + $0x10] ss:$0 sm:$0xff]  ;;  %v15139_v51 = vld [vmem:[#allocation10 + $0x11] ss:$0 sm:$0xff] }
0x148d   : > { %9031 = vrot.lane.b32.xlu1 %v7834_v56, %s19507_s21  ;;  %9109 = vrot.lane.b32.xlu0 %v7910_v58, %s19507_s21  ;;  %v8369_v38 = vmul.f32 0.35355338, %v7834_v56  ;;  %v8370_v44 = vmul.f32 0.35355338, %v7910_v58 }
0x1492   : > { %v7985_v61 = vpop.f32.mrb[90].mxu1  ;;  %v8061_v62 = vpop.f32.mrb[82].mxu0 }
0x1493   : > { %v7986_v63 = vadd.f32 %v15100_v60, %v7985_v61  ;;  %v16272_v3 = vpop.f32.mrb[91].mxu1  ;;  %v16279_v4 = vpop.f32.mrb[83].mxu0  ;;  %v8062_v6 = vadd.f32 %v15101_v5, %v8061_v62  ;;  %v17207_v62 = vld [vmem:[%s17835_s12] sm:$0xff] }
0x1495   : > { %9187 = vrot.lane.b32.xlu1 %v7986_v63, %s19507_s21  ;;  %v8371_v40 = vmul.f32 0.35355338, %v7986_v63  ;;  %v8372_v42 = vmul.f32 0.35355338, %v8062_v6 }
0x1499   : > { %9265 = vrot.lane.b32.xlu1 %v8062_v6, %s19507_s21 }
0x149a   : > { %v8137_v8 = vpop.f32.mrb[92].mxu1  ;;  %v8213_v10 = vpop.f32.mrb[84].mxu0 }
0x149b   : > { %v8138_v12 = vadd.f32 %v15102_v7, %v8137_v8  ;;  %v8214_v13 = vadd.f32 %v15103_v50, %v8213_v10  ;;  %v16286_v57 = vpop.f32.mrb[93].mxu1  ;;  %v16293_v14 = vpop.f32.mrb[85].mxu0 }
0x149d   : > { %9343 = vrot.lane.b32.xlu0 %v8138_v12, %s19507_s21  ;;  %9421 = vrot.lane.b32.xlu1 %v8214_v13, %s19507_s21  ;;  %v8373_v47 = vmul.f32 0.35355338, %v8138_v12  ;;  %v8374_v9 = vmul.f32 0.35355338, %v8214_v13 }
0x14a2   : > { %v8289_v54 = vpop.f32.mrb[94].mxu1  ;;  %v8365_v16 = vpop.f32.mrb[86].mxu0 }
0x14a3   : > { %v18754_v17 = vadd.f32 %v15104_v59, %v8289_v54  ;;  %v18756_v18 = vadd.f32 %v15105_v15, %v8365_v16  ;;  %v16300_v20 = vpop.f32.mrb[95].mxu1  ;;  %v16307_v21 = vpop.f32.mrb[87].mxu0 }
0x14a5   : > { %9499 = vrot.lane.b32.xlu0 %v18754_v17, %s19507_s21  ;;  %9577 = vrot.lane.b32.xlu1 %v18756_v18, %s19507_s21  ;;  %v8375_v56 = vmul.f32 0.35355338, %v18754_v17  ;;  %v8376_v58 = vmul.f32 0.35355338, %v18756_v18 }
0x14a6   : > { %v8515_v11 = vpop.f32.mrb[96].mxu1  ;;  %v18762_v23 = vpop.f32.mrb[88].mxu0 }
0x14a7   : > { %v16312_v24 = vpop.f32.mrb[97].mxu1  ;;  %v16322_v48 = vpop.f32.mrb[89].mxu0  ;;  %v8516_v53 = vadd.f32 %v15138_v49, %v8515_v11 }
0x14aa   : > { %v8588_v22 = vpop.f32.mrb[98].mxu1  ;;  %v18764_v27 = vpop.f32.mrb[90].mxu0 }
0x14ab   : > { %v16317_v29 = vpop.f32.mrb[99].mxu1  ;;  %v16332_v30 = vpop.f32.mrb[91].mxu0  ;;  %v8589_v46 = vadd.f32 %v15139_v51, %v8588_v22 }
0x14ae   : > { %v18766_v31 = vpop.f32.mrb[100].mxu1  ;;  %v18768_v32 = vpop.f32.mrb[92].mxu0 }
0x14af   : > { %v16327_v19 = vpop.f32.mrb[101].mxu1  ;;  %v16342_v33 = vpop.f32.mrb[93].mxu0 }
0x14b2   : > { %v18770_v34 = vpop.f32.mrb[102].mxu1 }
0x14b3   : > { %v16337_v35 = vpop.f32.mrb[103].mxu1 }
0x14b6   : > { %v18772_v36 = vpop.f32.mrb[104].mxu1 }
0x14b7   : > { %v16347_v28 = vpop.f32.mrb[105].mxu1 }
0x14ff   : > { %v9032_v37 = vpop.permute.xlu1 %9031  ;;  %v9110_v25 = vpop.permute.xlu0 %9109 }
0x1500   : > { %16349 = vmatpush3.xpose.msk.msra.mxu0 %vm2026_vm3, %v9032_v37  ;;  %16354 = vmatpush3.xpose.msk.msra.mxu1 %vm2026_vm3, %v9110_v25 }
0x1501   : > { %16358 = vmatprep.subr.mxu0 %v17478_v1  ;;  %16363 = vmatprep.subr.mxu1 %v17478_v1 }
0x1503   : > { %16351 = vmatmul.mubr.msk.f32.vlgmr.msra.gmra.mrb[94].mxu0 %vm2026_vm3, %v8369_v38  ;;  %16356 = vmatmul.mubr.msk.f32.vlgmr.msra.gmra.mrb[106].mxu1 %vm2026_vm3, %v8370_v44 }
0x1504   : > { %16360 = vmatprep.mubr.msk.f32.mxu0 %vm17477_vm0, %v17478_v1  ;;  %16365 = vmatprep.mubr.msk.f32.mxu1 %vm17477_vm0, %v17478_v1 }
0x1507   : > { %v9188_v39 = vpop.permute.xlu1 %9187 }
0x1508   : > { %16359 = vmatpush3.xpose.msk.msra.mxu0 %vm2026_vm3, %v9188_v39 }
0x1509   : > { %16368 = vmatprep.subr.mxu0 %v17478_v1 }
0x150b   : > { %16361 = vmatmul.mubr.msk.f32.vlgmr.msra.gmra.mrb[96].mxu0 %vm2026_vm3, %v8371_v40  ;;  %v9266_v41 = vpop.permute.xlu1 %9265 }
0x150c   : > { %16364 = vmatpush3.xpose.msk.msra.mxu1 %vm2026_vm3, %v9266_v41  ;;  %16370 = vmatprep.mubr.msk.f32.mxu0 %vm17477_vm0, %v17478_v1 }
0x150d   : > { %16373 = vmatprep.subr.mxu1 %v17478_v1 }
0x150f   : > { %v9344_v43 = vpop.permute.xlu0 %9343  ;;  %16366 = vmatmul.mubr.msk.f32.vlgmr.msra.gmra.mrb[108].mxu1 %vm2026_vm3, %v8372_v42  ;;  %v9422_v45 = vpop.permute.xlu1 %9421 }
0x1510   : > { %16369 = vmatpush3.xpose.msk.msra.mxu0 %vm2026_vm3, %v9344_v43  ;;  %16374 = vmatpush3.xpose.msk.msra.mxu1 %vm2026_vm3, %v9422_v45 }
0x1511   : > { %16375 = vmatprep.mubr.msk.f32.mxu1 %vm17477_vm0, %v17478_v1  ;;  %16378 = vmatprep.subr.mxu0 %v17478_v1 }
0x1512   : > { %16383 = vmatprep.subr.mxu1 %v17478_v1 }
0x1513   : > { %16371 = vmatmul.mubr.msk.f32.vlgmr.msra.gmra.mrb[98].mxu0 %vm2026_vm3, %v8373_v47  ;;  %16376 = vmatmul.mubr.msk.f32.vlgmr.msra.gmra.mrb[110].mxu1 %vm2026_vm3, %v8374_v9 }
0x1514   : > { %16380 = vmatprep.mubr.msk.f32.mxu0 %vm17477_vm0, %v17478_v1  ;;  %16385 = vmatprep.mubr.msk.f32.mxu1 %vm17477_vm0, %v17478_v1 }
0x1517   : > { %v9500_v52 = vpop.permute.xlu0 %9499  ;;  %v9578_v55 = vpop.permute.xlu1 %9577 }
0x1518   : > { %16379 = vmatpush3.xpose.msk.msra.mxu0 %vm2026_vm3, %v9500_v52  ;;  %16384 = vmatpush3.xpose.msk.msra.mxu1 %vm2026_vm3, %v9578_v55 }
0x1519   : > { %16388 = vmatprep.subr.mxu0 %v17478_v1  ;;  %16393 = vmatprep.subr.mxu1 %v17478_v1 }
0x151b   : > { %16381 = vmatmul.mubr.msk.f32.vlgmr.msra.gmra.mrb[100].mxu0 %vm2026_vm3, %v8375_v56  ;;  %16386 = vmatmul.mubr.msk.f32.vlgmr.msra.gmra.mrb[112].mxu1 %vm2026_vm3, %v8376_v58 }
0x151c   : > { %16389 = vmatpush3.msra.mxu0 %v8516_v53  ;;  %16394 = vmatpush3.msra.mxu1 %v8589_v46 }
0x151d   : > { %16390 = vmatprep.mubr.msk.f32.mxu0 %vm17477_vm0, %v17478_v1  ;;  %16395 = vmatprep.mubr.msk.f32.mxu1 %vm17477_vm0, %v17478_v1 }
0x151e   : > { %16398 = vmatprep.subr.mxu0 %v17478_v1  ;;  %16403 = vmatprep.subr.mxu1 %v17478_v1 }
0x15d6   : > { %v9104_v60 = vpop.f32.mrb[94].mxu0  ;;  %v9182_v61 = vpop.f32.mrb[106].mxu1 }
0x15d7   : > { %v9105_v63 = vadd.f32 %v17207_v62, %v9104_v60  ;;  %v9183_v3 = vadd.f32 %v17207_v62, %v9182_v61  ;;  %v16352_v4 = vpop.f32.mrb[95].mxu0  ;;  %v16357_v5 = vpop.f32.mrb[107].mxu1 }
0x15d9   : > { %v9657_v6 = vsel %vm2026_vm3, %v9183_v3, -inf  ;;  %v9654_v7 = vsel %vm2026_vm3, %v9105_v63, -inf }
0x15da   : > { %9658 = vmax.xlane.f32.xlu1 %v9657_v6  ;;  %9655 = vmax.xlane.f32.xlu0 %v9654_v7 }
0x15de   : > { %v9260_v50 = vpop.f32.mrb[96].mxu0 }
0x15df   : > { %v9261_v8 = vadd.f32 %v17207_v62, %v9260_v50  ;;  %v16362_v10 = vpop.f32.mrb[97].mxu0 }
0x15e1   : > { %v9660_v12 = vsel %vm2026_vm3, %v9261_v8, -inf }
0x15e2   : > { %v9338_v13 = vpop.f32.mrb[108].mxu1  ;;  %9661 = vmax.xlane.f32.xlu0 %v9660_v12 }
0x15e3   : > { %v9339_v57 = vadd.f32 %v17207_v62, %v9338_v13  ;;  %v16367_v14 = vpop.f32.mrb[109].mxu1 }
0x15e5   : > { %v9663_v59 = vsel %vm2026_vm3, %v9339_v57, -inf }
0x15e6   : > { %v9494_v15 = vpop.f32.mrb[110].mxu1  ;;  %9664 = vmax.xlane.f32.xlu0 %v9663_v59  ;;  %v9416_v54 = vpop.f32.mrb[98].mxu0 }
0x15e7   : > { %v9495_v16 = vadd.f32 %v17207_v62, %v9494_v15  ;;  %v9417_v17 = vadd.f32 %v17207_v62, %v9416_v54  ;;  %v16372_v18 = vpop.f32.mrb[99].mxu0  ;;  %v16377_v20 = vpop.f32.mrb[111].mxu1 }
0x15e8   : > { %v15141_v20 = vld [vmem:[#allocation10 + $0x13] ss:$0 sm:$0xff] }
0x15e9   : > { %v9669_v21 = vsel %vm2026_vm3, %v9495_v16, -inf  ;;  %v9666_v11 = vsel %vm2026_vm3, %v9417_v17, -inf }
0x15ea   : > { %9670 = vmax.xlane.f32.xlu0 %v9669_v21  ;;  %9667 = vmax.xlane.f32.xlu1 %v9666_v11  ;;  %v15140_v11 = vld [vmem:[#allocation10 + $0x12] ss:$0 sm:$0xff] }
0x15ee   : > { %v9572_v24 = vpop.f32.mrb[100].mxu0  ;;  %v9650_v48 = vpop.f32.mrb[112].mxu1 }
0x15ef   : > { %v9573_v22 = vadd.f32 %v17207_v62, %v9572_v24  ;;  %v9651_v29 = vadd.f32 %v17207_v62, %v9650_v48  ;;  %v16382_v30 = vpop.f32.mrb[101].mxu0  ;;  %v16387_v19 = vpop.f32.mrb[113].mxu1 }
0x15f0   : > { %v8662_v19 = vadd.f32 %v15140_v11, %v18762_v23 }
0x15f1   : > { %v9675_v33 = vsel %vm2026_vm3, %v9651_v29, -inf  ;;  %v9672_v35 = vsel %vm2026_vm3, %v9573_v22, -inf }
0x15f2   : > { %9676 = vmax.xlane.f32.xlu0 %v9675_v33  ;;  %9673 = vmax.xlane.f32.xlu1 %v9672_v35 }
0x1667   : > { %v9659_v28 = vpop.xlane.xlu1 %9658  ;;  %v9656_v37 = vpop.xlane.xlu0 %9655 }
0x1668   : > { %v9679_v25 = vsub.f32 %v9183_v3, %v9659_v28  ;;  %v9678_v38 = vsub.f32 %v9105_v63, %v9656_v37 }
0x166a   : > { %v9688_v44 = vmul.f32 1.442695, %v9679_v25  ;;  %v9686_v39 = vmul.f32 1.442695, %v9678_v38  ;;  %v15143_v25 = vld [vmem:[#allocation10 + $0x15] ss:$0 sm:$0xff] }
0x166c   : > { %17124 = vpow2.f32 %v9688_v44 }
0x166d   : > { %17126 = vpow2.f32 %v9686_v39 }
0x166f   : > { %v9662_v40 = vpop.xlane.xlu0 %9661 }
0x1670   : > { %v9680_v41 = vsub.f32 %v9261_v8, %v9662_v40  ;;  %v8881_v40 = vadd.f32 %v15143_v25, %v18770_v34 }
0x1672   : > { %v9690_v42 = vmul.f32 1.442695, %v9680_v41 }
0x1673   : > { %v9665_v43 = vpop.xlane.xlu0 %9664 }
0x1674   : > { %17128 = vpow2.f32 %v9690_v42  ;;  %v9681_v45 = vsub.f32 %v9339_v57, %v9665_v43  ;;  %v15145_v42 = vld [vmem:[#allocation10 + $0x17] ss:$0 sm:$0xff]  ;;  %v15144_v43 = vld [vmem:[#allocation10 + $0x16] ss:$0 sm:$0xff] }
0x1676   : > { %v17125_v47 = vpop.eup %17124  ;;  %v9692_v9 = vmul.f32 1.442695, %v9681_v45 }
0x1677   : > { %v17127_v49 = vpop.eup %17126  ;;  %v9671_v51 = vpop.xlane.xlu0 %9670  ;;  %v9705_v55 = vsel %vm2026_vm3, %v17125_v47, 0.0 }
0x1678   : > { %v9668_v52 = vpop.xlane.xlu1 %9667  ;;  %17130 = vpow2.f32 %v9692_v9  ;;  %v9683_v56 = vsub.f32 %v9495_v16, %v9671_v51  ;;  %9706 = vadd.xlane.f32.xlu0 %v9705_v55  ;;  %v9702_v53 = vsel %vm2026_vm3, %v17127_v49, 0.0  ;;  %v9027_v9 = vadd.f32 %v15145_v42, %v18772_v36  ;;  %v10327_v55 = vld [vmem:[#allocation11 + $0x80] sm:$0xff] }
0x1679   : > { %v9682_v58 = vsub.f32 %v9417_v17, %v9668_v52  ;;  %9703 = vadd.xlane.f32.xlu1 %v9702_v53 }
0x167a   : > { %v9696_v46 = vmul.f32 1.442695, %v9683_v56  ;;  %v10328_v56 = vld [vmem:[#allocation11 + $0x88] sm:$0xff] }
0x167b   : > { %v9694_v60 = vmul.f32 1.442695, %v9682_v58  ;;  %v10330_v58 = vld [vmem:[#allocation11 + $0x98] sm:$0xff] }
0x167c   : > { %17132 = vpow2.f32 %v9696_v46  ;;  %v10329_v46 = vld [vmem:[#allocation11 + $0x90] sm:$0xff] }
0x167d   : > { %17134 = vpow2.f32 %v9694_v60 }
0x167e   : > { %v17129_v61 = vpop.eup %17128 }
0x167f   : > { %v9677_v62 = vpop.xlane.xlu0 %9676  ;;  %v9674_v63 = vpop.xlane.xlu1 %9673  ;;  %v9708_v3 = vsel %vm2026_vm3, %v17129_v61, 0.0 }
0x1680   : > { %v9685_v4 = vsub.f32 %v9651_v29, %v9677_v62  ;;  %v9684_v5 = vsub.f32 %v9573_v22, %v9674_v63  ;;  %9709 = vadd.xlane.f32.xlu1 %v9708_v3  ;;  %v8735_v29 = vadd.f32 %v15141_v20, %v18766_v31  ;;  %v15142_v31 = vld [vmem:[#allocation10 + $0x14] ss:$0 sm:$0xff]  ;;  %v10331_v63 = vld [vmem:[#allocation11 + $0xa0] sm:$0xff] }
0x1681   : > { %v8808_v37 = vadd.f32 %v15142_v31, %v18764_v27 }
0x1682   : > { %v17131_v6 = vpop.eup %17130  ;;  %v9700_v7 = vmul.f32 1.442695, %v9685_v4  ;;  %v9698_v50 = vmul.f32 1.442695, %v9684_v5  ;;  %v10332_v5 = vld [vmem:[#allocation11 + $0xa8] sm:$0xff] }
0x1683   : > { %v9711_v8 = vsel %vm2026_vm3, %v17131_v6, 0.0 }
0x1684   : > { %17136 = vpow2.f32 %v9700_v7  ;;  %9712 = vadd.xlane.f32.xlu0 %v9711_v8 }
0x1685   : > { %17138 = vpow2.f32 %v9698_v50  ;;  %v10334_v50 = vld [vmem:[#allocation11 + $0xb8] sm:$0xff] }
0x1686   : > { %v18831_v10 = vpop.eup %17132 }
0x1687   : > { %v18833_v12 = vpop.eup %17134  ;;  %v9717_v13 = vsel %vm2026_vm3, %v18831_v10, 0.0 }
0x1688   : > { %9718 = vadd.xlane.f32.xlu0 %v9717_v13  ;;  %v9714_v57 = vsel %vm2026_vm3, %v18833_v12, 0.0 }
0x1689   : > { %9715 = vadd.xlane.f32.xlu1 %v9714_v57 }
0x168e   : > { %v18839_v14 = vpop.eup %17136 }
0x168f   : > { %v18841_v59 = vpop.eup %17138  ;;  %v9723_v15 = vsel %vm2026_vm3, %v18839_v14, 0.0 }
0x1690   : > { %9724 = vadd.xlane.f32.xlu0 %v9723_v15  ;;  %v9720_v54 = vsel %vm2026_vm3, %v18841_v59, 0.0 }
0x1691   : > { %9721 = vadd.xlane.f32.xlu1 %v9720_v54 }
0x1705   : > { %v9707_v16 = vpop.xlane.xlu0 %9706 }
0x1706   : > { %17140 = vrcp.f32 %v9707_v16  ;;  %v9704_v17 = vpop.xlane.xlu1 %9703 }
0x1707   : > { %17142 = vrcp.f32 %v9704_v17 }
0x170d   : > { %v9710_v18 = vpop.xlane.xlu1 %9709 }
0x170e   : > { %17144 = vrcp.f32 %v9710_v18 }
0x1710   : > { %v17141_v21 = vpop.eup %17140 }
0x1711   : > { %v17143_v24 = vpop.eup %17142  ;;  %v9735_v48 = vmul.f32 %v17141_v21, %v17125_v47  ;;  %v9713_v22 = vpop.xlane.xlu0 %9712 }
0x1712   : > { %v9734_v30 = vmul.f32 %v17143_v24, %v17127_v49  ;;  %17146 = vrcp.f32 %v9713_v22  ;;  %v8954_v49 = vadd.f32 %v15144_v43, %v18768_v32 }
0x1713   : > { %16396 = vmatmul.mubr.msk.f32.vlgmr.msra.gmra.mrb[114].mxu1 %vm2026_vm3, %v9735_v48 }
0x1714   : > { %16391 = vmatmul.mubr.msk.f32.vlgmr.msra.gmra.mrb[102].mxu0 %vm2026_vm3, %v9734_v30  ;;  %16404 = vmatpush3.msra.mxu1 %v8735_v29 }
0x1715   : > { %16399 = vmatpush3.msra.mxu0 %v8662_v19  ;;  %v9719_v33 = vpop.xlane.xlu0 %9718  ;;  %16400 = vmatprep.mubr.msk.f32.mxu0 %vm17477_vm0, %v17478_v1 }
0x1716   : > { %17148 = vrcp.f32 %v9719_v33  ;;  %v9716_v35 = vpop.xlane.xlu1 %9715  ;;  %16408 = vmatprep.subr.mxu0 %v17478_v1  ;;  %16405 = vmatprep.mubr.msk.f32.mxu1 %vm17477_vm0, %v17478_v1 }
0x1717   : > { %17150 = vrcp.f32 %v9716_v35  ;;  %16413 = vmatprep.subr.mxu1 %v17478_v1 }
0x1718   : > { %v17145_v23 = vpop.eup %17144 }
0x1719   : > { %v9736_v28 = vmul.f32 %v17145_v23, %v17129_v61 }
0x171b   : > { %16401 = vmatmul.mubr.msk.f32.vlgmr.msra.gmra.mrb[104].mxu0 %vm2026_vm3, %v9736_v28 }
0x171c   : > { %v17147_v38 = vpop.eup %17146  ;;  %16409 = vmatpush3.msra.mxu0 %v8808_v37  ;;  %16410 = vmatprep.mubr.msk.f32.mxu0 %vm17477_vm0, %v17478_v1 }
0x171d   : > { %v9737_v44 = vmul.f32 %v17147_v38, %v17131_v6  ;;  %v9725_v39 = vpop.xlane.xlu0 %9724  ;;  %16418 = vmatprep.subr.mxu0 %v17478_v1 }
0x171e   : > { %17152 = vrcp.f32 %v9725_v39  ;;  %v9722_v41 = vpop.xlane.xlu1 %9721 }
0x171f   : > { %17154 = vrcp.f32 %v9722_v41  ;;  %16406 = vmatmul.mubr.msk.f32.vlgmr.msra.gmra.mrb[116].mxu1 %vm2026_vm3, %v9737_v44 }
0x1720   : > { %v17149_v27 = vpop.eup %17148  ;;  %16414 = vmatpush3.msra.mxu1 %v8881_v40  ;;  %16415 = vmatprep.mubr.msk.f32.mxu1 %vm17477_vm0, %v17478_v1 }
0x1721   : > { %v17151_v45 = vpop.eup %17150  ;;  %v9739_v47 = vmul.f32 %v17149_v27, %v18831_v10  ;;  %16423 = vmatprep.subr.mxu1 %v17478_v1  ;;  %v10333_v10 = vld [vmem:[#allocation11 + $0xb0] sm:$0xff] }
0x1722   : > { %v9738_v34 = vmul.f32 %v17151_v45, %v18833_v12 }
0x1723   : > { %16416 = vmatmul.mubr.msk.f32.vlgmr.msra.gmra.mrb[118].mxu1 %vm2026_vm3, %v9739_v47 }
0x1724   : > { %16411 = vmatmul.mubr.msk.f32.vlgmr.msra.gmra.mrb[106].mxu0 %vm2026_vm3, %v9738_v34  ;;  %16424 = vmatpush3.msra.mxu1 %v9027_v9  ;;  %v15195_v34 = vld [vmem:[%s19430_s8 + $0x2] ss:$0 sm:$0xff] }
0x1725   : > { %16419 = vmatpush3.msra.mxu0 %v8954_v49  ;;  %16420 = vmatprep.mubr.msk.f32.mxu0 %vm17477_vm0, %v17478_v1 }
0x1726   : > { %16425 = vmatprep.mubr.msk.f32.mxu1 %vm17477_vm0, %v17478_v1  ;;  %16428 = vmatprep.subr.mxu0 %v17478_v1 }
0x1727   : > { %16433 = vmatprep.subr.mxu1 %v17478_v1 }
0x1728   : > { %v17153_v36 = vpop.eup %17152 }
0x1729   : > { %v17155_v51 = vpop.eup %17154  ;;  %v9741_v32 = vmul.f32 %v17153_v36, %v18839_v14 }
0x172a   : > { %v9740_v52 = vmul.f32 %v17155_v51, %v18841_v59 }
0x172b   : > { %16426 = vmatmul.mubr.msk.f32.vlgmr.msra.gmra.mrb[120].mxu1 %vm2026_vm3, %v9741_v32 }
0x172c   : > { %16421 = vmatmul.mubr.msk.f32.vlgmr.msra.gmra.mrb[108].mxu0 %vm2026_vm3, %v9740_v52  ;;  %16435 = vmatprep.mubr.msk.f32.mxu1 %vm17477_vm0, %v17478_v1 }
0x172d   : > { %16430 = vmatprep.mubr.msk.f32.mxu0 %vm17477_vm0, %v17478_v1  ;;  %16429 = vmatpush3.msra.mxu0 %v10327_v55 }
0x172e   : > { %16434 = vmatpush3.msra.mxu1 %v10328_v56  ;;  %16438 = vmatprep.subr.mxu0 %v17478_v1 }
0x172f   : > { %16443 = vmatprep.subr.mxu1 %v17478_v1 }
0x17e6   : > { %v9884_v53 = vpop.f32.mrb[114].mxu1 }
0x17e7   : > { %v9811_v60 = vpop.f32.mrb[102].mxu0  ;;  %v16397_v61 = vpop.f32.mrb[115].mxu1  ;;  %16436 = vmatmul.mubr.msk.f32.vlgmr.msra.gmra.mrb[122].mxu1 %vm2026_vm3, %v9884_v53 }
0x17e8   : > { %v16392_v62 = vpop.f32.mrb[103].mxu0  ;;  %16431 = vmatmul.mubr.msk.f32.vlgmr.msra.gmra.mrb[110].mxu0 %vm2026_vm3, %v9811_v60  ;;  %16444 = vmatpush3.msra.mxu1 %v10330_v58  ;;  %v15201_v60 = vld [vmem:[%s19433_s11 + $0x88] sm:$0xff] }
0x17e9   : > { %16439 = vmatpush3.msra.mxu0 %v10329_v46  ;;  %16440 = vmatprep.mubr.msk.f32.mxu0 %vm17477_vm0, %v17478_v1  ;;  %v15200_v46 = vld [vmem:[%s19433_s11 + $0x80] sm:$0xff]  ;;  %v15203_v62 = vld [vmem:[%s19433_s11 + $0x98] sm:$0xff] }
0x17ea   : > { %16445 = vmatprep.mubr.msk.f32.mxu1 %vm17477_vm0, %v17478_v1  ;;  %16448 = vmatprep.subr.mxu0 %v17478_v1  ;;  %v16877_v61 = vpack.c.bf16 %v15201_v60, %v15200_v46  ;;  %v11197_v60 = vld [vmem:[#allocation7 + $0x1a8] sm:$0xff] }
0x17eb   : > { %16453 = vmatprep.subr.mxu1 %v17478_v1 }
0x17ee   : > { %v9957_v3 = vpop.f32.mrb[104].mxu0 }
0x17ef   : > { %v16402_v4 = vpop.f32.mrb[105].mxu0  ;;  %16441 = vmatmul.mubr.msk.f32.vlgmr.msra.gmra.mrb[112].mxu0 %vm2026_vm3, %v9957_v3  ;;  %v15204_v3 = vld [vmem:[%s19433_s11 + $0xa0] sm:$0xff] }
0x17f0   : > { %16449 = vmatpush3.msra.mxu0 %v10331_v63  ;;  %16450 = vmatprep.mubr.msk.f32.mxu0 %vm17477_vm0, %v17478_v1  ;;  %v15205_v4 = vld [vmem:[%s19433_s11 + $0xa8] sm:$0xff] }
0x17f1   : > { %16458 = vmatprep.subr.mxu0 %v17478_v1 }
0x17f2   : > { %v10030_v6 = vpop.f32.mrb[116].mxu1 }
0x17f3   : > { %v16407_v7 = vpop.f32.mrb[117].mxu1  ;;  %16446 = vmatmul.mubr.msk.f32.vlgmr.msra.gmra.mrb[124].mxu1 %vm2026_vm3, %v10030_v6  ;;  %v15206_v6 = vld [vmem:[%s19433_s11 + $0xb0] sm:$0xff] }
0x17f4   : > { %16454 = vmatpush3.msra.mxu1 %v10332_v5  ;;  %16455 = vmatprep.mubr.msk.f32.mxu1 %vm17477_vm0, %v17478_v1  ;;  %v16883_v5 = vpack.c.bf16 %v15205_v4, %v15204_v3  ;;  %v15207_v7 = vld [vmem:[%s19433_s11 + $0xb8] sm:$0xff]  ;;  %v17208_v4 = vld [vmem:[%s17827_s3] sm:$0xff] }
0x17f5   : > { %16463 = vmatprep.subr.mxu1 %v17478_v1 }
0x17f6   : > { %v10176_v8 = vpop.f32.mrb[118].mxu1 }
0x17f7   : > { %v10103_v12 = vpop.f32.mrb[106].mxu0  ;;  %v16417_v13 = vpop.f32.mrb[119].mxu1  ;;  %16456 = vmatmul.mubr.msk.f32.vlgmr.msra.gmra.mrb[126].mxu1 %vm2026_vm3, %v10176_v8 }
0x17f8   : > { %v16412_v57 = vpop.f32.mrb[107].mxu0  ;;  %16451 = vmatmul.mubr.msk.f32.vlgmr.msra.gmra.mrb[114].mxu0 %vm2026_vm3, %v10103_v12  ;;  %16464 = vmatpush3.msra.mxu1 %v10334_v50  ;;  %v16886_v50 = vpack.c.bf16 %v15207_v7, %v15206_v6  ;;  %v11200_v6 = vld [vmem:[#allocation7 + $0x1c0] sm:$0xff]  ;;  %v11201_v7 = vld [vmem:[#allocation7 + $0x1c8] sm:$0xff] }
0x17f9   : > { %16459 = vmatpush3.msra.mxu0 %v10333_v10  ;;  %16460 = vmatprep.mubr.msk.f32.mxu0 %vm17477_vm0, %v17478_v1  ;;  %v15198_v57 = vld [vmem:[%s19431_s9 + $0x2] ss:$0 sm:$0xff] }
0x17fa   : > { %16465 = vmatprep.mubr.msk.f32.mxu1 %vm17477_vm0, %v17478_v1  ;;  %16876 = vmatprep.subr.bf16.mxu0 %v17476_v0 }
0x17fb   : > { %16888 = vmatprep.subr.bf16.mxu1 %v17476_v0 }
0x17fe   : > { %v10322_v14 = vpop.f32.mrb[120].mxu1 }
0x17ff   : > { %v10249_v59 = vpop.f32.mrb[108].mxu0  ;;  %v16427_v15 = vpop.f32.mrb[121].mxu1  ;;  %16466 = vmatmul.mubr.msk.f32.vlgmr.msra.gmra.mrb[128].mxu1 %vm2026_vm3, %v10322_v14 }
0x1800   : > { %v16422_v54 = vpop.f32.mrb[109].mxu0  ;;  %16461 = vmatmul.mubr.msk.f32.vlgmr.msra.gmra.mrb[116].mxu0 %vm2026_vm3, %v10249_v59  ;;  %16495 = vmatprep.mubr.msk.f32.mxu1 %vm17477_vm0, %v17478_v1  ;;  %v15199_v59 = vld [vmem:[%s19501_s20 + $0x2] ss:$0 sm:$0xff] }
0x1801   : > { %16484 = vmatprep.mubr.msk.f32.mxu0 %vm17477_vm0, %v17478_v1  ;;  %16878 = vmatpush3.bf16.msra.mxu0 %v16877_v61  ;;  %v11198_v61 = vld [vmem:[#allocation7 + $0x1b0] sm:$0xff] }
0x1802   : > { %16879 = vmatprep.subr.bf16.mxu0 %v17476_v0 }
0x18ba   : > { %v10477_v16 = vpop.f32.mrb[122].mxu1 }
0x18bb   : > { %v10404_v17 = vpop.f32.mrb[110].mxu0  ;;  %v10920_v18 = vsel %vm752_vm1, %v10477_v16, 0.0  ;;  %v16437_v20 = vpop.f32.mrb[123].mxu1  ;;  %v15212_v16 = vld [vmem:[%s19502_s6 + $0x40] sm:$0xff] }
0x18bc   : > { %v10919_v21 = vsel %vm752_vm1, %v10404_v17, 0.0  ;;  %v16432_v11 = vpop.f32.mrb[111].mxu0  ;;  %v15213_v17 = vld [vmem:[%s19502_s6 + $0x48] sm:$0xff]  ;;  %v15214_v20 = vld [vmem:[%s19502_s6 + $0x50] sm:$0xff] }
0x18bd   : > { %v10921_v24 = vadd.f32 %v10920_v18, %v10919_v21  ;;  %v16889_v18 = vpack.c.bf16 %v15213_v17, %v15212_v16  ;;  %v15215_v21 = vld [vmem:[%s19502_s6 + $0x58] sm:$0xff]  ;;  %v15255_v16 = vld [vmem:[%s19427_s5 + $0xc0] sm:$0xff]  ;;  %v15257_v17 = vld [vmem:[%s19427_s5 + $0xd0] sm:$0xff] }
0x18be   : > { %v16892_v11 = vpack.c.bf16 %v15215_v21, %v15214_v20  ;;  %v15258_v20 = vld [vmem:[%s19427_s5 + $0xd8] sm:$0xff]  ;;  %v15261_v21 = vld [vmem:[%s19427_s5 + $0xf0] sm:$0xff] }
0x18bf   : > { %16890 = vmatpush3.bf16.msra.mxu1 %v16889_v18  ;;  %v15259_v18 = vld [vmem:[%s19427_s5 + $0xe0] sm:$0xff] }
0x18c0   : > { %16891 = vmatprep.subr.bf16.mxu1 %v17476_v0 }
0x18c2   : > { %v10550_v48 = vpop.f32.mrb[112].mxu0 }
0x18c3   : > { %v10922_v22 = vsel %vm752_vm1, %v10550_v48, 0.0  ;;  %v16442_v29 = vpop.f32.mrb[113].mxu0  ;;  %16893 = vmatpush3.bf16.msra.mxu1 %v16892_v11  ;;  %v15260_v11 = vld [vmem:[%s19427_s5 + $0xe8] sm:$0xff] }
0x18c4   : > { %v10923_v30 = vadd.f32 %v10922_v22, %v10921_v24  ;;  %16894 = vmatprep.subr.bf16.mxu1 %v17476_v0  ;;  %v15209_v24 = vld [vmem:[%s19503_s4 + $0x2] ss:$0 sm:$0xff] }
0x18c6   : > { %v10623_v19 = vpop.f32.mrb[124].mxu1 }
0x18c7   : > { %v10924_v33 = vsel %vm752_vm1, %v10623_v19, 0.0  ;;  %v16447_v35 = vpop.f32.mrb[125].mxu1 }
0x18c8   : > { %v10925_v31 = vadd.f32 %v10924_v33, %v10923_v30 }
0x18ca   : > { %v10769_v23 = vpop.f32.mrb[126].mxu1 }
0x18cb   : > { %v10696_v28 = vpop.f32.mrb[114].mxu0  ;;  %v16457_v37 = vpop.f32.mrb[127].mxu1  ;;  %v10928_v39 = vsel %vm752_vm1, %v10769_v23, 0.0  ;;  %v15217_v23 = vld [vmem:[%s19504_s19 + $0x2] ss:$0 sm:$0xff] }
0x18cc   : > { %v10926_v25 = vsel %vm752_vm1, %v10696_v28, 0.0  ;;  %v16452_v38 = vpop.f32.mrb[115].mxu0 }
0x18cd   : > { %v10927_v44 = vadd.f32 %v10926_v25, %v10925_v31 }
0x18cf   : > { %v10929_v40 = vadd.f32 %v10928_v39, %v10927_v44 }
0x18d2   : > { %v10915_v41 = vpop.f32.mrb[128].mxu1 }
0x18d3   : > { %v10842_v42 = vpop.f32.mrb[116].mxu0  ;;  %v16467_v27 = vpop.f32.mrb[129].mxu1  ;;  %v10932_v9 = vsel %vm752_vm1, %v10915_v41, 0.0 }
0x18d4   : > { %v10930_v43 = vsel %vm752_vm1, %v10842_v42, 0.0  ;;  %v16462_v45 = vpop.f32.mrb[117].mxu0 }
0x18d5   : > { %v10931_v47 = vadd.f32 %v10930_v43, %v10929_v40  ;;  %v11192_v43 = vld [vmem:[#allocation7 + $0x180] sm:$0xff]  ;;  %v11193_v45 = vld [vmem:[#allocation7 + $0x188] sm:$0xff] }
0x18d7   : > { %v10933_v49 = vadd.f32 %v10932_v9, %v10931_v47  ;;  %v11194_v47 = vld [vmem:[#allocation7 + $0x190] sm:$0xff]  ;;  %v16895_v9 = vpack.c.bf16 %v11193_v45, %v11192_v43 }
0x18d9   : > { %v10942_v36 = vadd.f32 %v15195_v34, %v10933_v49  ;;  %v11195_v34 = vld [vmem:[#allocation7 + $0x198] sm:$0xff] }
0x18da   : > { %v16899_v49 = vpack.c.bf16 %v11195_v34, %v11194_v47 }
0x18db   : > { %v10943_v51 = vadd.f32 %v10942_v36, %v18630_v26  ;;  %v15202_v26 = vld [vmem:[%s19433_s11 + $0x90] sm:$0xff] }
0x18dc   : > { %v16880_v63 = vpack.c.bf16 %v15203_v62, %v15202_v26  ;;  %v11199_v26 = vld [vmem:[#allocation7 + $0x1b8] sm:$0xff] }
0x18dd   : > { %v10948_v32 = vsel %vm752_vm1, %v10943_v51, 0.0  ;;  %v16907_v3 = vpack.c.bf16 %v11199_v26, %v11198_v61 }
0x18de   : > { %10949 = vadd.xlane.f32.xlu1 %v10948_v32  ;;  %16881 = vmatpush3.bf16.msra.mxu0 %v16880_v63 }
0x18df   : > { %16882 = vmatprep.subr.bf16.mxu0 %v17476_v0 }
0x18e2   : > { %16884 = vmatpush3.bf16.msra.mxu0 %v16883_v5 }
0x18e3   : > { %16885 = vmatprep.subr.bf16.mxu0 %v17476_v0 }
0x18e6   : > { %16887 = vmatpush3.bf16.msra.mxu0 %v16886_v50  ;;  %v11202_v50 = vld [vmem:[#allocation7 + $0x1d0] sm:$0xff] }
0x18e7   : > { %16898 = vmatprep.subr.bf16.mxu0 %v17476_v0 }
0x196b   : > { %v10950_v52 = vpop.xlane.xlu1 %10949 }
0x196c   : > { %v10951_v55 = vmul.f32 0.015625, %v10950_v52 }
0x196e   : > { %v10952_v56 = vsub.f32 %v10943_v51, %v10951_v55  ;;  %v15221_v55 = vld [vmem:[%s19505_s30 + $0x2] ss:$0 sm:$0xff] }
0x1970   : > { %v10953_v58 = vmul.f32 %v10952_v56, %v10952_v56 }
0x1972   : > { %v10954_v53 = vsel %vm752_vm1, %v10953_v58, 0.0  ;;  %v15222_v58 = vld [vmem:[%s19506_s23 + $0x2] ss:$0 sm:$0xff] }
0x1973   : > { %10955 = vadd.xlane.f32.xlu0 %v10954_v53  ;;  %v11196_v53 = vld [vmem:[#allocation7 + $0x1a0] sm:$0xff] }
0x1974   : > { %v16903_v63 = vpack.c.bf16 %v11197_v60, %v11196_v53 }
0x1a00   : > { %v10956_v8 = vpop.xlane.xlu0 %10955 }
0x1a01   : > { %v10957_v10 = vmul.f32 0.015625, %v10956_v8  ;;  %v11203_v8 = vld [vmem:[#allocation7 + $0x1d8] sm:$0xff] }
0x1a03   : > { %v10958_v12 = vadd.f32 1e-05, %v10957_v10  ;;  %v16911_v10 = vpack.c.bf16 %v11201_v7, %v11200_v6 }
0x1a05   : > { %17156 = vrsqrt.f32 %v10958_v12  ;;  %v16915_v12 = vpack.c.bf16 %v11203_v8, %v11202_v50 }
0x1a0f   : > { %v17157_v13 = vpop.eup %17156 }
0x1a10   : > { %v10960_v14 = vmul.f32 %v17157_v13, %v10952_v56  ;;  %v11204_v13 = vld [vmem:[#allocation7 + $0x1e0] sm:$0xff] }
0x1a12   : > { %v10967_v15 = vmul.f32 %v15198_v57, %v10960_v14  ;;  %v11205_v57 = vld [vmem:[#allocation7 + $0x1e8] sm:$0xff]  ;;  %v11206_v14 = vld [vmem:[#allocation7 + $0x1f0] sm:$0xff] }
0x1a14   : > { %v10974_v54 = vadd.f32 %v15199_v59, %v10967_v15  ;;  %v11207_v59 = vld [vmem:[#allocation7 + $0x1f8] sm:$0xff]  ;;  %v16919_v15 = vpack.c.bf16 %v11205_v57, %v11204_v13 }
0x1a16   : > { %16485 = vmatmul.mubr.msk.f32.vlgmr.msra.gmra.mrb[118].mxu0 %vm752_vm1, %v10974_v54 }
0x1a17   : > { %16509 = vmatprep.mubr.msk.f32.mxu0 %vm17477_vm0, %v17478_v1  ;;  %16901 = vmatpush3.bf16.xpose.msk.msra.mxu0 %vm17863_vm2, %v16899_v49  ;;  %v15229_v49 = vld [vmem:[#allocation8 + $0x1e] ss:$0 sm:$0xff] }
0x1a18   : > { %16906 = vmatprep.subr.bf16.mxu0 %v17476_v0 }
0x1ae9   : > { %v11061_v48 = vpop.f32.mrb[118].mxu0 }
0x1aea   : > { %v11062_v22 = vadd.f32 %v15209_v24, %v11061_v48  ;;  %v16486_v29 = vpop.f32.mrb[119].mxu0  ;;  %v15262_v24 = vld [vmem:[%s19427_s5 + $0xf8] sm:$0xff] }
0x1aeb   : > { %v15223_v48 = vld [vmem:[#allocation8 + $0x18] ss:$0 sm:$0xff] }
0x1aec   : > { %v15211_v30 = vmul.f32 -1.442695, %v11062_v22 }
0x1aee   : > { %17158 = vpow2.f32 %v15211_v30 }
0x1af8   : > { %v17159_v19 = vpop.eup %17158 }
0x1af9   : > { %v11068_v33 = vadd.f32 1.0, %v17159_v19 }
0x1afb   : > { %17160 = vrcp.f32 %v11068_v33 }
0x1b05   : > { %v17161_v35 = vpop.eup %17160 }
0x1b06   : > { %v11071_v31 = vmul.f32 %v17161_v35, %v11062_v22  ;;  %v15224_v22 = vld [vmem:[#allocation8 + $0x19] ss:$0 sm:$0xff] }
0x1b08   : > { %16496 = vmatmul.mubr.msk.f32.vlgmr.msra.gmra.mrb[130].mxu1 %vm4072_vm4, %v11071_v31 }
0x1b09   : > { %16502 = vmatprep.mubr.msk.f32.mxu1 %vm17477_vm0, %v17478_v1  ;;  %16897 = vmatpush3.bf16.xpose.msk.msra.mxu1 %vm17863_vm2, %v16895_v9 }
0x1b0a   : > { %16902 = vmatprep.subr.bf16.mxu1 %v17476_v0 }
0x1bdb   : > { %v11154_v28 = vpop.f32.mrb[130].mxu1 }
0x1bdc   : > { %v11155_v37 = vadd.f32 %v15217_v23, %v11154_v28  ;;  %v16497_v25 = vpop.f32.mrb[131].mxu1  ;;  %v15225_v23 = vld [vmem:[#allocation8 + $0x1a] ss:$0 sm:$0xff] }
0x1bde   : > { %v11158_v38 = vadd.f32 %v11155_v37, %v10974_v54  ;;  %v16923_v54 = vpack.c.bf16 %v11207_v59, %v11206_v14 }
0x1be0   : > { %v11163_v44 = vsel %vm752_vm1, %v11158_v38, 0.0 }
0x1be1   : > { %11164 = vadd.xlane.f32.xlu1 %v11163_v44 }
0x1c6e   : > { %v11165_v39 = vpop.xlane.xlu1 %11164 }
0x1c6f   : > { %v11166_v40 = vmul.f32 0.015625, %v11165_v39  ;;  %v15226_v39 = vld [vmem:[#allocation8 + $0x1b] ss:$0 sm:$0xff] }
0x1c71   : > { %v11167_v41 = vsub.f32 %v11158_v38, %v11166_v40 }
0x1c73   : > { %v11168_v42 = vmul.f32 %v11167_v41, %v11167_v41 }
0x1c75   : > { %v11169_v27 = vsel %vm752_vm1, %v11168_v42, 0.0  ;;  %v15228_v42 = vld [vmem:[#allocation8 + $0x1d] ss:$0 sm:$0xff] }
0x1c76   : > { %11170 = vadd.xlane.f32.xlu0 %v11169_v27 }
0x1d03   : > { %v11171_v36 = vpop.xlane.xlu0 %11170 }
0x1d04   : > { %v11172_v51 = vmul.f32 0.015625, %v11171_v36  ;;  %v15230_v36 = vld [vmem:[#allocation8 + $0x1f] ss:$0 sm:$0xff] }
0x1d06   : > { %v11173_v32 = vadd.f32 1e-05, %v11172_v51 }
0x1d08   : > { %17162 = vrsqrt.f32 %v11173_v32 }
0x1d12   : > { %v17163_v52 = vpop.eup %17162 }
0x1d13   : > { %v11175_v56 = vmul.f32 %v17163_v52, %v11167_v41  ;;  %v15227_v41 = vld [vmem:[#allocation8 + $0x1c] ss:$0 sm:$0xff] }
0x1d15   : > { %v11182_v46 = vmul.f32 %v15221_v55, %v11175_v56 }
0x1d17   : > { %v19007_v62 = vadd.f32 %v15222_v58, %v11182_v46 }
0x1d19   : > { %v11190_v5 = vadd.f32 %v17208_v4, %v19007_v62 }
0x1d1b   : > { %16503 = vmatmul.mubr.msk.f32.vlgmr.msra.gmra.mrb[132].mxu1 %vm752_vm1, %v11190_v5  ;;  %16510 = vmatmul.mubr.msk.f32.vlgmr.msra.gmra.mrb[120].mxu0 %vm752_vm1, %v11190_v5 }
0x1d1c   : > { %16905 = vmatpush3.bf16.xpose.msk.msra.mxu1 %vm17863_vm2, %v16903_v63  ;;  %16909 = vmatpush3.bf16.xpose.msk.msra.mxu0 %vm17863_vm2, %v16907_v3 }
0x1d1d   : > { %16516 = vmatprep.mubr.msk.f32.mxu1 %vm17477_vm0, %v17478_v1  ;;  %16523 = vmatprep.mubr.msk.f32.mxu0 %vm17477_vm0, %v17478_v1 }
0x1d1e   : > { %16910 = vmatprep.subr.bf16.mxu1 %v17476_v0  ;;  %16914 = vmatprep.subr.bf16.mxu0 %v17476_v0 }
0x1d23   : > { %16517 = vmatmul.mubr.msk.f32.vlgmr.msra.gmra.mrb[134].mxu1 %vm752_vm1, %v11190_v5  ;;  %16524 = vmatmul.mubr.msk.f32.vlgmr.msra.gmra.mrb[122].mxu0 %vm752_vm1, %v11190_v5 }
0x1d24   : > { %16913 = vmatpush3.bf16.xpose.msk.msra.mxu1 %vm17863_vm2, %v16911_v10  ;;  %16917 = vmatpush3.bf16.xpose.msk.msra.mxu0 %vm17863_vm2, %v16915_v12 }
0x1d25   : > { %16530 = vmatprep.mubr.msk.f32.mxu1 %vm17477_vm0, %v17478_v1  ;;  %16537 = vmatprep.mubr.msk.f32.mxu0 %vm17477_vm0, %v17478_v1 }
0x1d26   : > { %16918 = vmatprep.subr.bf16.mxu1 %v17476_v0  ;;  %16922 = vmatprep.subr.bf16.mxu0 %v17476_v0 }
0x1d2b   : > { %16531 = vmatmul.mubr.msk.f32.vlgmr.msra.gmra.mrb[136].mxu1 %vm752_vm1, %v11190_v5  ;;  %16538 = vmatmul.mubr.msk.f32.vlgmr.msra.gmra.mrb[124].mxu0 %vm752_vm1, %v11190_v5 }
0x1d2c   : > { %16921 = vmatpush3.bf16.xpose.msk.msra.mxu1 %vm17863_vm2, %v16919_v15  ;;  %16925 = vmatpush3.bf16.xpose.msk.msra.mxu0 %vm17863_vm2, %v16923_v54 }
0x1d2d   : > { %16544 = vmatprep.mubr.msk.f32.mxu1 %vm17477_vm0, %v17478_v1  ;;  %16551 = vmatprep.mubr.msk.f32.mxu0 %vm17477_vm0, %v17478_v1 }
0x1d2e   : > { %16554 = vmatprep.subr.mxu1 %v17478_v1  ;;  %16564 = vmatprep.subr.mxu0 %v17478_v1 }
0x1d33   : > { %16545 = vmatmul.mubr.msk.f32.vlgmr.msra.gmra.mrb[138].mxu1 %vm752_vm1, %v11190_v5  ;;  %16552 = vmatmul.mubr.msk.f32.vlgmr.msra.gmra.mrb[126].mxu0 %vm752_vm1, %v11190_v5 }
0x1d34   : > { %16555 = vmatpush3.xpose.msk.msra.mxu1 %vm752_vm1, %v15255_v16  ;;  %16565 = vmatpush3.xpose.msk.msra.mxu0 %vm752_vm1, %v15257_v17 }
0x1d35   : > { %16556 = vmatprep.mubr.msk.f32.mxu1 %vm17477_vm0, %v17478_v1  ;;  %16566 = vmatprep.mubr.msk.f32.mxu0 %vm17477_vm0, %v17478_v1 }
0x1d36   : > { %16559 = vmatprep.subr.mxu1 %v17478_v1  ;;  %16574 = vmatprep.subr.mxu0 %v17478_v1 }
0x1d37   : > { %16557 = vmatmul.mubr.msk.f32.vlgmr.msra.gmra.mrb[140].mxu1 %vm752_vm1, %v19007_v62  ;;  %16567 = vmatmul.mubr.msk.f32.vlgmr.msra.gmra.mrb[128].mxu0 %vm752_vm1, %v19007_v62 }
0x1d38   : > { %16560 = vmatpush3.xpose.msk.msra.mxu1 %vm752_vm1, %v15256_v2  ;;  %16575 = vmatpush3.xpose.msk.msra.mxu0 %vm752_vm1, %v15259_v18 }
0x1d39   : > { %16561 = vmatprep.mubr.msk.f32.mxu1 %vm17477_vm0, %v17478_v1  ;;  %16576 = vmatprep.mubr.msk.f32.mxu0 %vm17477_vm0, %v17478_v1 }
0x1d3a   : > { %16569 = vmatprep.subr.mxu1 %v17478_v1  ;;  %16584 = vmatprep.subr.mxu0 %v17478_v1 }
0x1d3b   : > { %16562 = vmatmul.mubr.msk.f32.vlgmr.msra.gmra.mrb[142].mxu1 %vm752_vm1, %v19007_v62  ;;  %16577 = vmatmul.mubr.msk.f32.vlgmr.msra.gmra.mrb[130].mxu0 %vm752_vm1, %v19007_v62 }
0x1d3c   : > { %16570 = vmatpush3.xpose.msk.msra.mxu1 %vm752_vm1, %v15258_v20  ;;  %16585 = vmatpush3.xpose.msk.msra.mxu0 %vm752_vm1, %v15261_v21 }
0x1d3d   : > { %16571 = vmatprep.mubr.msk.f32.mxu1 %vm17477_vm0, %v17478_v1  ;;  %16586 = vmatprep.mubr.msk.f32.mxu0 %vm17477_vm0, %v17478_v1 }
0x1d3e   : > { %16579 = vmatprep.subr.mxu1 %v17478_v1  ;;  %16594 = vmatprep.subr.mxu0 %v17478_v1 }
0x1d3f   : > { %16572 = vmatmul.mubr.msk.f32.vlgmr.msra.gmra.mrb[144].mxu1 %vm752_vm1, %v19007_v62  ;;  %16587 = vmatmul.mubr.msk.f32.vlgmr.msra.gmra.mrb[132].mxu0 %vm752_vm1, %v19007_v62 }
0x1d40   : > { %16580 = vmatpush3.xpose.msk.msra.mxu1 %vm752_vm1, %v15260_v11  ;;  %16581 = vmatprep.mubr.msk.f32.mxu1 %vm17477_vm0, %v17478_v1 }
0x1d41   : > { %16589 = vmatprep.subr.mxu1 %v17478_v1  ;;  %16596 = vmatprep.mubr.msk.f32.mxu0 %vm17477_vm0, %v17478_v1 }
0x1d43   : > { %16582 = vmatmul.mubr.msk.f32.vlgmr.msra.gmra.mrb[146].mxu1 %vm752_vm1, %v19007_v62 }
0x1d44   : > { %16590 = vmatpush3.xpose.msk.msra.mxu1 %vm752_vm1, %v15262_v24  ;;  %16591 = vmatprep.mubr.msk.f32.mxu1 %vm17477_vm0, %v17478_v1  ;;  %v15263_v24 = vld [vmem:[#allocation10 + $0x18] ss:$0 sm:$0xff] }
0x1d45   : > { %16599 = vmatprep.subr.mxu1 %v17478_v1 }
0x1d47   : > { %16592 = vmatmul.mubr.msk.f32.vlgmr.msra.gmra.mrb[148].mxu1 %vm752_vm1, %v19007_v62 }
0x1d48   : > { %16601 = vmatprep.mubr.msk.f32.mxu1 %vm17477_vm0, %v17478_v1 }
0x1dee   : > { %v11340_v29 = vpop.f32.mrb[132].mxu1  ;;  %v11416_v30 = vpop.f32.mrb[120].mxu0 }
0x1def   : > { %v11341_v19 = vadd.f32 %v15223_v48, %v11340_v29  ;;  %v11417_v33 = vadd.f32 %v15224_v22, %v11416_v30  ;;  %v16504_v35 = vpop.f32.mrb[133].mxu1  ;;  %v16511_v31 = vpop.f32.mrb[121].mxu0  ;;  %v15264_v48 = vld [vmem:[#allocation10 + $0x19] ss:$0 sm:$0xff] }
0x1df1   : > { %12538 = vrot.lane.b32.xlu1 %v11341_v19, %s19507_s21  ;;  %12616 = vrot.lane.b32.xlu0 %v11417_v33, %s19507_s21  ;;  %v11876_v59 = vmul.f32 0.35355338, %v11341_v19  ;;  %v11877_v15 = vmul.f32 0.35355338, %v11417_v33 }
0x1df6   : > { %v11492_v28 = vpop.f32.mrb[134].mxu1  ;;  %v11568_v37 = vpop.f32.mrb[122].mxu0 }
0x1df7   : > { %v11493_v25 = vadd.f32 %v15225_v23, %v11492_v28  ;;  %v16518_v38 = vpop.f32.mrb[135].mxu1  ;;  %v16525_v44 = vpop.f32.mrb[123].mxu0  ;;  %v11569_v40 = vadd.f32 %v15226_v39, %v11568_v37  ;;  %v17209_v28 = vld [vmem:[%s17835_s12] sm:$0xff]  ;;  %s19377_s12 = scalar_lea.hbm %s19508_s1, %s15349_s28 }
0x1df9   : > { %12694 = vrot.lane.b32.xlu1 %v11493_v25, %s19507_s21  ;;  %v11878_v16 = vmul.f32 0.35355338, %v11493_v25  ;;  %v11879_v2 = vmul.f32 0.35355338, %v11569_v40 }
0x1dfd   : > { %12772 = vrot.lane.b32.xlu1 %v11569_v40, %s19507_s21 }
0x1dfe   : > { %v11644_v27 = vpop.f32.mrb[136].mxu1  ;;  %v11720_v43 = vpop.f32.mrb[124].mxu0 }
0x1dff   : > { %v11645_v45 = vadd.f32 %v15227_v41, %v11644_v27  ;;  %v11721_v47 = vadd.f32 %v15228_v42, %v11720_v43  ;;  %v16532_v9 = vpop.f32.mrb[137].mxu1  ;;  %v16539_v34 = vpop.f32.mrb[125].mxu0 }
0x1e01   : > { %12850 = vrot.lane.b32.xlu0 %v11645_v45, %s19507_s21  ;;  %12928 = vrot.lane.b32.xlu1 %v11721_v47, %s19507_s21  ;;  %v11880_v21 = vmul.f32 0.35355338, %v11645_v45  ;;  %v11881_v11 = vmul.f32 0.35355338, %v11721_v47 }
0x1e06   : > { %v11796_v51 = vpop.f32.mrb[138].mxu1  ;;  %v11872_v32 = vpop.f32.mrb[126].mxu0 }
0x1e07   : > { %v19131_v52 = vadd.f32 %v15229_v49, %v11796_v51  ;;  %v19133_v55 = vadd.f32 %v15230_v36, %v11872_v32  ;;  %v16546_v56 = vpop.f32.mrb[139].mxu1  ;;  %v16553_v58 = vpop.f32.mrb[127].mxu0 }
0x1e09   : > { %13006 = vrot.lane.b32.xlu0 %v19131_v52, %s19507_s21  ;;  %13084 = vrot.lane.b32.xlu1 %v19133_v55, %s19507_s21  ;;  %v11882_v30 = vmul.f32 0.35355338, %v19131_v52  ;;  %v11883_v19 = vmul.f32 0.35355338, %v19133_v55  ;;  %s14699_s21 = scalar_lea.sflag [#allocation4], %s17820_s10 }
0x1e0a   : > { %v12022_v53 = vpop.f32.mrb[140].mxu1  ;;  %v19139_v46 = vpop.f32.mrb[128].mxu0 }
0x1e0b   : > { %v16558_v60 = vpop.f32.mrb[141].mxu1  ;;  %v16568_v61 = vpop.f32.mrb[129].mxu0  ;;  %v12023_v33 = vadd.f32 %v15263_v24, %v12022_v53 }
0x1e0e   : > { %v12095_v26 = vpop.f32.mrb[142].mxu1  ;;  %v19141_v63 = vpop.f32.mrb[130].mxu0 }
0x1e0f   : > { %v16563_v3 = vpop.f32.mrb[143].mxu1  ;;  %v16578_v4 = vpop.f32.mrb[131].mxu0  ;;  %v12096_v35 = vadd.f32 %v15264_v48, %v12095_v26 }
0x1e12   : > { %v19143_v5 = vpop.f32.mrb[144].mxu1  ;;  %v19145_v6 = vpop.f32.mrb[132].mxu0 }
0x1e13   : > { %v16573_v7 = vpop.f32.mrb[145].mxu1  ;;  %v16588_v50 = vpop.f32.mrb[133].mxu0 }
0x1e16   : > { %v19147_v8 = vpop.f32.mrb[146].mxu1 }
0x1e17   : > { %v16583_v10 = vpop.f32.mrb[147].mxu1 }
0x1e1a   : > { %v19149_v12 = vpop.f32.mrb[148].mxu1 }
0x1e1b   : > { %v16593_v13 = vpop.f32.mrb[149].mxu1 }
0x1e63   : > { %v12539_v57 = vpop.permute.xlu1 %12538  ;;  %v12617_v14 = vpop.permute.xlu0 %12616 }
0x1e64   : > { %16595 = vmatpush3.xpose.msk.msra.mxu0 %vm2026_vm3, %v12539_v57  ;;  %16600 = vmatpush3.xpose.msk.msra.mxu1 %vm2026_vm3, %v12617_v14 }
0x1e65   : > { %16604 = vmatprep.subr.mxu0 %v17478_v1  ;;  %16609 = vmatprep.subr.mxu1 %v17478_v1 }
0x1e67   : > { %16597 = vmatmul.mubr.msk.f32.vlgmr.msra.gmra.mrb[134].mxu0 %vm2026_vm3, %v11876_v59  ;;  %16602 = vmatmul.mubr.msk.f32.vlgmr.msra.gmra.mrb[150].mxu1 %vm2026_vm3, %v11877_v15 }
0x1e68   : > { %16606 = vmatprep.mubr.msk.f32.mxu0 %vm17477_vm0, %v17478_v1  ;;  %16611 = vmatprep.mubr.msk.f32.mxu1 %vm17477_vm0, %v17478_v1 }
0x1e6b   : > { %v12695_v54 = vpop.permute.xlu1 %12694 }
0x1e6c   : > { %16605 = vmatpush3.xpose.msk.msra.mxu0 %vm2026_vm3, %v12695_v54 }
0x1e6d   : > { %16614 = vmatprep.subr.mxu0 %v17478_v1 }
0x1e6f   : > { %16607 = vmatmul.mubr.msk.f32.vlgmr.msra.gmra.mrb[136].mxu0 %vm2026_vm3, %v11878_v16  ;;  %v12773_v17 = vpop.permute.xlu1 %12772 }
0x1e70   : > { %16610 = vmatpush3.xpose.msk.msra.mxu1 %vm2026_vm3, %v12773_v17  ;;  %16616 = vmatprep.mubr.msk.f32.mxu0 %vm17477_vm0, %v17478_v1 }
0x1e71   : > { %16619 = vmatprep.subr.mxu1 %v17478_v1 }
0x1e73   : > { %v12851_v18 = vpop.permute.xlu0 %12850  ;;  %16612 = vmatmul.mubr.msk.f32.vlgmr.msra.gmra.mrb[152].mxu1 %vm2026_vm3, %v11879_v2  ;;  %v12929_v20 = vpop.permute.xlu1 %12928 }
0x1e74   : > { %16615 = vmatpush3.xpose.msk.msra.mxu0 %vm2026_vm3, %v12851_v18  ;;  %16620 = vmatpush3.xpose.msk.msra.mxu1 %vm2026_vm3, %v12929_v20 }
0x1e75   : > { %16621 = vmatprep.mubr.msk.f32.mxu1 %vm17477_vm0, %v17478_v1  ;;  %16624 = vmatprep.subr.mxu0 %v17478_v1 }
0x1e76   : > { %16629 = vmatprep.subr.mxu1 %v17478_v1 }
0x1e77   : > { %16617 = vmatmul.mubr.msk.f32.vlgmr.msra.gmra.mrb[138].mxu0 %vm2026_vm3, %v11880_v21  ;;  %16622 = vmatmul.mubr.msk.f32.vlgmr.msra.gmra.mrb[154].mxu1 %vm2026_vm3, %v11881_v11 }
0x1e78   : > { %16626 = vmatprep.mubr.msk.f32.mxu0 %vm17477_vm0, %v17478_v1  ;;  %16631 = vmatprep.mubr.msk.f32.mxu1 %vm17477_vm0, %v17478_v1 }
0x1e7b   : > { %v13007_v22 = vpop.permute.xlu0 %13006  ;;  %v13085_v29 = vpop.permute.xlu1 %13084 }
0x1e7c   : > { %16625 = vmatpush3.xpose.msk.msra.mxu0 %vm2026_vm3, %v13007_v22  ;;  %16630 = vmatpush3.xpose.msk.msra.mxu1 %vm2026_vm3, %v13085_v29 }
0x1e7d   : > { %16634 = vmatprep.subr.mxu0 %v17478_v1  ;;  %16639 = vmatprep.subr.mxu1 %v17478_v1 }
0x1e7f   : > { %16627 = vmatmul.mubr.msk.f32.vlgmr.msra.gmra.mrb[140].mxu0 %vm2026_vm3, %v11882_v30  ;;  %16632 = vmatmul.mubr.msk.f32.vlgmr.msra.gmra.mrb[156].mxu1 %vm2026_vm3, %v11883_v19 }
0x1e80   : > { %16635 = vmatpush3.msra.mxu0 %v12023_v33  ;;  %16640 = vmatpush3.msra.mxu1 %v12096_v35 }
0x1e81   : > { %16636 = vmatprep.mubr.msk.f32.mxu0 %vm17477_vm0, %v17478_v1  ;;  %16641 = vmatprep.mubr.msk.f32.mxu1 %vm17477_vm0, %v17478_v1 }
0x1e82   : > { %16644 = vmatprep.subr.mxu0 %v17478_v1  ;;  %16649 = vmatprep.subr.mxu1 %v17478_v1 }
0x1f3a   : > { %v12611_v31 = vpop.f32.mrb[134].mxu0  ;;  %v12689_v23 = vpop.f32.mrb[150].mxu1 }
0x1f3b   : > { %v12612_v37 = vadd.f32 %v17209_v28, %v12611_v31  ;;  %v12690_v25 = vadd.f32 %v17209_v28, %v12689_v23  ;;  %v16598_v38 = vpop.f32.mrb[135].mxu0  ;;  %v16603_v44 = vpop.f32.mrb[151].mxu1 }
0x1f3d   : > { %v13164_v39 = vsel %vm2026_vm3, %v12690_v25, -inf  ;;  %v13161_v40 = vsel %vm2026_vm3, %v12612_v37, -inf }
0x1f3e   : > { %13165 = vmax.xlane.f32.xlu1 %v13164_v39  ;;  %13162 = vmax.xlane.f32.xlu0 %v13161_v40 }
0x1f42   : > { %v12767_v41 = vpop.f32.mrb[136].mxu0 }
0x1f43   : > { %v12768_v42 = vadd.f32 %v17209_v28, %v12767_v41  ;;  %v16608_v27 = vpop.f32.mrb[137].mxu0 }
0x1f45   : > { %v13167_v43 = vsel %vm2026_vm3, %v12768_v42, -inf }
0x1f46   : > { %v12845_v45 = vpop.f32.mrb[152].mxu1  ;;  %13168 = vmax.xlane.f32.xlu0 %v13167_v43 }
0x1f47   : > { %v12846_v47 = vadd.f32 %v17209_v28, %v12845_v45  ;;  %v16613_v9 = vpop.f32.mrb[153].mxu1 }
0x1f49   : > { %v13170_v34 = vsel %vm2026_vm3, %v12846_v47, -inf }
0x1f4a   : > { %v13001_v49 = vpop.f32.mrb[154].mxu1  ;;  %13171 = vmax.xlane.f32.xlu0 %v13170_v34  ;;  %v12923_v36 = vpop.f32.mrb[138].mxu0 }
0x1f4b   : > { %v13002_v51 = vadd.f32 %v17209_v28, %v13001_v49  ;;  %v12924_v32 = vadd.f32 %v17209_v28, %v12923_v36  ;;  %v16618_v52 = vpop.f32.mrb[139].mxu0  ;;  %v16623_v55 = vpop.f32.mrb[155].mxu1 }
0x1f4c   : > { %v15266_v52 = vld [vmem:[#allocation10 + $0x1b] ss:$0 sm:$0xff] }
0x1f4d   : > { %v13176_v56 = vsel %vm2026_vm3, %v13002_v51, -inf  ;;  %v13173_v58 = vsel %vm2026_vm3, %v12924_v32, -inf }
0x1f4e   : > { %13177 = vmax.xlane.f32.xlu0 %v13176_v56  ;;  %13174 = vmax.xlane.f32.xlu1 %v13173_v58  ;;  %v15265_v56 = vld [vmem:[#allocation10 + $0x1a] ss:$0 sm:$0xff] }
0x1f52   : > { %v13079_v53 = vpop.f32.mrb[140].mxu0  ;;  %v13157_v60 = vpop.f32.mrb[156].mxu1 }
0x1f53   : > { %v13080_v61 = vadd.f32 %v17209_v28, %v13079_v53  ;;  %v13158_v26 = vadd.f32 %v17209_v28, %v13157_v60  ;;  %v16628_v3 = vpop.f32.mrb[141].mxu0  ;;  %v16633_v4 = vpop.f32.mrb[157].mxu1 }
0x1f54   : > { %v12169_v3 = vadd.f32 %v15265_v56, %v19139_v46 }
0x1f55   : > { %v13182_v7 = vsel %vm2026_vm3, %v13158_v26, -inf  ;;  %v13179_v50 = vsel %vm2026_vm3, %v13080_v61, -inf }
0x1f56   : > { %13183 = vmax.xlane.f32.xlu0 %v13182_v7  ;;  %13180 = vmax.xlane.f32.xlu1 %v13179_v50 }
0x1fcb   : > { %v13166_v10 = vpop.xlane.xlu1 %13165  ;;  %v13163_v13 = vpop.xlane.xlu0 %13162 }
0x1fcc   : > { %v13186_v57 = vsub.f32 %v12690_v25, %v13166_v10  ;;  %v13185_v14 = vsub.f32 %v12612_v37, %v13163_v13  ;;  %v15268_v13 = vld [vmem:[#allocation10 + $0x1d] ss:$0 sm:$0xff] }
0x1fce   : > { %v13195_v59 = vmul.f32 1.442695, %v13186_v57  ;;  %v13193_v15 = vmul.f32 1.442695, %v13185_v14 }
0x1fd0   : > { %17164 = vpow2.f32 %v13195_v59 }
0x1fd1   : > { %17166 = vpow2.f32 %v13193_v15  ;;  %v12388_v15 = vadd.f32 %v15268_v13, %v19147_v8 }
0x1fd3   : > { %v13169_v54 = vpop.xlane.xlu0 %13168 }
0x1fd4   : > { %v13187_v16 = vsub.f32 %v12768_v42, %v13169_v54 }
0x1fd6   : > { %v13197_v17 = vmul.f32 1.442695, %v13187_v16  ;;  %v15270_v16 = vld [vmem:[#allocation10 + $0x1f] ss:$0 sm:$0xff] }
0x1fd7   : > { %v13172_v2 = vpop.xlane.xlu0 %13171 }
0x1fd8   : > { %17168 = vpow2.f32 %v13197_v17  ;;  %v13188_v18 = vsub.f32 %v12846_v47, %v13172_v2  ;;  %v15269_v17 = vld [vmem:[#allocation10 + $0x1e] ss:$0 sm:$0xff] }
0x1fda   : > { %v17165_v20 = vpop.eup %17164  ;;  %v13199_v21 = vmul.f32 1.442695, %v13188_v18 }
0x1fdb   : > { %v17167_v11 = vpop.eup %17166  ;;  %v13178_v24 = vpop.xlane.xlu0 %13177  ;;  %v13212_v22 = vsel %vm2026_vm3, %v17165_v20, 0.0 }
0x1fdc   : > { %v13175_v48 = vpop.xlane.xlu1 %13174  ;;  %17170 = vpow2.f32 %v13199_v21  ;;  %v13190_v29 = vsub.f32 %v13002_v51, %v13178_v24  ;;  %13213 = vadd.xlane.f32.xlu0 %v13212_v22  ;;  %v13209_v19 = vsel %vm2026_vm3, %v17167_v11, 0.0  ;;  %v12461_v21 = vadd.f32 %v15269_v17, %v19145_v6  ;;  %v13835_v22 = vld [vmem:[#allocation11 + $0xc8] sm:$0xff] }
0x1fdd   : > { %v13189_v30 = vsub.f32 %v12924_v32, %v13175_v48  ;;  %13210 = vadd.xlane.f32.xlu1 %v13209_v19  ;;  %v13834_v48 = vld [vmem:[#allocation11 + $0xc0] sm:$0xff]  ;;  %v13836_v19 = vld [vmem:[#allocation11 + $0xd0] sm:$0xff] }
0x1fde   : > { %v13203_v33 = vmul.f32 1.442695, %v13190_v29  ;;  %v13837_v29 = vld [vmem:[#allocation11 + $0xd8] sm:$0xff] }
0x1fdf   : > { %v13201_v35 = vmul.f32 1.442695, %v13189_v30 }
0x1fe0   : > { %17172 = vpow2.f32 %v13203_v33 }
0x1fe1   : > { %17174 = vpow2.f32 %v13201_v35 }
0x1fe2   : > { %v17169_v31 = vpop.eup %17168 }
0x1fe3   : > { %v13184_v23 = vpop.xlane.xlu0 %13183  ;;  %v13181_v28 = vpop.xlane.xlu1 %13180  ;;  %v13215_v37 = vsel %vm2026_vm3, %v17169_v31, 0.0 }
0x1fe4   : > { %v13192_v25 = vsub.f32 %v13158_v26, %v13184_v23  ;;  %v13191_v38 = vsub.f32 %v13080_v61, %v13181_v28  ;;  %13216 = vadd.xlane.f32.xlu1 %v13215_v37  ;;  %v12242_v61 = vadd.f32 %v15266_v52, %v19143_v5  ;;  %v15267_v5 = vld [vmem:[#allocation10 + $0x1c] ss:$0 sm:$0xff]  ;;  %v13838_v23 = vld [vmem:[#allocation11 + $0xe0] sm:$0xff] }
0x1fe5   : > { %v12315_v10 = vadd.f32 %v15267_v5, %v19141_v63 }
0x1fe6   : > { %v17171_v44 = vpop.eup %17170  ;;  %v13207_v39 = vmul.f32 1.442695, %v13192_v25  ;;  %v13205_v40 = vmul.f32 1.442695, %v13191_v38  ;;  %v13839_v25 = vld [vmem:[#allocation11 + $0xe8] sm:$0xff] }
0x1fe7   : > { %v13218_v41 = vsel %vm2026_vm3, %v17171_v44, 0.0 }
0x1fe8   : > { %17176 = vpow2.f32 %v13207_v39  ;;  %13219 = vadd.xlane.f32.xlu0 %v13218_v41  ;;  %v13841_v39 = vld [vmem:[#allocation11 + $0xf8] sm:$0xff]  ;;  %v13840_v41 = vld [vmem:[#allocation11 + $0xf0] sm:$0xff] }
0x1fe9   : > { %17178 = vpow2.f32 %v13205_v40 }
0x1fea   : > { %v19208_v42 = vpop.eup %17172 }
0x1feb   : > { %v19210_v27 = vpop.eup %17174  ;;  %v13224_v43 = vsel %vm2026_vm3, %v19208_v42, 0.0 }
0x1fec   : > { %13225 = vadd.xlane.f32.xlu0 %v13224_v43  ;;  %v13221_v45 = vsel %vm2026_vm3, %v19210_v27, 0.0 }
0x1fed   : > { %13222 = vadd.xlane.f32.xlu1 %v13221_v45 }
0x1ff2   : > { %v19216_v47 = vpop.eup %17176 }
0x1ff3   : > { %v19218_v9 = vpop.eup %17178  ;;  %v13230_v34 = vsel %vm2026_vm3, %v19216_v47, 0.0 }
0x1ff4   : > { %13231 = vadd.xlane.f32.xlu0 %v13230_v34  ;;  %v13227_v49 = vsel %vm2026_vm3, %v19218_v9, 0.0 }
0x1ff5   : > { %13228 = vadd.xlane.f32.xlu1 %v13227_v49 }
0x2069   : > { %v13214_v36 = vpop.xlane.xlu0 %13213 }
0x206a   : > { %17180 = vrcp.f32 %v13214_v36  ;;  %v13211_v51 = vpop.xlane.xlu1 %13210 }
0x206b   : > { %17182 = vrcp.f32 %v13211_v51 }
0x2071   : > { %v13217_v32 = vpop.xlane.xlu1 %13216 }
0x2072   : > { %17184 = vrcp.f32 %v13217_v32 }
0x2074   : > { %v17181_v55 = vpop.eup %17180 }
0x2075   : > { %v17183_v58 = vpop.eup %17182  ;;  %v13242_v53 = vmul.f32 %v17181_v55, %v17165_v20  ;;  %v13220_v60 = vpop.xlane.xlu0 %13219  ;;  %v12534_v20 = vadd.f32 %v15270_v16, %v19149_v12 }
0x2076   : > { %v13241_v26 = vmul.f32 %v17183_v58, %v17167_v11  ;;  %17186 = vrcp.f32 %v13220_v60 }
0x2077   : > { %16642 = vmatmul.mubr.msk.f32.vlgmr.msra.gmra.mrb[158].mxu1 %vm2026_vm3, %v13242_v53 }
0x2078   : > { %16637 = vmatmul.mubr.msk.f32.vlgmr.msra.gmra.mrb[142].mxu0 %vm2026_vm3, %v13241_v26  ;;  %16650 = vmatpush3.msra.mxu1 %v12242_v61 }
0x2079   : > { %16645 = vmatpush3.msra.mxu0 %v12169_v3  ;;  %v13226_v4 = vpop.xlane.xlu0 %13225  ;;  %16646 = vmatprep.mubr.msk.f32.mxu0 %vm17477_vm0, %v17478_v1 }
0x207a   : > { %17188 = vrcp.f32 %v13226_v4  ;;  %v13223_v7 = vpop.xlane.xlu1 %13222  ;;  %16654 = vmatprep.subr.mxu0 %v17478_v1  ;;  %16651 = vmatprep.mubr.msk.f32.mxu1 %vm17477_vm0, %v17478_v1 }
0x207b   : > { %17190 = vrcp.f32 %v13223_v7  ;;  %16659 = vmatprep.subr.mxu1 %v17478_v1 }
0x207c   : > { %v17185_v46 = vpop.eup %17184 }
0x207d   : > { %v13243_v50 = vmul.f32 %v17185_v46, %v17169_v31 }
0x207f   : > { %16647 = vmatmul.mubr.msk.f32.vlgmr.msra.gmra.mrb[144].mxu0 %vm2026_vm3, %v13243_v50 }
0x2080   : > { %v17187_v57 = vpop.eup %17186  ;;  %16655 = vmatpush3.msra.mxu0 %v12315_v10  ;;  %16656 = vmatprep.mubr.msk.f32.mxu0 %vm17477_vm0, %v17478_v1 }
0x2081   : > { %v13244_v14 = vmul.f32 %v17187_v57, %v17171_v44  ;;  %v13232_v59 = vpop.xlane.xlu0 %13231  ;;  %16664 = vmatprep.subr.mxu0 %v17478_v1 }
0x2082   : > { %17192 = vrcp.f32 %v13232_v59  ;;  %v13229_v54 = vpop.xlane.xlu1 %13228 }
0x2083   : > { %17194 = vrcp.f32 %v13229_v54  ;;  %16652 = vmatmul.mubr.msk.f32.vlgmr.msra.gmra.mrb[160].mxu1 %vm2026_vm3, %v13244_v14 }
0x2084   : > { %v17189_v63 = vpop.eup %17188  ;;  %16660 = vmatpush3.msra.mxu1 %v12388_v15  ;;  %16661 = vmatprep.mubr.msk.f32.mxu1 %vm17477_vm0, %v17478_v1 }
0x2085   : > { %v17191_v2 = vpop.eup %17190  ;;  %v13246_v18 = vmul.f32 %v17189_v63, %v19208_v42  ;;  %16669 = vmatprep.subr.mxu1 %v17478_v1 }
0x2086   : > { %v13245_v8 = vmul.f32 %v17191_v2, %v19210_v27 }
0x2087   : > { %16662 = vmatmul.mubr.msk.f32.vlgmr.msra.gmra.mrb[162].mxu1 %vm2026_vm3, %v13246_v18  ;;  %v15320_v18 = vld [vmem:[%s19430_s8 + $0x3] ss:$0 sm:$0xff] }
0x2088   : > { %16657 = vmatmul.mubr.msk.f32.vlgmr.msra.gmra.mrb[146].mxu0 %vm2026_vm3, %v13245_v8  ;;  %16670 = vmatpush3.msra.mxu1 %v12534_v20 }
0x2089   : > { %16665 = vmatpush3.msra.mxu0 %v12461_v21  ;;  %16666 = vmatprep.mubr.msk.f32.mxu0 %vm17477_vm0, %v17478_v1 }
0x208a   : > { %16671 = vmatprep.mubr.msk.f32.mxu1 %vm17477_vm0, %v17478_v1  ;;  %16674 = vmatprep.subr.mxu0 %v17478_v1 }
0x208b   : > { %16679 = vmatprep.subr.mxu1 %v17478_v1 }
0x208c   : > { %v17193_v12 = vpop.eup %17192 }
0x208d   : > { %v17195_v11 = vpop.eup %17194  ;;  %v13248_v6 = vmul.f32 %v17193_v12, %v19216_v47 }
0x208e   : > { %v13247_v24 = vmul.f32 %v17195_v11, %v19218_v9 }
0x208f   : > { %16672 = vmatmul.mubr.msk.f32.vlgmr.msra.gmra.mrb[164].mxu1 %vm2026_vm3, %v13248_v6 }
0x2090   : > { %16667 = vmatmul.mubr.msk.f32.vlgmr.msra.gmra.mrb[148].mxu0 %vm2026_vm3, %v13247_v24  ;;  %16681 = vmatprep.mubr.msk.f32.mxu1 %vm17477_vm0, %v17478_v1 }
0x2091   : > { %16676 = vmatprep.mubr.msk.f32.mxu0 %vm17477_vm0, %v17478_v1  ;;  %16675 = vmatpush3.msra.mxu0 %v13834_v48 }
0x2092   : > { %16680 = vmatpush3.msra.mxu1 %v13835_v22  ;;  %16684 = vmatprep.subr.mxu0 %v17478_v1 }
0x2093   : > { %16689 = vmatprep.subr.mxu1 %v17478_v1 }
0x214a   : > { %v13391_v30 = vpop.f32.mrb[158].mxu1 }
0x214b   : > { %v13318_v33 = vpop.f32.mrb[142].mxu0  ;;  %v16643_v35 = vpop.f32.mrb[159].mxu1  ;;  %16682 = vmatmul.mubr.msk.f32.vlgmr.msra.gmra.mrb[166].mxu1 %vm2026_vm3, %v13391_v30  ;;  %v15326_v30 = vld [vmem:[%s19433_s11 + $0xc8] sm:$0xff] }
0x214c   : > { %v16638_v31 = vpop.f32.mrb[143].mxu0  ;;  %16677 = vmatmul.mubr.msk.f32.vlgmr.msra.gmra.mrb[150].mxu0 %vm2026_vm3, %v13318_v33  ;;  %16690 = vmatpush3.msra.mxu1 %v13837_v29  ;;  %v15325_v29 = vld [vmem:[%s19433_s11 + $0xc0] sm:$0xff]  ;;  %v15328_v33 = vld [vmem:[%s19433_s11 + $0xd8] sm:$0xff] }
0x214d   : > { %16685 = vmatpush3.msra.mxu0 %v13836_v19  ;;  %16686 = vmatprep.mubr.msk.f32.mxu0 %vm17477_vm0, %v17478_v1  ;;  %v16927_v19 = vpack.c.bf16 %v15326_v30, %v15325_v29  ;;  %v15329_v31 = vld [vmem:[%s19433_s11 + $0xe0] sm:$0xff] }
0x214e   : > { %16691 = vmatprep.mubr.msk.f32.mxu1 %vm17477_vm0, %v17478_v1  ;;  %16694 = vmatprep.subr.mxu0 %v17478_v1 }
0x214f   : > { %16699 = vmatprep.subr.mxu1 %v17478_v1 }
0x2152   : > { %v13464_v28 = vpop.f32.mrb[144].mxu0 }
0x2153   : > { %v16648_v37 = vpop.f32.mrb[145].mxu0  ;;  %16687 = vmatmul.mubr.msk.f32.vlgmr.msra.gmra.mrb[152].mxu0 %vm2026_vm3, %v13464_v28 }
0x2154   : > { %16695 = vmatpush3.msra.mxu0 %v13838_v23  ;;  %16696 = vmatprep.mubr.msk.f32.mxu0 %vm17477_vm0, %v17478_v1  ;;  %v15330_v23 = vld [vmem:[%s19433_s11 + $0xe8] sm:$0xff]  ;;  %v15331_v37 = vld [vmem:[%s19433_s11 + $0xf0] sm:$0xff] }
0x2155   : > { %16704 = vmatprep.subr.mxu0 %v17478_v1  ;;  %v16933_v28 = vpack.c.bf16 %v15330_v23, %v15329_v31 }
0x2156   : > { %v13537_v38 = vpop.f32.mrb[160].mxu1 }
0x2157   : > { %v16653_v44 = vpop.f32.mrb[161].mxu1  ;;  %16692 = vmatmul.mubr.msk.f32.vlgmr.msra.gmra.mrb[168].mxu1 %vm2026_vm3, %v13537_v38 }
0x2158   : > { %16700 = vmatpush3.msra.mxu1 %v13839_v25  ;;  %16701 = vmatprep.mubr.msk.f32.mxu1 %vm17477_vm0, %v17478_v1  ;;  %v15332_v25 = vld [vmem:[%s19433_s11 + $0xf8] sm:$0xff] }
0x2159   : > { %16709 = vmatprep.subr.mxu1 %v17478_v1  ;;  %v16936_v38 = vpack.c.bf16 %v15332_v25, %v15331_v37 }
0x215a   : > { %v13683_v40 = vpop.f32.mrb[162].mxu1 }
0x215b   : > { %v13610_v42 = vpop.f32.mrb[146].mxu0  ;;  %v16663_v27 = vpop.f32.mrb[163].mxu1  ;;  %16702 = vmatmul.mubr.msk.f32.vlgmr.msra.gmra.mrb[170].mxu1 %vm2026_vm3, %v13683_v40 }
0x215c   : > { %v16658_v43 = vpop.f32.mrb[147].mxu0  ;;  %16697 = vmatmul.mubr.msk.f32.vlgmr.msra.gmra.mrb[154].mxu0 %vm2026_vm3, %v13610_v42  ;;  %16710 = vmatpush3.msra.mxu1 %v13841_v39  ;;  %v15323_v42 = vld [vmem:[%s19431_s9 + $0x3] ss:$0 sm:$0xff] }
0x215d   : > { %16705 = vmatpush3.msra.mxu0 %v13840_v41  ;;  %16706 = vmatprep.mubr.msk.f32.mxu0 %vm17477_vm0, %v17478_v1  ;;  %v15324_v43 = vld [vmem:[%s19501_s20 + $0x3] ss:$0 sm:$0xff] }
0x215e   : > { %16711 = vmatprep.mubr.msk.f32.mxu1 %vm17477_vm0, %v17478_v1  ;;  %16926 = vmatprep.subr.bf16.mxu0 %v17476_v0 }
0x215f   : > { %16938 = vmatprep.subr.bf16.mxu1 %v17476_v0 }
0x2162   : > { %v13829_v45 = vpop.f32.mrb[164].mxu1 }
0x2163   : > { %v13756_v47 = vpop.f32.mrb[148].mxu0  ;;  %v16673_v9 = vpop.f32.mrb[165].mxu1  ;;  %16712 = vmatmul.mubr.msk.f32.vlgmr.msra.gmra.mrb[172].mxu1 %vm2026_vm3, %v13829_v45 }
0x2164   : > { %v16668_v34 = vpop.f32.mrb[149].mxu0  ;;  %16707 = vmatmul.mubr.msk.f32.vlgmr.msra.gmra.mrb[156].mxu0 %vm2026_vm3, %v13756_v47  ;;  %16741 = vmatprep.mubr.msk.f32.mxu1 %vm17477_vm0, %v17478_v1  ;;  %v15337_v9 = vld [vmem:[%s19502_s6 + $0x60] sm:$0xff] }
0x2165   : > { %16730 = vmatprep.mubr.msk.f32.mxu0 %vm17477_vm0, %v17478_v1  ;;  %16928 = vmatpush3.bf16.msra.mxu0 %v16927_v19  ;;  %v15338_v34 = vld [vmem:[%s19502_s6 + $0x68] sm:$0xff] }
0x2166   : > { %16929 = vmatprep.subr.bf16.mxu0 %v17476_v0 }
0x221e   : > { %v13984_v49 = vpop.f32.mrb[166].mxu1 }
0x221f   : > { %v13911_v36 = vpop.f32.mrb[150].mxu0  ;;  %v14427_v51 = vsel %vm752_vm1, %v13984_v49, 0.0  ;;  %v16683_v32 = vpop.f32.mrb[167].mxu1  ;;  %v16939_v49 = vpack.c.bf16 %v15338_v34, %v15337_v9 }
0x2220   : > { %v14426_v52 = vsel %vm752_vm1, %v13911_v36, 0.0  ;;  %v16678_v55 = vpop.f32.mrb[151].mxu0  ;;  %v15339_v36 = vld [vmem:[%s19502_s6 + $0x70] sm:$0xff] }
0x2221   : > { %v14428_v56 = vadd.f32 %v14427_v51, %v14426_v52  ;;  %16940 = vmatpush3.bf16.msra.mxu1 %v16939_v49  ;;  %v15340_v51 = vld [vmem:[%s19502_s6 + $0x78] sm:$0xff]  ;;  %v15334_v52 = vld [vmem:[%s19503_s4 + $0x3] ss:$0 sm:$0xff] }
0x2222   : > { %16941 = vmatprep.subr.bf16.mxu1 %v17476_v0  ;;  %v16942_v32 = vpack.c.bf16 %v15340_v51, %v15339_v36 }
0x2225   : > { %16943 = vmatpush3.bf16.msra.mxu1 %v16942_v32 }
0x2226   : > { %v14057_v58 = vpop.f32.mrb[152].mxu0 }
0x2227   : > { %v14429_v53 = vsel %vm752_vm1, %v14057_v58, 0.0  ;;  %v16688_v60 = vpop.f32.mrb[153].mxu0 }
0x2228   : > { %v14430_v61 = vadd.f32 %v14429_v53, %v14428_v56 }
0x222a   : > { %v14130_v26 = vpop.f32.mrb[168].mxu1 }
0x222b   : > { %v14431_v3 = vsel %vm752_vm1, %v14130_v26, 0.0  ;;  %v16693_v4 = vpop.f32.mrb[169].mxu1 }
0x222c   : > { %v14432_v7 = vadd.f32 %v14431_v3, %v14430_v61  ;;  %v15342_v3 = vld [vmem:[%s19504_s19 + $0x3] ss:$0 sm:$0xff] }
0x222e   : > { %v14276_v1 = vpop.f32.mrb[170].mxu1 }
0x222f   : > { %v14203_v5 = vpop.f32.mrb[154].mxu0  ;;  %v16703_v46 = vpop.f32.mrb[171].mxu1  ;;  %v14435_v57 = vsel %vm752_vm1, %v14276_v1, 0.0 }
0x2230   : > { %v14433_v50 = vsel %vm752_vm1, %v14203_v5, 0.0  ;;  %v16698_v10 = vpop.f32.mrb[155].mxu0 }
0x2231   : > { %v14434_v13 = vadd.f32 %v14433_v50, %v14432_v7 }
0x2233   : > { %v14436_v14 = vadd.f32 %v14435_v57, %v14434_v13 }
0x2236   : > { %v14422_v59 = vpop.f32.mrb[172].mxu1 }
0x2237   : > { %v14349_v15 = vpop.f32.mrb[156].mxu0  ;;  %v16713_v54 = vpop.f32.mrb[173].mxu1  ;;  %v14439_v2 = vsel %vm752_vm1, %v14422_v59, 0.0 }
0x2238   : > { %v14437_v16 = vsel %vm752_vm1, %v14349_v15, 0.0  ;;  %v16708_v63 = vpop.f32.mrb[157].mxu0 }
0x2239   : > { %v14438_v17 = vadd.f32 %v14437_v16, %v14436_v14  ;;  %v15346_v63 = vld [vmem:[%s19505_s30 + $0x3] ss:$0 sm:$0xff] }
0x223b   : > { %v14440_v20 = vadd.f32 %v14439_v2, %v14438_v17  ;;  %v15347_v2 = vld [vmem:[%s19506_s23 + $0x3] ss:$0 sm:$0xff] }
0x223d   : > { %v14449_v8 = vadd.f32 %v15320_v18, %v14440_v20 }
0x223f   : > { %v14450_v21 = vadd.f32 %v14449_v8, %v19007_v62  ;;  %v15327_v62 = vld [vmem:[%s19433_s11 + $0xd0] sm:$0xff] }
0x2240   : > { %v16930_v35 = vpack.c.bf16 %v15328_v33, %v15327_v62 }
0x2241   : > { %v14455_v12 = vsel %vm752_vm1, %v14450_v21, 0.0 }
0x2242   : > { %14456 = vadd.xlane.f32.xlu1 %v14455_v12  ;;  %16931 = vmatpush3.bf16.msra.mxu0 %v16930_v35 }
0x2243   : > { %16932 = vmatprep.subr.bf16.mxu0 %v17476_v0 }
0x2246   : > { %16934 = vmatpush3.bf16.msra.mxu0 %v16933_v28 }
0x2247   : > { %16935 = vmatprep.subr.bf16.mxu0 %v17476_v0 }
0x224a   : > { %16937 = vmatpush3.bf16.msra.mxu0 %v16936_v38 }
0x22cf   : > { %v14457_v11 = vpop.xlane.xlu1 %14456 }
0x22d0   : > { %v14458_v6 = vmul.f32 0.015625, %v14457_v11 }
0x22d2   : > { %v14459_v24 = vsub.f32 %v14450_v21, %v14458_v6 }
0x22d4   : > { %v14460_v48 = vmul.f32 %v14459_v24, %v14459_v24 }
0x22d6   : > { %v14461_v22 = vsel %vm752_vm1, %v14460_v48, 0.0 }
0x22d7   : > { %14462 = vadd.xlane.f32.xlu0 %v14461_v22 }
0x2364   : > { %v14463_v44 = vpop.xlane.xlu0 %14462 }
0x2365   : > { %v14464_v39 = vmul.f32 0.015625, %v14463_v44 }
0x2367   : > { %v14465_v40 = vadd.f32 1e-05, %v14464_v39 }
0x2369   : > { %17196 = vrsqrt.f32 %v14465_v40 }
0x2373   : > { %v17197_v41 = vpop.eup %17196 }
0x2374   : > { %v14467_v27 = vmul.f32 %v17197_v41, %v14459_v24 }
0x2376   : > { %v14474_v45 = vmul.f32 %v15323_v42, %v14467_v27 }
0x2378   : > { %v14481_v47 = vadd.f32 %v15324_v43, %v14474_v45 }
0x237a   : > { %16731 = vmatmul.mubr.msk.f32.vlgmr.msra.gmra.mrb[158].mxu0 %vm752_vm1, %v14481_v47 }
0x244d   : > { %v14568_v55 = vpop.f32.mrb[158].mxu0 }
0x244e   : > { %v14569_v56 = vadd.f32 %v15334_v52, %v14568_v55  ;;  %v16732_v58 = vpop.f32.mrb[159].mxu0 }
0x2450   : > { %v15336_v53 = vmul.f32 -1.442695, %v14569_v56 }
0x2452   : > { %17198 = vpow2.f32 %v15336_v53 }
0x245c   : > { %v17199_v0 = vpop.eup %17198 }
0x245d   : > { %v14575_v60 = vadd.f32 1.0, %v17199_v0 }
0x245f   : > { %17200 = vrcp.f32 %v14575_v60 }
0x2469   : > { %v17201_v61 = vpop.eup %17200 }
0x246a   : > { %v14578_v26 = vmul.f32 %v17201_v61, %v14569_v56 }
0x246c   : > { %16742 = vmatmul.mubr.msk.f32.vlgmr.msra.gmra.mrb[174].mxu1 %vm4072_vm4, %v14578_v26 }
0x253f   : > { %v14661_v4 = vpop.f32.mrb[174].mxu1 }
0x2540   : > { %v14662_v7 = vadd.f32 %v15342_v3, %v14661_v4  ;;  %v16743_v1 = vpop.f32.mrb[175].mxu1 }
0x2542   : > { %v14665_v5 = vadd.f32 %v14662_v7, %v14481_v47 }
0x2544   : > { %v14670_v46 = vsel %vm752_vm1, %v14665_v5, 0.0 }
0x2545   : > { %14671 = vadd.xlane.f32.xlu1 %v14670_v46 }
0x25d2   : > { %v14672_v50 = vpop.xlane.xlu1 %14671 }
0x25d3   : > { %v14673_v10 = vmul.f32 0.015625, %v14672_v50 }
0x25d5   : > { %v14674_v13 = vsub.f32 %v14665_v5, %v14673_v10 }
0x25d7   : > { %v14675_v57 = vmul.f32 %v14674_v13, %v14674_v13 }
0x25d9   : > { %v14676_v14 = vsel %vm752_vm1, %v14675_v57, 0.0 }
0x25da   : > { %14677 = vadd.xlane.f32.xlu0 %v14676_v14 }
0x2667   : > { %v14678_v59 = vpop.xlane.xlu0 %14677 }
0x2668   : > { %v14679_v15 = vmul.f32 0.015625, %v14678_v59 }
0x266a   : > { %v14680_v54 = vadd.f32 1e-05, %v14679_v15 }
0x266c   : > { %17202 = vrsqrt.f32 %v14680_v54 }
0x2676   : > { %v17203_v16 = vpop.eup %17202 }
0x2677   : > { %v14682_v17 = vmul.f32 %v17203_v16, %v14674_v13 }
0x2679   : > { %v14689_v18 = vmul.f32 %v15346_v63, %v14682_v17 }
0x267b   : > { %v14696_v20 = vadd.f32 %v15347_v2, %v14689_v18 }
0x267d   : > { %14697 = vst.msk [vmem:[%s671_s26] sm:$0xff] %vm752_vm1, %v14696_v20 }
0x267e   : > { %17395 = shalt.err (!%p17392_p4)
}
0x267f   : > { %s17396_s10 = scalar_lea.hbm %s19377_s12, 128  ;;  %s17400_s26 = scalar_lea.hbm %s19508_s1, 256 }
0x2680   : > { %p17397_p8 = scmp.ne.s32.totalorder %s19377_s12, %s17396_s10  ;;  %p17401_p11 = scmp.lt.u32.totalorder %s19377_s12, %s19508_s1 }
0x2681   : > { %p17402_p3 = scmp.lt.u32.totalorder %s17400_s26, %s17396_s10  ;;  %p17404_p13 = scmp.lt.u32.totalorder %s17396_s10, %s19377_s12 }
0x2682   : > { %p17398_p5 = pnand %p17397_p8, %p19509_p7 }
0x2683   : > { %p17403_p12 = por %p17402_p3, %p17401_p11 }
0x2684   : > { %p17399_p10 = pneg %p17398_p5 }
0x2685   : > { %p17405_p9 = por %p17404_p13, %p17403_p12 }
0x2687   : > { %p17406_p0 = pnand %p17405_p9, %p17399_p10 }
0x2689   : > { %17409 = shalt.err (!%p17406_p0)
}
0x268a   : > { %16964 = dma.vmem_to_hbm [thread:$0]  (%p19509_p7), %s19379_s2, 128, %s19377_s12, %s14699_s21  }
0x268b PF: > { %s14724_s17 = sand.u32 1, %s17452_s24   ;;  %p19510_p2 = scmp.ne.s32.totalorder %s19486_s29, 0 }
0x268c   : > { %p19511_p1 = scmp.ge.s32.totalorder %s17464_s27, 2  ;;  %s14725_s0 = scalar_lea.sflag [#allocation4], %s14724_s17 }
0x268e   : > { %p16987_p6 = pnand %p19511_p1, %p19510_p2 }
0x2690   : > { %17447 = dma.done.wait (!%p16987_p6), %s14725_s0, 128  }
0x2691   : > { %17449 = vsyncadd (!%p16987_p6), %s14725_s0, 4294967168  ;;  %s19512_s7 = sld [smem:[#allocation20_spill]]  ;;  %s19513_s26 = sld [smem:[#allocation21_spill]] }
0x2692   : > { %p35_p4 = scmp.ge.s32.totalorder %s17713_s18, 4   ;;  %s19514_s24 = smov %s17456_s25 }
0x2693   : > { %s19516_s27 = smov %s17713_s18 }
0x2694   :  { %37 = sbr.rel (!%p35_p4) target bundleno = 24 (0x18), region = 207 }
0x2697   : > { %s19515_s25 = smov %s19512_s7 }
0x269b   :  { %14730 = vsyncpa [#allocation3], 1 }
0x269c   :  { %14732 = vsyncpa [#allocation3 + $0x1], 1 }
0x269d   :  { %14733 = vsyncpa [#allocation6], 1 }
0x269e   :  { %14735 = vsyncpa [#allocation6 + $0x1], 1 }
0x269f   :  { %14736 = vsyncpa [#allocation9], 1 }
0x26a0   :  { %14737 = vsyncpa [#allocation12], 1 }
0x26a1   :  { %14738 = vsyncpa [#allocation4], 1 }
0x26a2   :  { %14740 = vsyncpa [#allocation4 + $0x1], 1 }

</bundles_post_ra>
